<compile_context>
chip_gen: v7x
topology: tpu7x:2x2x1
jax: 0.10.0
libtpu: 0.0.40
codegen_flags: <defaults>
</compile_context>

<pallas_src>
import functools

import jax
import jax.numpy as jnp
from jax.experimental import pallas as pl
from jax.experimental.pallas import tpu as pltpu


# --------------------------------------------------------------------------------------
# Kernel
# --------------------------------------------------------------------------------------
def _gnn_kernel(bdin_ref, bdout_ref, h_ref,
                w_h_ref, b_h_ref, w_ih_ref, b_gi_ref,
                o_ref, *, step, compute_dtype):
    """One batch-block per grid step.

    bdin/bdout : (1, M, M)   block-diagonal A_in / A_out (compute_dtype), M = Bb*N
    h / o      : (Bb, N, Hp) hidden state (lane-padded, f32)
    w_h        : (Hp, 5*Hp)  [W_ein | W_eout | W_hh_r | W_hh_i | W_hh_n] (compute_dtype)
    b_h        : (1, 5*Hp)   matching biases (f32)
    w_ih       : (2*Hp, 3*Hp) gate-input weights, rows = [in-half | out-half] (compute_dtype)
    b_gi       : (1, 3*Hp)   b_ih with b_iah/b_oah folded in (f32)
    """
    Bb, N, Hp = h_ref.shape
    M = Bb * N
    cd = compute_dtype

    # Load every operand exactly once; reused across all fused steps.
    bd_in = bdin_ref[0]          # (M, M)   already in compute_dtype
    bd_out = bdout_ref[0]        # (M, M)
    w_h = w_h_ref[...]           # (Hp, 5Hp)
    b_h = b_h_ref[...]           # (1, 5Hp)  f32
    w_ih = w_ih_ref[...]         # (2Hp, 3Hp)
    b_gi = b_gi_ref[...]         # (1, 3Hp)  f32

    def one_step(h2):            # h2: (M, Hp) f32
        # Single fused hidden projection: edge-in, edge-out and the three gh gates.
        proj = jnp.dot(h2.astype(cd), w_h, preferred_element_type=jnp.float32) + b_h
        h_in = proj[:, :Hp].astype(cd)            # 128-aligned lane slices: free
        h_out = proj[:, Hp:2 * Hp].astype(cd)
        gh = proj[:, 2 * Hp:]                     # (M, 3Hp) f32

        # Message passing as two MXU-shaped (M,M)@(M,Hp) matmuls (block-diagonal A).
        msg_in = jnp.dot(bd_in, h_in, preferred_element_type=jnp.float32)
        msg_out = jnp.dot(bd_out, h_out, preferred_element_type=jnp.float32)
        msgs = jnp.concatenate([msg_in, msg_out], axis=-1).astype(cd)   # (M, 2Hp)

        # Single gate-input projection, K = 2*Hp; b_iah/b_oah already folded into b_gi.
        gi = jnp.dot(msgs, w_ih, preferred_element_type=jnp.float32) + b_gi  # (M, 3Hp)

        i_r, i_i, i_n = gi[:, :Hp], gi[:, Hp:2 * Hp], gi[:, 2 * Hp:]
        h_r, h_i, h_n = gh[:, :Hp], gh[:, Hp:2 * Hp], gh[:, 2 * Hp:]
        resetgate = jax.nn.sigmoid(i_r + h_r)
        inputgate = jax.nn.sigmoid(i_i + h_i)
        newgate = jnp.tanh(i_n + resetgate * h_n)
        return newgate + inputgate * (h2 - newgate)

    h2 = h_ref[...].astype(jnp.float32).reshape(M, Hp)
    if step == 1:
        h2 = one_step(h2)
    else:
        # fori_loop bounds live ranges; unroll small step counts for LLO visibility.
        h2 = jax.lax.fori_loop(0, step, lambda _, h: one_step(h), h2,
                               unroll=bool(step <= 4))
    o_ref[...] = h2.reshape(Bb, N, Hp).astype(o_ref.dtype)


# --------------------------------------------------------------------------------------
# Wrapper helpers
# --------------------------------------------------------------------------------------
def _round_up(x, m):
    return ((x + m - 1) // m) * m


def _pick_batch_block(n_nodes, target_m=256):
    """Batch elements per grid step so M = Bb*N ~ target_m (fills the MXU)."""
    return max(1, -(-target_m // n_nodes))     # ceil(target_m / N)


def _prepare_params(params, H, Hp, compute_dtype):
    """Lane-pad all H-wide tensors to Hp, stack weights along lanes/K, fold biases."""
    f32 = jnp.float32
    hi = jax.lax.Precision.HIGHEST

    def pad_mat(w):   # (h0, h1) -> (Hp, Hp) zero-padded
        return jnp.pad(w, ((0, Hp - w.shape[0]), (0, Hp - w.shape[1])))

    def pad_vec(b):   # (H,) -> (1, Hp) zero-padded
        return jnp.pad(b, (0, Hp - b.shape[0]))[None, :]

    # Fused hidden projection  h2 @ [W_ein | W_eout | W_hh_r | W_hh_i | W_hh_n].
    w_hh_t = params["w_hh"].T                                   # (H, 3H)
    w_h_all = jnp.concatenate(
        [pad_mat(params["w_ein"].T), pad_mat(params["w_eout"].T)]
        + [pad_mat(w_hh_t[:, g * H:(g + 1) * H]) for g in range(3)], axis=1)   # (Hp, 5Hp)
    b_h_all = jnp.concatenate(
        [pad_vec(params["b_ein"]), pad_vec(params["b_eout"])]
        + [pad_vec(params["b_hh"][g * H:(g + 1) * H]) for g in range(3)], axis=1)  # (1, 5Hp)

    # Gate-input weights: rows = [input_in (Hp) | input_out (Hp)], cols = [r | i | n].
    w_ih_t = params["w_ih"].T                                   # (2H, 3H)
    w_ih_full = jnp.concatenate([
        jnp.concatenate([pad_mat(w_ih_t[h * H:(h + 1) * H, g * H:(g + 1) * H])
                         for g in range(3)], axis=1)
        for h in range(2)], axis=0)                             # (2Hp, 3Hp)

    # Fold b_iah / b_oah through w_ih into the gi bias (exact: padding is zero).
    b_io = jnp.concatenate([pad_vec(params["b_iah"]), pad_vec(params["b_oah"])], axis=1)
    b_ih_pad = jnp.concatenate([pad_vec(params["b_ih"][g * H:(g + 1) * H])
                                for g in range(3)], axis=1)     # (1, 3Hp)
    b_gi = b_ih_pad + jnp.dot(b_io, w_ih_full, precision=hi)    # (1, 3Hp)

    return (w_h_all.astype(compute_dtype), b_h_all.astype(f32),
            w_ih_full.astype(compute_dtype), b_gi.astype(f32))


def _block_diag_adjacency(A_half, nb, Bb, n_nodes, dtype):
    """(nb*Bb, N, N) compact per-graph adjacency -> (nb, Bb*N, Bb*N) block-diagonal."""
    M = Bb * n_nodes
    a = A_half.reshape(nb, Bb, n_nodes, n_nodes).astype(dtype)
    eye = jnp.eye(Bb, dtype=dtype)
    bd = a[:, :, :, None, :] * eye[None, :, None, :, None]      # (nb, Bb, N, Bb, N)
    return bd.reshape(nb, M, M)


# --------------------------------------------------------------------------------------
# Public forward
# --------------------------------------------------------------------------------------
def gnn_forward(A, hidden, params, step=1, compute_dtype=jnp.float32):
    """GNN.forward: A [B, N, 2N], hidden [B, N, H] -> [B, N, H]; all `step` iters fused."""
    B, N, H = hidden.shape
    assert A.shape == (B, N, 2 * N)

    Hp = _round_up(H, 128)               # lane-dense last dim for all H-wide tensors
    Bb = _pick_batch_block(N)            # batch elements per grid step (M = Bb*N >= 256)
    Bp = _round_up(B, Bb)                # pad batch UP instead of shrinking Bb
    nb = Bp // Bb
    M = Bb * N

    hidden_p = jnp.pad(hidden, ((0, Bp - B), (0, 0), (0, Hp - H)))
    A_p = jnp.pad(A, ((0, Bp - B), (0, 0), (0, 0)))
    bd_in = _block_diag_adjacency(A_p[:, :, :N], nb, Bb, N, compute_dtype)
    bd_out = _block_diag_adjacency(A_p[:, :, N:2 * N], nb, Bb, N, compute_dtype)

    w_h_all, b_h_all, w_ih_full, b_gi = _prepare_params(params, H, Hp, compute_dtype)

    kernel = functools.partial(_gnn_kernel, step=step, compute_dtype=compute_dtype)

    batched = lambda shape: pl.BlockSpec(shape, lambda b: (b, 0, 0))
    full2 = lambda shape: pl.BlockSpec(shape, lambda b: (0, 0))

    # TODO(synk): on v7x with large H, single-buffer the grid-invariant weight specs
    # (pipeline_mode=pl.Buffered(1)) before growing Bb further; not needed at these sizes.
    out = pl.pallas_call(
        kernel,
        out_shape=jax.ShapeDtypeStruct((Bp, N, Hp), hidden.dtype),
        grid=(nb,),
        in_specs=[
            batched((1, M, M)),             # block-diagonal A_in
            batched((1, M, M)),             # block-diagonal A_out
            batched((Bb, N, Hp)),           # hidden (lane-padded)
            full2((Hp, 5 * Hp)),            # fused hidden-projection weights
            full2((1, 5 * Hp)),             # fused hidden-projection biases
            full2((2 * Hp, 3 * Hp)),        # fused gate-input weights
            full2((1, 3 * Hp)),             # folded gi bias
        ],
        out_specs=batched((Bb, N, Hp)),
        compiler_params=pltpu.CompilerParams(
            dimension_semantics=("parallel",),
            vmem_limit_bytes=48 * 1024 * 1024),
    )(bd_in, bd_out, hidden_p, w_h_all, b_h_all, w_ih_full, b_gi)

    return out[:B, :, :H]


# --------------------------------------------------------------------------------------
# Pure-JAX reference (mirrors the PyTorch module exactly)
# --------------------------------------------------------------------------------------
def gnn_forward_ref(A, hidden, params, step=1):
    N = A.shape[1]
    for _ in range(step):
        h_in = hidden @ params["w_ein"].T + params["b_ein"]
        h_out = hidden @ params["w_eout"].T + params["b_eout"]
        input_in = jnp.matmul(A[:, :, :N], h_in) + params["b_iah"]
        input_out = jnp.matmul(A[:, :, N:2 * N], h_out) + params["b_oah"]
        inputs = jnp.concatenate([input_in, input_out], axis=2)
        gi = inputs @ params["w_ih"].T + params["b_ih"]
        gh = hidden @ params["w_hh"].T + params["b_hh"]
        i_r, i_i, i_n = jnp.split(gi, 3, axis=-1)
        h_r, h_i, h_n = jnp.split(gh, 3, axis=-1)
        resetgate = jax.nn.sigmoid(i_r + h_r)
        inputgate = jax.nn.sigmoid(i_i + h_i)
        newgate = jnp.tanh(i_n + resetgate * h_n)
        hidden = newgate + inputgate * (hidden - newgate)
    return hidden


def init_params(key, hidden_size):
    """Deterministic init; shapes match the PyTorch __init__ (canonical layout)."""
    H = hidden_size
    ks = jax.random.split(key, 10)
    scale = 1.0 / jnp.sqrt(jnp.float32(H))
    u = lambda k, shp: jax.random.uniform(k, shp, jnp.float32, -scale, scale)
    # NOTE: linear_edge_f exists in the PyTorch module but is unused in forward(); omitted.
    return {
        "w_ih": u(ks[0], (3 * H, 2 * H)),
        "w_hh": u(ks[1], (3 * H, H)),
        "b_ih": u(ks[2], (3 * H,)),
        "b_hh": u(ks[3], (3 * H,)),
        "b_iah": u(ks[4], (H,)),
        "b_oah": u(ks[5], (H,)),
        "w_ein": u(ks[6], (H, H)),
        "b_ein": u(ks[7], (H,)),
        "w_eout": u(ks[8], (H, H)),
        "b_eout": u(ks[9], (H,)),
    }


if __name__ == "__main__":
    B, N, H = 2, 8, 32

    key = jax.random.PRNGKey(0)
    k_a, k_h, k_p = jax.random.split(key, 3)
    A = jax.random.uniform(k_a, (B, N, 2 * N), jnp.float32)
    hidden = jax.random.normal(k_h, (B, N, H), jnp.float32)
    params = init_params(k_p, H)

    # f32 path: step=1 (module default), step=2 (unrolled fused recurrence),
    # step=5 (rolled in-kernel fori_loop recurrence).
    for step in (1, 2, 5):
        out = jax.block_until_ready(gnn_forward(A, hidden, params, step=step))
        ref = gnn_forward_ref(A, hidden, params, step=step)
        assert out.shape == (B, N, H)
        assert jnp.allclose(out, ref, atol=5e-4, rtol=5e-4), f"f32 mismatch (step={step})"

    # bf16 matmul-operand path (wide MXU on v6e/v7x); f32 accumulation + f32 gate math,
    # validated against the f32 reference with relaxed tolerance.
    out_bf16 = jax.block_until_ready(
        gnn_forward(A, hidden, params, step=1, compute_dtype=jnp.bfloat16))
    ref1 = gnn_forward_ref(A, hidden, params, step=1)
    assert jnp.allclose(out_bf16, ref1, atol=1e-1, rtol=1e-1), "bf16 mismatch (step=1)"

    print("KERNEL_OK")
</pallas_src>

<mosaic_0001>
module attributes {stable_mosaic.version = 11 : i64} {
  func.func @_gnn_kernel(%arg0: i32, %arg1: memref<1x256x256xf32, #tpu.memory_space<vmem>>, %arg2: memref<1x256x256xf32, #tpu.memory_space<vmem>>, %arg3: memref<32x8x128xf32, #tpu.memory_space<vmem>>, %arg4: memref<128x640xf32, #tpu.memory_space<vmem>>, %arg5: memref<1x640xf32, #tpu.memory_space<vmem>>, %arg6: memref<256x384xf32, #tpu.memory_space<vmem>>, %arg7: memref<1x384xf32, #tpu.memory_space<vmem>>, %arg8: memref<32x8x128xf32, #tpu.memory_space<vmem>>) attributes {dimension_semantics = [#tpu.dimension_semantics<parallel>], iteration_bounds = array<i64: 1>, scalar_prefetch = 0 : i64, scratch_operands = 0 : i64, tpu.core_type = #tpu.core_type<tc>, window_params = [{transform_indices = @transform_0, window_bounds = array<i64: 1, 256, 256>}, {transform_indices = @transform_1, window_bounds = array<i64: 1, 256, 256>}, {transform_indices = @transform_2, window_bounds = array<i64: 32, 8, 128>}, {pipeline_mode = #tpu.pipeline_mode<synchronous>, transform_indices = @transform_3, window_bounds = array<i64: 128, 640>}, {pipeline_mode = #tpu.pipeline_mode<synchronous>, transform_indices = @transform_4, window_bounds = array<i64: 1, 640>}, {pipeline_mode = #tpu.pipeline_mode<synchronous>, transform_indices = @transform_5, window_bounds = array<i64: 256, 384>}, {pipeline_mode = #tpu.pipeline_mode<synchronous>, transform_indices = @transform_6, window_bounds = array<i64: 1, 384>}, {transform_indices = @transform_7, window_bounds = array<i64: 32, 8, 128>}]} {
    %c0 = arith.constant 0 : index
    %c0_0 = arith.constant 0 : index
    %c0_1 = arith.constant 0 : index
    %0 = vector.load %arg1[%c0, %c0_0, %c0_1] : memref<1x256x256xf32, #tpu.memory_space<vmem>>, vector<1x256x256xf32>
    %1 = vector.shape_cast %0 : vector<1x256x256xf32> to vector<256x256xf32>
    %c0_2 = arith.constant 0 : index
    %c0_3 = arith.constant 0 : index
    %c0_4 = arith.constant 0 : index
    %2 = vector.load %arg2[%c0_2, %c0_3, %c0_4] : memref<1x256x256xf32, #tpu.memory_space<vmem>>, vector<1x256x256xf32>
    %3 = vector.shape_cast %2 : vector<1x256x256xf32> to vector<256x256xf32>
    %c0_5 = arith.constant 0 : index
    %c0_6 = arith.constant 0 : index
    %4 = vector.load %arg4[%c0_5, %c0_6] : memref<128x640xf32, #tpu.memory_space<vmem>>, vector<128x640xf32>
    %c0_7 = arith.constant 0 : index
    %c0_8 = arith.constant 0 : index
    %5 = vector.load %arg5[%c0_7, %c0_8] : memref<1x640xf32, #tpu.memory_space<vmem>>, vector<1x640xf32>
    %c0_9 = arith.constant 0 : index
    %c0_10 = arith.constant 0 : index
    %6 = vector.load %arg6[%c0_9, %c0_10] : memref<256x384xf32, #tpu.memory_space<vmem>>, vector<256x384xf32>
    %c0_11 = arith.constant 0 : index
    %c0_12 = arith.constant 0 : index
    %7 = vector.load %arg7[%c0_11, %c0_12] : memref<1x384xf32, #tpu.memory_space<vmem>>, vector<1x384xf32>
    %c0_13 = arith.constant 0 : index
    %c0_14 = arith.constant 0 : index
    %c0_15 = arith.constant 0 : index
    %8 = vector.load %arg3[%c0_13, %c0_14, %c0_15] : memref<32x8x128xf32, #tpu.memory_space<vmem>>, vector<32x8x128xf32>
    %9 = vector.shape_cast %8 : vector<32x8x128xf32> to vector<256x128xf32>
    %cst = arith.constant dense<0.000000e+00> : vector<256x640xf32>
    %10 = tpu.matmul %9, %4, %cst {dimension_numbers = #tpu.dot_dimension_numbers<[1], [0], [0], [1], [0, 0, 1, 1], [], []>} : vector<256x128xf32>, vector<128x640xf32>, vector<256x640xf32> -> vector<256x640xf32>
    %11 = vector.broadcast %5 : vector<1x640xf32> to vector<256x640xf32>
    %12 = arith.addf %10, %11 : vector<256x640xf32>
    %13 = vector.extract_strided_slice %12 {offsets = [0, 0], sizes = [256, 128], strides = [1, 1]} : vector<256x640xf32> to vector<256x128xf32>
    %14 = vector.extract_strided_slice %12 {offsets = [0, 128], sizes = [256, 128], strides = [1, 1]} : vector<256x640xf32> to vector<256x128xf32>
    %15 = vector.extract_strided_slice %12 {offsets = [0, 256], sizes = [256, 384], strides = [1, 1]} : vector<256x640xf32> to vector<256x384xf32>
    %cst_16 = arith.constant dense<0.000000e+00> : vector<256x128xf32>
    %16 = tpu.matmul %1, %13, %cst_16 {dimension_numbers = #tpu.dot_dimension_numbers<[1], [0], [0], [1], [0, 0, 1, 1], [], []>} : vector<256x256xf32>, vector<256x128xf32>, vector<256x128xf32> -> vector<256x128xf32>
    %cst_17 = arith.constant dense<0.000000e+00> : vector<256x128xf32>
    %17 = tpu.matmul %3, %14, %cst_17 {dimension_numbers = #tpu.dot_dimension_numbers<[1], [0], [0], [1], [0, 0, 1, 1], [], []>} : vector<256x256xf32>, vector<256x128xf32>, vector<256x128xf32> -> vector<256x128xf32>
    %18 = tpu.concatenate %16, %17 in 1 : vector<256x128xf32>, vector<256x128xf32> -> vector<256x256xf32>
    %cst_18 = arith.constant dense<0.000000e+00> : vector<256x384xf32>
    %19 = tpu.matmul %18, %6, %cst_18 {dimension_numbers = #tpu.dot_dimension_numbers<[1], [0], [0], [1], [0, 0, 1, 1], [], []>} : vector<256x256xf32>, vector<256x384xf32>, vector<256x384xf32> -> vector<256x384xf32>
    %20 = vector.broadcast %7 : vector<1x384xf32> to vector<256x384xf32>
    %21 = arith.addf %19, %20 : vector<256x384xf32>
    %22 = vector.extract_strided_slice %21 {offsets = [0, 0], sizes = [256, 128], strides = [1, 1]} : vector<256x384xf32> to vector<256x128xf32>
    %23 = vector.extract_strided_slice %21 {offsets = [0, 128], sizes = [256, 128], strides = [1, 1]} : vector<256x384xf32> to vector<256x128xf32>
    %24 = vector.extract_strided_slice %21 {offsets = [0, 256], sizes = [256, 128], strides = [1, 1]} : vector<256x384xf32> to vector<256x128xf32>
    %25 = vector.extract_strided_slice %15 {offsets = [0, 0], sizes = [256, 128], strides = [1, 1]} : vector<256x384xf32> to vector<256x128xf32>
    %26 = vector.extract_strided_slice %15 {offsets = [0, 128], sizes = [256, 128], strides = [1, 1]} : vector<256x384xf32> to vector<256x128xf32>
    %27 = vector.extract_strided_slice %15 {offsets = [0, 256], sizes = [256, 128], strides = [1, 1]} : vector<256x384xf32> to vector<256x128xf32>
    %28 = arith.addf %22, %25 : vector<256x128xf32>
    %29 = arith.negf %28 : vector<256x128xf32>
    %30 = math.exp %29 : vector<256x128xf32>
    %cst_19 = arith.constant 1.000000e+00 : f32
    %31 = vector.broadcast %cst_19 : f32 to vector<256x128xf32>
    %32 = arith.addf %31, %30 : vector<256x128xf32>
    %33 = arith.divf %31, %32 : vector<256x128xf32>
    %34 = arith.addf %23, %26 : vector<256x128xf32>
    %35 = arith.negf %34 : vector<256x128xf32>
    %36 = math.exp %35 : vector<256x128xf32>
    %cst_20 = arith.constant 1.000000e+00 : f32
    %37 = vector.broadcast %cst_20 : f32 to vector<256x128xf32>
    %38 = arith.addf %37, %36 : vector<256x128xf32>
    %39 = arith.divf %37, %38 : vector<256x128xf32>
    %40 = arith.mulf %33, %27 : vector<256x128xf32>
    %41 = arith.addf %24, %40 : vector<256x128xf32>
    %42 = math.tanh %41 : vector<256x128xf32>
    %43 = arith.subf %9, %42 : vector<256x128xf32>
    %44 = arith.mulf %39, %43 : vector<256x128xf32>
    %45 = arith.addf %42, %44 : vector<256x128xf32>
    %46 = vector.shape_cast %45 : vector<256x128xf32> to vector<32x8x128xf32>
    %c0_21 = arith.constant 0 : index
    %c0_22 = arith.constant 0 : index
    %c0_23 = arith.constant 0 : index
    %47 = vector.load %arg8[%c0_21, %c0_22, %c0_23] : memref<32x8x128xf32, #tpu.memory_space<vmem>>, vector<32x8x128xf32>
    tpu.vector_store %arg8[%c0_21, %c0_22, %c0_23], %46 {strides = array<i32>} : memref<32x8x128xf32, #tpu.memory_space<vmem>>, vector<32x8x128xf32>,
    return
  }
  func.func @transform_0(%arg0: i32) -> (i32, i32, i32) {
    %c0_i32 = arith.constant 0 : i32
    %c0_i32_0 = arith.constant 0 : i32
    %c0_i32_1 = arith.constant 0 : i32
    return %arg0, %c0_i32, %c0_i32_0 : i32, i32, i32
  }
  func.func @transform_1(%arg0: i32) -> (i32, i32, i32) {
    %c0_i32 = arith.constant 0 : i32
    %c0_i32_0 = arith.constant 0 : i32
    %c0_i32_1 = arith.constant 0 : i32
    return %arg0, %c0_i32, %c0_i32_0 : i32, i32, i32
  }
  func.func @transform_2(%arg0: i32) -> (i32, i32, i32) {
    %c0_i32 = arith.constant 0 : i32
    %c0_i32_0 = arith.constant 0 : i32
    %c0_i32_1 = arith.constant 0 : i32
    return %arg0, %c0_i32, %c0_i32_0 : i32, i32, i32
  }
  func.func @transform_3(%arg0: i32) -> (i32, i32) {
    %c0_i32 = arith.constant 0 : i32
    %c0_i32_0 = arith.constant 0 : i32
    %c0_i32_1 = arith.constant 0 : i32
    return %c0_i32, %c0_i32_0 : i32, i32
  }
  func.func @transform_4(%arg0: i32) -> (i32, i32) {
    %c0_i32 = arith.constant 0 : i32
    %c0_i32_0 = arith.constant 0 : i32
    %c0_i32_1 = arith.constant 0 : i32
    return %c0_i32, %c0_i32_0 : i32, i32
  }
  func.func @transform_5(%arg0: i32) -> (i32, i32) {
    %c0_i32 = arith.constant 0 : i32
    %c0_i32_0 = arith.constant 0 : i32
    %c0_i32_1 = arith.constant 0 : i32
    return %c0_i32, %c0_i32_0 : i32, i32
  }
  func.func @transform_6(%arg0: i32) -> (i32, i32) {
    %c0_i32 = arith.constant 0 : i32
    %c0_i32_0 = arith.constant 0 : i32
    %c0_i32_1 = arith.constant 0 : i32
    return %c0_i32, %c0_i32_0 : i32, i32
  }
  func.func @transform_7(%arg0: i32) -> (i32, i32, i32) {
    %c0_i32 = arith.constant 0 : i32
    %c0_i32_0 = arith.constant 0 : i32
    %c0_i32_1 = arith.constant 0 : i32
    return %arg0, %c0_i32, %c0_i32_0 : i32, i32, i32
  }
}

</mosaic_0001>

<bundles_post_ra>
// kernel: tpu_custom_call.1
= control target key start
LH: loop header
LB: loop body
LE: loop exit
PB: predicated region body
PF: predicated region fallthrough
CT: control target
= control target key end

     0   :  { %12 = vsyncpa [#allocation3], 0  ;;  %s5092_s0 = inlined_call_operand.hbm [shape: f32[1,256,256], index: 0, kind: input, shape index: {}]   ;;  %s5093_s1 = inlined_call_operand.hbm [shape: f32[1,256,256], index: 1, kind: input, shape index: {}]   ;;  %s5094_s2 = inlined_call_operand.hbm [shape: f32[32,8,128], index: 2, kind: input, shape index: {}]   ;;  %s5095_s3 = inlined_call_operand.hbm [shape: f32[128,640], index: 3, kind: input, shape index: {}]   ;;  %s5096_s4 = inlined_call_operand.vmem [shape: f32[1,640], index: 4, kind: input, shape index: {}]   ;;  %s5097_s5 = inlined_call_operand.hbm [shape: f32[256,384], index: 5, kind: input, shape index: {}]   ;;  %s5098_s6 = inlined_call_operand.vmem [shape: f32[1,384], index: 6, kind: input, shape index: {}]   ;;  %s5099_s7 = inlined_call_operand.hbm [shape: f32[32,8,128], index: 7, kind: output, shape index: {}]  }
   0x1   :  { %13 = vsyncpa [#allocation6], 0 }
   0x2   :  { %14 = vsyncpa [#allocation9], 0 }
   0x3   :  { %15 = vsyncpa [#allocation4], 0  ;;  %s4050_s24 = smov [#allocation5]   ;;  %s4051_s26 = smov [#allocation8]  }
   0x4   :  { %s33_s25 = sshll.u32 %s4050_s24, 4  ;;  %s57_s27 = sshll.u32 %s4051_s26, 4  ;;  %s34_s25 = int_to_ptr.vmem [resolvable:$true] %s33_s25  ;;  %s4106_s27 = int_to_ptr.vmem [resolvable:$true] %s57_s27 }
   0x5   :  { %s3910_s30 = scalar_lea.hbm %s5093_s1, 8192 }
   0x6   :  { %p3911_p0 = scmp.ne.s32.totalorder %s5093_s1, %s3910_s30  ;;  %p3914_p1 = scmp.lt.u32.totalorder %s3910_s30, %s5093_s1 }
   0x8   :  { %p3916_p2 = pnand %p3914_p1, %p3911_p0 }
   0xa   :  { %3919 = shalt.err (!%p3916_p2)
}
   0xb   :  { %s3920_s12 = scalar_lea.vmem %s34_s25, 8192  ;;  %p3925_p4 = scmp.lt.s32.totalorder %s34_s25, %s34_s25 }
   0xc   :  { %p3921_p3 = scmp.ne.s32.totalorder %s34_s25, %s3920_s12  ;;  %p3926_p5 = scmp.lt.s32.totalorder %s3920_s12, %s3920_s12 }
   0xe   :  { %p3927_p6 = por %p3926_p5, %p3925_p4 }
  0x10   :  { %p3928_p7 = pnand %p3927_p6, %p3921_p3 }
  0x12   :  { %3931 = shalt.err (!%p3928_p7)
}
  0x13   :  { %s4052_s13 = smov 256   ;;  %s4053_s14 = smov 16  }
  0x14   :  { %39 = dma.hbm_to_vmem [thread:$0]  %s5093_s1, 8192, %s34_s25, [#allocation6], %s4052_s13, %s4052_s13, %s4053_s14  }
  0x15   :  { %s3932_s19 = scalar_lea.hbm %s5095_s3, 10240 }
  0x16   :  { %p3933_p8 = scmp.ne.s32.totalorder %s5095_s3, %s3932_s19  ;;  %p3936_p9 = scmp.lt.u32.totalorder %s3932_s19, %s5095_s3 }
  0x18   :  { %p3938_p10 = pnand %p3936_p9, %p3933_p8 }
  0x1a   :  { %3941 = shalt.err (!%p3938_p10)
}
  0x1b   :  { %s3942_s24 = scalar_lea.vmem %s4106_s27, 10240  ;;  %p3947_p12 = scmp.lt.s32.totalorder %s4106_s27, %s4106_s27 }
  0x1c   :  { %p3943_p11 = scmp.ne.s32.totalorder %s4106_s27, %s3942_s24  ;;  %p3948_p13 = scmp.lt.s32.totalorder %s3942_s24, %s3942_s24 }
  0x1e   :  { %p3949_p0 = por %p3948_p13, %p3947_p12 }
  0x20   :  { %p3950_p1 = pnand %p3949_p0, %p3943_p11 }
  0x22   :  { %3953 = shalt.err (!%p3950_p1)
}
  0x23   :  { %s4054_s1 = smov 640   ;;  %s4055_s25 = smov 40  }
  0x24   :  { %63 = dma.hbm_to_vmem [thread:$0]  %s5095_s3, 10240, %s4106_s27, [#allocation9], %s4054_s1, %s4054_s1, %s4055_s25  }
  0x25   :  { %s4056_s29 = smov [#allocation2]   ;;  %s4057_s8 = smov [#allocation7]  }
  0x26   :  { %s21_s30 = sshll.u32 %s4056_s29, 4  ;;  %s45_s9 = sshll.u32 %s4057_s8, 4  ;;  %s22_s30 = int_to_ptr.vmem [resolvable:$true] %s21_s30  ;;  %s4140_s9 = int_to_ptr.vmem [resolvable:$true] %s45_s9 }
  0x27   :  { %s3954_s12 = scalar_lea.hbm %s5092_s0, 8192 }
  0x28   :  { %p3955_p2 = scmp.ne.s32.totalorder %s5092_s0, %s3954_s12  ;;  %p3958_p3 = scmp.lt.u32.totalorder %s3954_s12, %s5092_s0 }
  0x2a   :  { %p3960_p4 = pnand %p3958_p3, %p3955_p2 }
  0x2c   :  { %3963 = shalt.err (!%p3960_p4)
}
  0x2d   :  { %s3964_s3 = scalar_lea.vmem %s22_s30, 8192  ;;  %p3969_p6 = scmp.lt.s32.totalorder %s22_s30, %s22_s30 }
  0x2e   :  { %p3965_p5 = scmp.ne.s32.totalorder %s22_s30, %s3964_s3  ;;  %p3970_p7 = scmp.lt.s32.totalorder %s3964_s3, %s3964_s3 }
  0x30   :  { %p3971_p8 = por %p3970_p7, %p3969_p6 }
  0x32   :  { %p3972_p9 = pnand %p3971_p8, %p3965_p5 }
  0x34   :  { %3975 = shalt.err (!%p3972_p9)
}
  0x35   :  { %27 = dma.hbm_to_vmem [thread:$0]  %s5092_s0, 8192, %s22_s30, [#allocation3], %s4052_s13, %s4052_s13, %s4053_s14  }
  0x36   :  { %s3976_s22 = scalar_lea.hbm %s5094_s2, 4096 }
  0x37   :  { %p3977_p10 = scmp.ne.s32.totalorder %s5094_s2, %s3976_s22  ;;  %p3980_p11 = scmp.lt.u32.totalorder %s3976_s22, %s5094_s2 }
  0x39   :  { %p3982_p12 = pnand %p3980_p11, %p3977_p10 }
  0x3b   :  { %3985 = shalt.err (!%p3982_p12)
}
  0x3c   :  { %s3986_s26 = scalar_lea.vmem %s4140_s9, 4096  ;;  %p3991_p0 = scmp.lt.s32.totalorder %s4140_s9, %s4140_s9 }
  0x3d   :  { %p3987_p13 = scmp.ne.s32.totalorder %s4140_s9, %s3986_s26  ;;  %p3992_p1 = scmp.lt.s32.totalorder %s3986_s26, %s3986_s26 }
  0x3f   :  { %p3993_p2 = por %p3992_p1, %p3991_p0 }
  0x41   :  { %p3994_p3 = pnand %p3993_p2, %p3987_p13 }
  0x43   :  { %3997 = shalt.err (!%p3994_p3)
}
  0x44   :  { %s4058_s0 = smov 128   ;;  %s4059_s13 = smov 8  }
  0x45   :  { %51 = dma.hbm_to_vmem [thread:$0]  %s5094_s2, 4096, %s4140_s9, [#allocation6], %s4058_s0, %s4058_s0, %s4059_s13  }
  0x46   :  { %s4060_s29 = smov [#allocation10]   ;;  %s3998_s11 = scalar_lea.hbm %s5097_s5, 12288 }
  0x47   :  { %s71_s30 = sshll.u32 %s4060_s29, 4  ;;  %p3999_p4 = scmp.ne.s32.totalorder %s5097_s5, %s3998_s11  ;;  %s72_s30 = int_to_ptr.vmem [resolvable:$true] %s71_s30 }
  0x48   :  { %p4002_p5 = scmp.lt.u32.totalorder %s3998_s11, %s5097_s5 }
  0x4a   :  { %p4004_p6 = pnand %p4002_p5, %p3999_p4 }
  0x4c   :  { %4007 = shalt.err (!%p4004_p6)
}
  0x4d   :  { %s4008_s18 = scalar_lea.vmem %s72_s30, 12288  ;;  %p4013_p8 = scmp.lt.s32.totalorder %s72_s30, %s72_s30 }
  0x4e   :  { %p4009_p7 = scmp.ne.s32.totalorder %s72_s30, %s4008_s18  ;;  %p4014_p9 = scmp.lt.s32.totalorder %s4008_s18, %s4008_s18 }
  0x50   :  { %p4015_p10 = por %p4014_p9, %p4013_p8 }
  0x52   :  { %p4016_p11 = pnand %p4015_p10, %p4009_p7 }
  0x54   :  { %4019 = shalt.err (!%p4016_p11)
}
  0x55   :  { %s4061_s2 = smov 384   ;;  %s4062_s9 = smov 24  }
  0x56   :  { %77 = dma.hbm_to_vmem [thread:$0]  %s5097_s5, 12288, %s72_s30, [#allocation9], %s4061_s2, %s4061_s2, %s4062_s9  }
  0x57   :  { %4042 = dma.done.wait [#allocation3], 8192  }
  0x58   :  { %4043 = vsyncadd [#allocation3], 4294959104 }
  0x59   :  { %4044 = dma.done.wait [#allocation6], 12288  }
  0x5a   :  { %4045 = vsyncadd [#allocation6], 4294955008 }
  0x5b   :  { %4046 = dma.done.wait [#allocation9], 22528  }
  0x5c   :  { %4047 = vsyncadd [#allocation9], 4294944768  ;;  %v4063_v0 = vmov 0.0   ;;  %v224_v1 = vld [vmem:[#allocation8 + $0x8] sm:$0xff]  ;;  %v229_v2 = vld [vmem:[#allocation8 + $0x30] sm:$0xff] }
  0x5d   :  { %523 = vmatprep.mubr.f32.mxu0 %v4063_v0  ;;  %667 = vmatprep.mubr.f32.mxu1 %v4063_v0  ;;  %v223_v3 = vld [vmem:[#allocation8] sm:$0xff]  ;;  %v3029_v4 = vpack.c.bf16 %v229_v2, %v224_v1  ;;  %v228_v5 = vld [vmem:[#allocation8 + $0x28] sm:$0xff]  ;;  %v234_v6 = vld [vmem:[#allocation8 + $0x58] sm:$0xff] }
  0x5e   :  { %v239_v7 = vld [vmem:[#allocation8 + $0x80] sm:$0xff]  ;;  %v3031_v8 = vpack.c.bf16 %v228_v5, %v223_v3  ;;  %v233_v10 = vld [vmem:[#allocation8 + $0x50] sm:$0xff]  ;;  %v238_v11 = vld [vmem:[#allocation8 + $0x78] sm:$0xff] }
  0x5f   :  { %v3033_v9 = vpack.c.bf16 %v239_v7, %v234_v6  ;;  %v244_v12 = vld [vmem:[#allocation8 + $0xa8] sm:$0xff]  ;;  %3030 = vmatprep.subr.bf16.mxu0 %v3029_v4  ;;  %v249_v13 = vld [vmem:[#allocation8 + $0xd0] sm:$0xff]  ;;  %3333 = vmatprep.subr.bf16.mxu1 %v3029_v4  ;;  %v3035_v14 = vpack.c.bf16 %v238_v11, %v233_v10  ;;  %v243_v16 = vld [vmem:[#allocation8 + $0xa0] sm:$0xff] }
  0x60   :  { %3032 = vmatpush1.bf16.msra.mxu0 %v3031_v8  ;;  %3341 = vmatpush1.bf16.msra.mxu1 %v3031_v8  ;;  %v3037_v15 = vpack.c.bf16 %v249_v13, %v244_v12  ;;  %v248_v17 = vld [vmem:[#allocation8 + $0xc8] sm:$0xff]  ;;  %v254_v18 = vld [vmem:[#allocation8 + $0xf8] sm:$0xff]  ;;  %v259_v19 = vld [vmem:[#allocation8 + $0x120] sm:$0xff] }
  0x61   :  { %3034 = vmatprep.subr.bf16.mxu0 %v3033_v9  ;;  %3334 = vmatprep.subr.bf16.mxu1 %v3033_v9  ;;  %v3039_v20 = vpack.c.bf16 %v248_v17, %v243_v16  ;;  %v3041_v21 = vpack.c.bf16 %v259_v19, %v254_v18  ;;  %v253_v22 = vld [vmem:[#allocation8 + $0xf0] sm:$0xff]  ;;  %v258_v23 = vld [vmem:[#allocation8 + $0x118] sm:$0xff]  ;;  %v264_v24 = vld [vmem:[#allocation8 + $0x148] sm:$0xff] }
  0x62   :  { %v269_v25 = vld [vmem:[#allocation8 + $0x170] sm:$0xff]  ;;  %v3043_v26 = vpack.c.bf16 %v258_v23, %v253_v22  ;;  %v263_v28 = vld [vmem:[#allocation8 + $0x140] sm:$0xff]  ;;  %v268_v29 = vld [vmem:[#allocation8 + $0x168] sm:$0xff] }
  0x63   :  { %v3045_v27 = vpack.c.bf16 %v269_v25, %v264_v24  ;;  %v274_v30 = vld [vmem:[#allocation8 + $0x198] sm:$0xff]  ;;  %v279_v31 = vld [vmem:[#allocation8 + $0x1c0] sm:$0xff]  ;;  %v3047_v32 = vpack.c.bf16 %v268_v29, %v263_v28  ;;  %v273_v34 = vld [vmem:[#allocation8 + $0x190] sm:$0xff] }
  0x64   :  { %3036 = vmatpush1.bf16.msra.mxu0 %v3035_v14  ;;  %3342 = vmatpush1.bf16.msra.mxu1 %v3035_v14  ;;  %v3049_v33 = vpack.c.bf16 %v279_v31, %v274_v30  ;;  %v278_v35 = vld [vmem:[#allocation8 + $0x1b8] sm:$0xff]  ;;  %v284_v36 = vld [vmem:[#allocation8 + $0x1e8] sm:$0xff]  ;;  %v289_v37 = vld [vmem:[#allocation8 + $0x210] sm:$0xff] }
  0x65   :  { %3038 = vmatprep.subr.bf16.mxu0 %v3037_v15  ;;  %3335 = vmatprep.subr.bf16.mxu1 %v3037_v15  ;;  %v3051_v38 = vpack.c.bf16 %v278_v35, %v273_v34  ;;  %v3053_v39 = vpack.c.bf16 %v289_v37, %v284_v36  ;;  %v283_v40 = vld [vmem:[#allocation8 + $0x1e0] sm:$0xff]  ;;  %v288_v41 = vld [vmem:[#allocation8 + $0x208] sm:$0xff]  ;;  %v294_v42 = vld [vmem:[#allocation8 + $0x238] sm:$0xff] }
  0x66   :  { %v299_v43 = vld [vmem:[#allocation8 + $0x260] sm:$0xff]  ;;  %v3055_v44 = vpack.c.bf16 %v288_v41, %v283_v40  ;;  %v293_v46 = vld [vmem:[#allocation8 + $0x230] sm:$0xff]  ;;  %v298_v47 = vld [vmem:[#allocation8 + $0x258] sm:$0xff] }
  0x67   :  { %v3057_v45 = vpack.c.bf16 %v299_v43, %v294_v42  ;;  %v226_v48 = vld [vmem:[#allocation8 + $0x18] sm:$0xff]  ;;  %v231_v49 = vld [vmem:[#allocation8 + $0x40] sm:$0xff]  ;;  %v3059_v50 = vpack.c.bf16 %v298_v47, %v293_v46  ;;  %v232_v52 = vld [vmem:[#allocation8 + $0x48] sm:$0xff] }
  0x68   :  { %3040 = vmatpush1.bf16.msra.mxu0 %v3039_v20  ;;  %3343 = vmatpush1.bf16.msra.mxu1 %v3039_v20  ;;  %v227_v51 = vld [vmem:[#allocation8 + $0x20] sm:$0xff]  ;;  %v3061_v53 = vpack.c.bf16 %v231_v49, %v226_v48  ;;  %v225_v55 = vld [vmem:[#allocation8 + $0x10] sm:$0xff]  ;;  %v230_v56 = vld [vmem:[#allocation8 + $0x38] sm:$0xff] }
  0x69   :  { %3042 = vmatprep.subr.bf16.mxu0 %v3041_v21  ;;  %3336 = vmatprep.subr.bf16.mxu1 %v3041_v21  ;;  %v3093_v54 = vpack.c.bf16 %v232_v52, %v227_v51  ;;  %v236_v57 = vld [vmem:[#allocation8 + $0x68] sm:$0xff]  ;;  %v241_v58 = vld [vmem:[#allocation8 + $0x90] sm:$0xff]  ;;  %v242_v60 = vld [vmem:[#allocation8 + $0x98] sm:$0xff]  ;;  %v3063_v63 = vpack.c.bf16 %v230_v56, %v225_v55 }
  0x6a   :  { %v237_v59 = vld [vmem:[#allocation8 + $0x70] sm:$0xff]  ;;  %v4191_v61 = vld [vmem:[#allocation7] sm:$0xff]  ;;  %v3065_v1 = vpack.c.bf16 %v241_v58, %v236_v57  ;;  %v240_v3 = vld [vmem:[#allocation8 + $0x88] sm:$0xff] }
  0x6b   :  { %v4193_v62 = vld [vmem:[#allocation7 + $0xc0] sm:$0xff]  ;;  %v246_v4 = vld [vmem:[#allocation8 + $0xb8] sm:$0xff]  ;;  %v3097_v5 = vpack.c.bf16 %v242_v60, %v237_v59  ;;  %v252_v8 = vld [vmem:[#allocation8 + $0xe8] sm:$0xff] }
  0x6c   :  { %3044 = vmatpush1.bf16.msra.mxu0 %v3043_v26  ;;  %3344 = vmatpush1.bf16.msra.mxu1 %v3043_v26  ;;  %v235_v2 = vld [vmem:[#allocation8 + $0x60] sm:$0xff]  ;;  %v4198_v9 = vld [vmem:[#allocation7 + $0x8] sm:$0xff]  ;;  %v245_v13 = vld [vmem:[#allocation8 + $0xb0] sm:$0xff] }
  0x6d   :  { %3046 = vmatprep.subr.bf16.mxu0 %v3045_v27  ;;  %3337 = vmatprep.subr.bf16.mxu1 %v3045_v27  ;;  %v251_v6 = vld [vmem:[#allocation8 + $0xe0] sm:$0xff]  ;;  %v4201_v10 = vld [vmem:[#allocation7 + $0xc8] sm:$0xff]  ;;  %v3067_v11 = vpack.c.bf16 %v240_v3, %v235_v2  ;;  %v250_v14 = vld [vmem:[#allocation8 + $0xd8] sm:$0xff] }
  0x6e   :  { %v247_v7 = vld [vmem:[#allocation8 + $0xc0] sm:$0xff]  ;;  %v3069_v12 = vpack.c.bf16 %v251_v6, %v246_v4  ;;  %v256_v15 = vld [vmem:[#allocation8 + $0x108] sm:$0xff]  ;;  %v261_v17 = vld [vmem:[#allocation8 + $0x130] sm:$0xff]  ;;  %v3071_v22 = vpack.c.bf16 %v250_v14, %v245_v13 }
  0x6f   :  { %v3101_v16 = vpack.c.bf16 %v252_v8, %v247_v7  ;;  %v257_v18 = vld [vmem:[#allocation8 + $0x110] sm:$0xff]  ;;  %v262_v19 = vld [vmem:[#allocation8 + $0x138] sm:$0xff]  ;;  %v3073_v23 = vpack.c.bf16 %v261_v17, %v256_v15  ;;  %v255_v24 = vld [vmem:[#allocation8 + $0x100] sm:$0xff] }
  0x70   :  { %3048 = vmatpush1.bf16.msra.mxu0 %v3047_v32  ;;  %3345 = vmatpush1.bf16.msra.mxu1 %v3047_v32  ;;  %v4206_v20 = vld [vmem:[#allocation7 + $0x10] sm:$0xff]  ;;  %v260_v25 = vld [vmem:[#allocation8 + $0x128] sm:$0xff]  ;;  %v266_v26 = vld [vmem:[#allocation8 + $0x158] sm:$0xff]  ;;  %v3105_v27 = vpack.c.bf16 %v262_v19, %v257_v18 }
  0x71   :  { %3050 = vmatprep.subr.bf16.mxu0 %v3049_v33  ;;  %3338 = vmatprep.subr.bf16.mxu1 %v3049_v33  ;;  %v4209_v21 = vld [vmem:[#allocation7 + $0xd0] sm:$0xff]  ;;  %v271_v28 = vld [vmem:[#allocation8 + $0x180] sm:$0xff]  ;;  %v272_v30 = vld [vmem:[#allocation8 + $0x188] sm:$0xff]  ;;  %v3075_v33 = vpack.c.bf16 %v260_v25, %v255_v24 }
  0x72   :  { %v267_v29 = vld [vmem:[#allocation8 + $0x160] sm:$0xff]  ;;  %v4214_v31 = vld [vmem:[#allocation7 + $0x18] sm:$0xff]  ;;  %v3077_v34 = vpack.c.bf16 %v271_v28, %v266_v26  ;;  %v265_v35 = vld [vmem:[#allocation8 + $0x150] sm:$0xff] }
  0x73   :  { %v4217_v32 = vld [vmem:[#allocation7 + $0xd8] sm:$0xff]  ;;  %v276_v37 = vld [vmem:[#allocation8 + $0x1a8] sm:$0xff]  ;;  %v277_v40 = vld [vmem:[#allocation8 + $0x1b0] sm:$0xff] }
  0x74   :  { %3052 = vmatpush1.bf16.msra.mxu0 %v3051_v38  ;;  %3346 = vmatpush1.bf16.msra.mxu1 %v3051_v38  ;;  %v270_v36 = vld [vmem:[#allocation8 + $0x178] sm:$0xff]  ;;  %v3109_v38 = vpack.c.bf16 %v272_v30, %v267_v29  ;;  %v4222_v42 = vld [vmem:[#allocation7 + $0x20] sm:$0xff]  ;;  %v280_v47 = vld [vmem:[#allocation8 + $0x1c8] sm:$0xff] }
  0x75   :  { %3054 = vmatprep.subr.bf16.mxu0 %v3053_v39  ;;  %3339 = vmatprep.subr.bf16.mxu1 %v3053_v39  ;;  %v281_v39 = vld [vmem:[#allocation8 + $0x1d0] sm:$0xff]  ;;  %v282_v41 = vld [vmem:[#allocation8 + $0x1d8] sm:$0xff]  ;;  %v4225_v43 = vld [vmem:[#allocation7 + $0xe0] sm:$0xff] }
  0x76   :  { %v275_v46 = vld [vmem:[#allocation8 + $0x1a0] sm:$0xff]  ;;  %v3113_v48 = vpack.c.bf16 %v282_v41, %v277_v40  ;;  %v286_v49 = vld [vmem:[#allocation8 + $0x1f8] sm:$0xff]  ;;  %v4230_v51 = vld [vmem:[#allocation7 + $0x28] sm:$0xff] }
  0x77   :  { %v4233_v52 = vld [vmem:[#allocation7 + $0xe8] sm:$0xff]  ;;  %v285_v55 = vld [vmem:[#allocation8 + $0x1f0] sm:$0xff]  ;;  %v290_v56 = vld [vmem:[#allocation8 + $0x218] sm:$0xff] }
  0x78   :  { %3056 = vmatpush1.bf16.msra.mxu0 %v3055_v44  ;;  %3347 = vmatpush1.bf16.msra.mxu1 %v3055_v44  ;;  %v3079_v44 = vpack.c.bf16 %v270_v36, %v265_v35  ;;  %v296_v57 = vld [vmem:[#allocation8 + $0x248] sm:$0xff]  ;;  %v301_v58 = vld [vmem:[#allocation8 + $0x270] sm:$0xff]  ;;  %v295_v2 = vld [vmem:[#allocation8 + $0x240] sm:$0xff]  ;;  %v4064_v35 = vmov 0.0|0.0  }
  0x79   :  { %3058 = vmatprep.subr.bf16.mxu0 %v3057_v45  ;;  %3340 = vmatprep.subr.bf16.mxu1 %v3057_v45  ;;  %v3081_v45 = vpack.c.bf16 %v281_v39, %v276_v37  ;;  %v4238_v59 = vld [vmem:[#allocation7 + $0x30] sm:$0xff]  ;;  %v300_v3 = vld [vmem:[#allocation8 + $0x268] sm:$0xff]  ;;  %v4246_v4 = vld [vmem:[#allocation7 + $0x38] sm:$0xff] }
  0x7a   :  { %v4241_v60 = vld [vmem:[#allocation7 + $0xf0] sm:$0xff]  ;;  %v3091_v6 = vpack.c.bf16 %v300_v3, %v295_v2  ;;  %v4254_v7 = vld [vmem:[#allocation7 + $0x40] sm:$0xff]  ;;  %v4259_v8 = vld [vmem:[#allocation7 + $0x48] sm:$0xff] }
  0x7b   :  { %v4277_v13 = vld [vmem:[#allocation7 + $0x60] sm:$0xff]  ;;  %v4283_v14 = vld [vmem:[#allocation7 + $0x68] sm:$0xff]  ;;  %v4289_v15 = vld [vmem:[#allocation7 + $0x70] sm:$0xff] }
  0x7c   :  { %3060 = vmatpush1.bf16.msra.mxu0 %v3059_v50  ;;  %3348 = vmatpush1.bf16.msra.mxu1 %v3059_v50  ;;  %v291_v50 = vld [vmem:[#allocation8 + $0x220] sm:$0xff]  ;;  %v4307_v18 = vld [vmem:[#allocation7 + $0x88] sm:$0xff]  ;;  %v4313_v19 = vld [vmem:[#allocation7 + $0x90] sm:$0xff] }
  0x7d   :  { %3062 = vmatprep.subr.bf16.mxu1 %v3061_v53  ;;  %3094 = vmatprep.subr.bf16.mxu0 %v3093_v54  ;;  %v3083_v53 = vpack.c.bf16 %v280_v47, %v275_v46  ;;  %v4301_v17 = vld [vmem:[#allocation7 + $0x80] sm:$0xff]  ;;  %v4331_v24 = vld [vmem:[#allocation7 + $0xa8] sm:$0xff]  ;;  %v423_v28 = vld [vmem:[#allocation7 + $0xb0] sm:$0xff] }
  0x7e   :  { %v287_v25 = vld [vmem:[#allocation8 + $0x200] sm:$0xff]  ;;  %v292_v26 = vld [vmem:[#allocation8 + $0x228] sm:$0xff]  ;;  %v297_v29 = vld [vmem:[#allocation8 + $0x250] sm:$0xff] }
  0x7f   :  { %524 = vmatmul.mubr.f32.vlgmr.msra.gmra.mrb[0].mxu0 %v4191_v61  ;;  %668 = vmatmul.mubr.f32.vlgmr.msra.gmra.mrb[0].mxu1 %v4193_v62  ;;  %v302_v30 = vld [vmem:[#allocation8 + $0x278] sm:$0xff] }
  0x80   :  { %529 = vmatprep.mubr.f32.mxu0 %v4063_v0  ;;  %673 = vmatprep.mubr.f32.mxu1 %v4063_v0 }
  0x81   :  { %3064 = vmatpush1.bf16.msra.mxu1 %v3063_v63  ;;  %3096 = vmatpush3.bf16.msra.mxu0 %v3093_v54  ;;  %v3085_v54 = vpack.c.bf16 %v291_v50, %v286_v49  ;;  %v3087_v63 = vpack.c.bf16 %v290_v56, %v285_v55 }
  0x82   :  { %3066 = vmatprep.subr.bf16.mxu1 %v3065_v1  ;;  %3098 = vmatprep.subr.bf16.mxu0 %v3097_v5  ;;  %v3089_v1 = vpack.c.bf16 %v301_v58, %v296_v57 }
  0x83   :  { %530 = vmatmul.mubr.f32.gmra.mrb[2].mxu0 %v4198_v9  ;;  %674 = vmatmul.mubr.f32.gmra.mrb[2].mxu1 %v4201_v10 }
  0x84   :  { %535 = vmatprep.mubr.f32.mxu0 %v4063_v0  ;;  %679 = vmatprep.mubr.f32.mxu1 %v4063_v0 }
  0x85   :  { %3068 = vmatpush1.bf16.msra.mxu1 %v3067_v11  ;;  %3100 = vmatpush3.bf16.msra.mxu0 %v3097_v5  ;;  %v4249_v5 = vld [vmem:[#allocation7 + $0xf8] sm:$0xff]  ;;  %v4265_v11 = vld [vmem:[#allocation7 + $0x50] sm:$0xff] }
  0x86   :  { %3070 = vmatprep.subr.bf16.mxu1 %v3069_v12  ;;  %3102 = vmatprep.subr.bf16.mxu0 %v3101_v16  ;;  %v4271_v12 = vld [vmem:[#allocation7 + $0x58] sm:$0xff] }
  0x87   :  { %536 = vmatmul.mubr.f32.gmra.mrb[4].mxu0 %v4206_v20  ;;  %680 = vmatmul.mubr.f32.gmra.mrb[4].mxu1 %v4209_v21 }
  0x88   :  { %541 = vmatprep.mubr.f32.mxu0 %v4063_v0  ;;  %685 = vmatprep.mubr.f32.mxu1 %v4063_v0 }
  0x89   :  { %3072 = vmatpush1.bf16.msra.mxu1 %v3071_v22  ;;  %3104 = vmatpush3.bf16.msra.mxu0 %v3101_v16  ;;  %v4295_v16 = vld [vmem:[#allocation7 + $0x78] sm:$0xff] }
  0x8a   :  { %3074 = vmatprep.subr.bf16.mxu1 %v3073_v23  ;;  %3106 = vmatprep.subr.bf16.mxu0 %v3105_v27  ;;  %v4319_v22 = vld [vmem:[#allocation7 + $0x98] sm:$0xff]  ;;  %v4325_v23 = vld [vmem:[#allocation7 + $0xa0] sm:$0xff] }
  0x8b   :  { %542 = vmatmul.mubr.f32.gmra.mrb[6].mxu0 %v4214_v31  ;;  %686 = vmatmul.mubr.f32.gmra.mrb[6].mxu1 %v4217_v32 }
  0x8c   :  { %547 = vmatprep.mubr.f32.mxu0 %v4063_v0  ;;  %691 = vmatprep.mubr.f32.mxu1 %v4063_v0 }
  0x8d   :  { %3076 = vmatpush1.bf16.msra.mxu1 %v3075_v33  ;;  %3108 = vmatpush3.bf16.msra.mxu0 %v3105_v27  ;;  %v3117_v27 = vpack.c.bf16 %v292_v26, %v287_v25  ;;  %v3121_v33 = vpack.c.bf16 %v302_v30, %v297_v29 }
  0x8e   :  { %3078 = vmatprep.subr.bf16.mxu1 %v3077_v34  ;;  %3110 = vmatprep.subr.bf16.mxu0 %v3109_v38  ;;  %v424_v34 = vld [vmem:[#allocation7 + $0xb8] sm:$0xff] }
  0x8f   :  { %548 = vmatmul.mubr.f32.gmra.mrb[8].mxu0 %v4222_v42  ;;  %692 = vmatmul.mubr.f32.gmra.mrb[8].mxu1 %v4225_v43 }
  0x90   :  { %553 = vmatprep.mubr.f32.mxu0 %v4063_v0  ;;  %697 = vmatprep.mubr.f32.mxu1 %v4063_v0 }
  0x91   :  { %3080 = vmatpush1.bf16.msra.mxu1 %v3079_v44  ;;  %3112 = vmatpush3.bf16.msra.mxu0 %v3109_v38 }
  0x92   :  { %3082 = vmatprep.subr.bf16.mxu1 %v3081_v45  ;;  %3114 = vmatprep.subr.bf16.mxu0 %v3113_v48 }
  0x93   :  { %554 = vmatmul.mubr.f32.gmra.mrb[10].mxu0 %v4230_v51  ;;  %698 = vmatmul.mubr.f32.gmra.mrb[10].mxu1 %v4233_v52 }
  0x94   :  { %559 = vmatprep.mubr.f32.mxu0 %v4063_v0  ;;  %703 = vmatprep.mubr.f32.mxu1 %v4063_v0 }
  0x95   :  { %3084 = vmatpush1.bf16.msra.mxu1 %v3083_v53  ;;  %3116 = vmatpush3.bf16.msra.mxu0 %v3113_v48 }
  0x96   :  { %3086 = vmatprep.subr.bf16.mxu1 %v3085_v54  ;;  %3118 = vmatprep.subr.bf16.mxu0 %v3117_v27 }
  0x97   :  { %560 = vmatmul.mubr.f32.gmra.mrb[12].mxu0 %v4238_v59  ;;  %704 = vmatmul.mubr.f32.gmra.mrb[12].mxu1 %v4241_v60 }
  0x98   :  { %565 = vmatprep.mubr.f32.mxu0 %v4063_v0  ;;  %709 = vmatprep.mubr.f32.mxu1 %v4063_v0 }
  0x99   :  { %3088 = vmatpush1.bf16.msra.mxu1 %v3087_v63  ;;  %3120 = vmatpush3.bf16.msra.mxu0 %v3117_v27 }
  0x9a   :  { %3090 = vmatprep.subr.bf16.mxu1 %v3089_v1  ;;  %3122 = vmatprep.subr.bf16.mxu0 %v3121_v33 }
  0x9b   :  { %566 = vmatmul.mubr.f32.gmra.mrb[14].mxu0 %v4246_v4  ;;  %710 = vmatmul.mubr.f32.gmra.mrb[14].mxu1 %v4249_v5 }
  0x9c   :  { %571 = vmatprep.mubr.f32.mxu0 %v4063_v0  ;;  %780 = vmatprep.mubr.f32.mxu1 %v4063_v0 }
  0x9d   :  { %3092 = vmatpush1.bf16.msra.mxu1 %v3091_v6  ;;  %3124 = vmatpush3.bf16.msra.mxu0 %v3121_v33 }
  0x9e   :  { %3125 = vmatprep.subr.bf16.mxu1 %v4064_v35  ;;  %3173 = vmatprep.subr.bf16.mxu0 %v4064_v35 }
  0x9f   :  { %572 = vmatmul.mubr.f32.gmra.mrb[16].mxu0 %v4254_v7 }
  0xa0   :  { %577 = vmatprep.mubr.f32.mxu0 %v4063_v0  ;;  %781 = vmatmul.mubr.f32.vlgmr.msra.gmra.mrb[16].mxu1 %v4191_v61 }
  0xa1   :  { %786 = vmatprep.mubr.f32.mxu1 %v4063_v0 }
  0xa3   :  { %578 = vmatmul.mubr.f32.gmra.mrb[18].mxu0 %v4259_v8 }
  0xa4   :  { %583 = vmatprep.mubr.f32.mxu0 %v4063_v0  ;;  %787 = vmatmul.mubr.f32.gmra.mrb[18].mxu1 %v4198_v9 }
  0xa5   :  { %792 = vmatprep.mubr.f32.mxu1 %v4063_v0 }
  0xa7   :  { %584 = vmatmul.mubr.f32.gmra.mrb[20].mxu0 %v4265_v11 }
  0xa8   :  { %589 = vmatprep.mubr.f32.mxu0 %v4063_v0  ;;  %793 = vmatmul.mubr.f32.gmra.mrb[20].mxu1 %v4206_v20 }
  0xa9   :  { %798 = vmatprep.mubr.f32.mxu1 %v4063_v0 }
  0xab   :  { %590 = vmatmul.mubr.f32.gmra.mrb[22].mxu0 %v4271_v12 }
  0xac   :  { %595 = vmatprep.mubr.f32.mxu0 %v4063_v0  ;;  %799 = vmatmul.mubr.f32.gmra.mrb[22].mxu1 %v4214_v31 }
  0xad   :  { %804 = vmatprep.mubr.f32.mxu1 %v4063_v0 }
  0xaf   :  { %596 = vmatmul.mubr.f32.gmra.mrb[24].mxu0 %v4277_v13 }
  0xb0   :  { %601 = vmatprep.mubr.f32.mxu0 %v4063_v0  ;;  %805 = vmatmul.mubr.f32.gmra.mrb[24].mxu1 %v4222_v42 }
  0xb1   :  { %810 = vmatprep.mubr.f32.mxu1 %v4063_v0 }
  0xb3   :  { %602 = vmatmul.mubr.f32.gmra.mrb[26].mxu0 %v4283_v14 }
  0xb4   :  { %607 = vmatprep.mubr.f32.mxu0 %v4063_v0  ;;  %811 = vmatmul.mubr.f32.gmra.mrb[26].mxu1 %v4230_v51 }
  0xb5   :  { %816 = vmatprep.mubr.f32.mxu1 %v4063_v0 }
  0xb7   :  { %608 = vmatmul.mubr.f32.gmra.mrb[28].mxu0 %v4289_v15 }
  0xb8   :  { %613 = vmatprep.mubr.f32.mxu0 %v4063_v0  ;;  %817 = vmatmul.mubr.f32.gmra.mrb[28].mxu1 %v4238_v59 }
  0xb9   :  { %822 = vmatprep.mubr.f32.mxu1 %v4063_v0 }
  0xbb   :  { %614 = vmatmul.mubr.f32.gmra.mrb[30].mxu0 %v4295_v16 }
  0xbc   :  { %619 = vmatprep.mubr.f32.mxu0 %v4063_v0  ;;  %823 = vmatmul.mubr.f32.gmra.mrb[30].mxu1 %v4246_v4 }
  0xbd   :  { %828 = vmatprep.mubr.f32.mxu1 %v4063_v0 }
  0xbf   :  { %620 = vmatmul.mubr.f32.gmra.mrb[32].mxu0 %v4301_v17 }
  0xc0   :  { %625 = vmatprep.mubr.f32.mxu0 %v4063_v0  ;;  %829 = vmatmul.mubr.f32.gmra.mrb[32].mxu1 %v4254_v7 }
  0xc1   :  { %834 = vmatprep.mubr.f32.mxu1 %v4063_v0 }
  0xc3   :  { %626 = vmatmul.mubr.f32.gmra.mrb[34].mxu0 %v4307_v18 }
  0xc4   :  { %631 = vmatprep.mubr.f32.mxu0 %v4063_v0  ;;  %835 = vmatmul.mubr.f32.gmra.mrb[34].mxu1 %v4259_v8 }
  0xc5   :  { %840 = vmatprep.mubr.f32.mxu1 %v4063_v0 }
  0xc7   :  { %632 = vmatmul.mubr.f32.gmra.mrb[36].mxu0 %v4313_v19 }
  0xc8   :  { %637 = vmatprep.mubr.f32.mxu0 %v4063_v0  ;;  %841 = vmatmul.mubr.f32.gmra.mrb[36].mxu1 %v4265_v11 }
  0xc9   :  { %846 = vmatprep.mubr.f32.mxu1 %v4063_v0 }
  0xcb   :  { %638 = vmatmul.mubr.f32.gmra.mrb[38].mxu0 %v4319_v22 }
  0xcc   :  { %643 = vmatprep.mubr.f32.mxu0 %v4063_v0  ;;  %847 = vmatmul.mubr.f32.gmra.mrb[38].mxu1 %v4271_v12 }
  0xcd   :  { %852 = vmatprep.mubr.f32.mxu1 %v4063_v0 }
  0xcf   :  { %644 = vmatmul.mubr.f32.gmra.mrb[40].mxu0 %v4325_v23 }
  0xd0   :  { %649 = vmatprep.mubr.f32.mxu0 %v4063_v0  ;;  %853 = vmatmul.mubr.f32.gmra.mrb[40].mxu1 %v4277_v13 }
  0xd1   :  { %858 = vmatprep.mubr.f32.mxu1 %v4063_v0 }
  0xd3   :  { %650 = vmatmul.mubr.f32.gmra.mrb[42].mxu0 %v4331_v24 }
  0xd4   :  { %655 = vmatprep.mubr.f32.mxu0 %v4063_v0  ;;  %859 = vmatmul.mubr.f32.gmra.mrb[42].mxu1 %v4283_v14 }
  0xd5   :  { %864 = vmatprep.mubr.f32.mxu1 %v4063_v0 }
  0xd7   :  { %656 = vmatmul.mubr.f32.gmra.mrb[44].mxu0 %v423_v28 }
  0xd8   :  { %661 = vmatprep.mubr.f32.mxu0 %v4063_v0  ;;  %865 = vmatmul.mubr.f32.gmra.mrb[44].mxu1 %v4289_v15 }
  0xd9   :  { %870 = vmatprep.mubr.f32.mxu1 %v4063_v0 }
  0xdb   :  { %662 = vmatmul.mubr.f32.gmra.mrb[46].mxu0 %v424_v34 }
  0xdc   :  { %2981 = vmatprep.mubr.f32.mxu0 %v4191_v61  ;;  %871 = vmatmul.mubr.f32.gmra.mrb[46].mxu1 %v4295_v16  ;;  %v160_v61 = vld [vmem:[#allocation5 + $0x8] sm:$0xff] }
  0xdd   :  { %876 = vmatprep.mubr.f32.mxu1 %v4063_v0 }
  0xdf   :  { %2982 = vmatmul.mubr.f32.vlgmr.msra.gmra.mrb[48].mxu0 %v4198_v9  ;;  %v434_v9 = vlaneseq }
  0xe0   :  { %2984 = vmatprep.mubr.f32.mxu0 %v4206_v20  ;;  %877 = vmatmul.mubr.f32.gmra.mrb[48].mxu1 %v4301_v17 }
  0xe1   :  { %882 = vmatprep.mubr.f32.mxu1 %v4063_v0 }
  0xe3   :  { %2985 = vmatmul.mubr.f32.gmra.mrb[50].mxu0 %v4214_v31 }
  0xe4   :  { %2987 = vmatprep.mubr.f32.mxu0 %v4222_v42  ;;  %883 = vmatmul.mubr.f32.gmra.mrb[50].mxu1 %v4307_v18 }
  0xe5   :  { %888 = vmatprep.mubr.f32.mxu1 %v4063_v0 }
  0xe7   :  { %2988 = vmatmul.mubr.f32.gmra.mrb[52].mxu0 %v4230_v51 }
  0xe8   :  { %2990 = vmatprep.mubr.f32.mxu0 %v4238_v59  ;;  %889 = vmatmul.mubr.f32.gmra.mrb[52].mxu1 %v4313_v19 }
  0xe9   :  { %894 = vmatprep.mubr.f32.mxu1 %v4063_v0 }
  0xeb   :  { %2991 = vmatmul.mubr.f32.gmra.mrb[54].mxu0 %v4246_v4 }
  0xec   :  { %2993 = vmatprep.mubr.f32.mxu0 %v4254_v7  ;;  %895 = vmatmul.mubr.f32.gmra.mrb[54].mxu1 %v4319_v22 }
  0xed   :  { %900 = vmatprep.mubr.f32.mxu1 %v4063_v0 }
  0xef   :  { %2994 = vmatmul.mubr.f32.gmra.mrb[56].mxu0 %v4259_v8 }
  0xf0   :  { %2996 = vmatprep.mubr.f32.mxu0 %v4265_v11  ;;  %901 = vmatmul.mubr.f32.gmra.mrb[56].mxu1 %v4325_v23 }
  0xf1   :  { %906 = vmatprep.mubr.f32.mxu1 %v4063_v0 }
  0xf3   :  { %2997 = vmatmul.mubr.f32.gmra.mrb[58].mxu0 %v4271_v12 }
  0xf4   :  { %2999 = vmatprep.mubr.f32.mxu0 %v4277_v13  ;;  %907 = vmatmul.mubr.f32.gmra.mrb[58].mxu1 %v4331_v24 }
  0xf5   :  { %912 = vmatprep.mubr.f32.mxu1 %v4063_v0 }
  0xf7   :  { %3000 = vmatmul.mubr.f32.gmra.mrb[60].mxu0 %v4283_v14 }
  0xf8   :  { %3002 = vmatprep.mubr.f32.mxu0 %v4289_v15  ;;  %913 = vmatmul.mubr.f32.gmra.mrb[60].mxu1 %v423_v28 }
  0xf9   :  { %918 = vmatprep.mubr.f32.mxu1 %v4063_v0 }
  0xfb   :  { %3003 = vmatmul.mubr.f32.gmra.mrb[62].mxu0 %v4295_v16 }
  0xfc   :  { %3005 = vmatprep.mubr.f32.mxu0 %v4301_v17  ;;  %919 = vmatmul.mubr.f32.gmra.mrb[62].mxu1 %v424_v34 }
  0xfd   :  { %924 = vmatprep.mubr.f32.mxu1 %v4063_v0 }
  0xff   :  { %3006 = vmatmul.mubr.f32.gmra.mrb[64].mxu0 %v4307_v18 }
 0x100   :  { %3008 = vmatprep.mubr.f32.mxu0 %v4313_v19  ;;  %925 = vmatmul.mubr.f32.gmra.mrb[64].mxu1 %v4193_v62 }
 0x101   :  { %930 = vmatprep.mubr.f32.mxu1 %v4063_v0 }
 0x103   :  { %3009 = vmatmul.mubr.f32.gmra.mrb[66].mxu0 %v4319_v22 }
 0x104   :  { %3011 = vmatprep.mubr.f32.mxu0 %v4325_v23  ;;  %931 = vmatmul.mubr.f32.gmra.mrb[66].mxu1 %v4201_v10 }
 0x105   :  { %936 = vmatprep.mubr.f32.mxu1 %v4063_v0 }
 0x107   :  { %3012 = vmatmul.mubr.f32.gmra.mrb[68].mxu0 %v4331_v24 }
 0x108   :  { %3014 = vmatprep.mubr.f32.mxu0 %v423_v28  ;;  %937 = vmatmul.mubr.f32.gmra.mrb[68].mxu1 %v4209_v21 }
 0x109   :  { %942 = vmatprep.mubr.f32.mxu1 %v4063_v0 }
 0x10b   :  { %3015 = vmatmul.mubr.f32.gmra.mrb[70].mxu0 %v424_v34 }
 0x10c   :  { %3017 = vmatprep.mubr.f32.mxu0 %v4193_v62  ;;  %943 = vmatmul.mubr.f32.gmra.mrb[70].mxu1 %v4217_v32  ;;  %v96_v62 = vld [vmem:[#allocation2 + $0x8] sm:$0xff] }
 0x10d   :  { %948 = vmatprep.mubr.f32.mxu1 %v4063_v0 }
 0x10f   :  { %3018 = vmatmul.mubr.f32.gmra.mrb[72].mxu0 %v4201_v10  ;;  %v4405_v10 = vshrl.u32 %v434_v9, 7 }
 0x110   :  { %3020 = vmatprep.mubr.f32.mxu0 %v4209_v21  ;;  %949 = vmatmul.mubr.f32.gmra.mrb[72].mxu1 %v4225_v43  ;;  %v4411_v21 = vld [vmem:[%s5096_s4] sm:$0x1f] }
 0x111   :  { %954 = vmatprep.mubr.f32.mxu1 %v4063_v0  ;;  %v436_v20 = vsub.s32 0, %v4405_v10 }
 0x113   :  { %3021 = vmatmul.mubr.f32.gmra.mrb[74].mxu0 %v4217_v32  ;;  %v4417_v36 = vrot.slane %v4411_v21, %v436_v20 }
 0x114   :  { %3023 = vmatprep.mubr.f32.mxu0 %v4225_v43  ;;  %955 = vmatmul.mubr.f32.gmra.mrb[74].mxu1 %v4233_v52 }
 0x115   :  { %960 = vmatprep.mubr.f32.mxu1 %v4063_v0 }
 0x117   :  { %3024 = vmatmul.mubr.f32.gmra.mrb[76].mxu0 %v4233_v52 }
 0x118   :  { %3026 = vmatprep.mubr.f32.mxu0 %v4241_v60  ;;  %961 = vmatmul.mubr.f32.gmra.mrb[76].mxu1 %v4241_v60 }
 0x119   :  { %966 = vmatprep.mubr.f32.mxu1 %v4063_v0  ;;  %v440_v0 = vsub.s32 1, %v4405_v10 }
 0x11b   :  { %3027 = vmatmul.mubr.f32.gmra.mrb[78].mxu0 %v4249_v5  ;;  %v4422_v39 = vrot.slane %v4411_v21, %v440_v0 }
 0x11c   :  { %967 = vmatmul.mubr.f32.gmra.mrb[78].mxu1 %v4249_v5  ;;  %1487 = vmatprep.mubr.f32.mxu0 %v160_v61 }
 0x11d   :  { %1262 = vmatprep.mubr.f32.mxu1 %v96_v62 }
 0x152   :  { %v525_v31 = vpop.f32.mrb[0].mxu0  ;;  %v669_v32 = vpop.f32.mrb[0].mxu1 }
 0x153   :  { %v527_v37 = vpop.f32.mrb[1].mxu0  ;;  %v671_v38 = vpop.f32.mrb[1].mxu1  ;;  %v4425_v40 = vadd.f32 %v669_v32, %v4417_v36  ;;  %v526_v44 = vadd.f32 %v525_v31, %v4417_v36 }
 0x154   :  { %v4428_v42 = vadd.f32 %v671_v38, %v4422_v39  ;;  %v528_v49 = vadd.f32 %v527_v37, %v4422_v39 }
 0x156   :  { %v531_v41 = vpop.f32.mrb[2].mxu0  ;;  %v675_v43 = vpop.f32.mrb[2].mxu1 }
 0x157   :  { %v532_v45 = vadd.f32 %v531_v41, %v4417_v36  ;;  %v533_v46 = vpop.f32.mrb[3].mxu0  ;;  %v4433_v47 = vadd.f32 %v675_v43, %v4417_v36  ;;  %v677_v48 = vpop.f32.mrb[3].mxu1 }
 0x158   :  { %v534_v50 = vadd.f32 %v533_v46, %v4422_v39  ;;  %v4438_v51 = vadd.f32 %v677_v48, %v4422_v39 }
 0x159   :  { %v3126_v52 = vpack.c.bf16 %v532_v45, %v526_v44  ;;  %v3162_v53 = vpack.c.bf16 %v4433_v47, %v4425_v40  ;;  %v307_v47 = vld [vmem:[#allocation10 + $0x18] sm:$0xff] }
 0x15a   :  { %v3174_v54 = vpack.c.bf16 %v534_v50, %v528_v49  ;;  %v537_v55 = vpop.f32.mrb[4].mxu0  ;;  %v3210_v56 = vpack.c.bf16 %v4438_v51, %v4428_v42  ;;  %v681_v57 = vpop.f32.mrb[4].mxu1  ;;  %v304_v42 = vld [vmem:[#allocation10] sm:$0xff]  ;;  %v311_v51 = vld [vmem:[#allocation10 + $0x38] sm:$0xff] }
 0x15b   :  { %v539_v58 = vpop.f32.mrb[5].mxu0  ;;  %3127 = vmatpush1.bf16.msra.mxu1 %v3126_v52  ;;  %v683_v59 = vpop.f32.mrb[5].mxu1  ;;  %v4447_v60 = vadd.f32 %v681_v57, %v4417_v36  ;;  %v538_v3 = vadd.f32 %v537_v55, %v4417_v36 }
 0x15c   :  { %3175 = vmatpush1.bf16.msra.mxu0 %v3174_v54  ;;  %3128 = vmatprep.subr.bf16.mxu1 %v4064_v35  ;;  %v4450_v1 = vadd.f32 %v683_v59, %v4422_v39  ;;  %v540_v8 = vadd.f32 %v539_v58, %v4422_v39 }
 0x15d   :  { %3176 = vmatprep.subr.bf16.mxu0 %v4064_v35 }
 0x15e   :  { %v543_v63 = vpop.f32.mrb[6].mxu0  ;;  %v687_v2 = vpop.f32.mrb[6].mxu1 }
 0x15f   :  { %v544_v4 = vadd.f32 %v543_v63, %v4417_v36  ;;  %v545_v5 = vpop.f32.mrb[7].mxu0  ;;  %v4455_v6 = vadd.f32 %v687_v2, %v4417_v36  ;;  %v689_v7 = vpop.f32.mrb[7].mxu1 }
 0x160   :  { %v546_v11 = vadd.f32 %v545_v5, %v4422_v39  ;;  %v4460_v12 = vadd.f32 %v689_v7, %v4422_v39 }
 0x161   :  { %v3129_v13 = vpack.c.bf16 %v544_v4, %v538_v3  ;;  %v3165_v14 = vpack.c.bf16 %v4455_v6, %v4447_v60  ;;  %v95_v60 = vld [vmem:[#allocation2] sm:$0xff] }
 0x162   :  { %v3177_v15 = vpack.c.bf16 %v546_v11, %v540_v8  ;;  %v549_v16 = vpop.f32.mrb[8].mxu0  ;;  %v3213_v17 = vpack.c.bf16 %v4460_v12, %v4450_v1  ;;  %v693_v18 = vpop.f32.mrb[8].mxu1  ;;  %v162_v1 = vld [vmem:[#allocation5 + $0x18] sm:$0xff] }
 0x163   :  { %v551_v19 = vpop.f32.mrb[9].mxu0  ;;  %3130 = vmatpush1.bf16.msra.mxu1 %v3129_v13  ;;  %v695_v22 = vpop.f32.mrb[9].mxu1  ;;  %v4469_v23 = vadd.f32 %v693_v18, %v4417_v36  ;;  %v550_v27 = vadd.f32 %v549_v16, %v4417_v36  ;;  %v98_v12 = vld [vmem:[#allocation2 + $0x18] sm:$0xff] }
 0x164   :  { %3178 = vmatpush1.bf16.msra.mxu0 %v3177_v15  ;;  %3131 = vmatprep.subr.bf16.mxu1 %v4064_v35  ;;  %v4472_v25 = vadd.f32 %v695_v22, %v4422_v39  ;;  %v552_v34 = vadd.f32 %v551_v19, %v4422_v39 }
 0x165   :  { %3179 = vmatprep.subr.bf16.mxu0 %v4064_v35 }
 0x166   :  { %v555_v24 = vpop.f32.mrb[10].mxu0  ;;  %v699_v26 = vpop.f32.mrb[10].mxu1 }
 0x167   :  { %v556_v28 = vadd.f32 %v555_v24, %v4417_v36  ;;  %v557_v29 = vpop.f32.mrb[11].mxu0  ;;  %v4477_v30 = vadd.f32 %v699_v26, %v4417_v36  ;;  %v701_v33 = vpop.f32.mrb[11].mxu1 }
 0x168   :  { %v558_v61 = vadd.f32 %v557_v29, %v4422_v39  ;;  %v4482_v62 = vadd.f32 %v701_v33, %v4422_v39 }
 0x169   :  { %v3132_v9 = vpack.c.bf16 %v556_v28, %v550_v27  ;;  %v3168_v31 = vpack.c.bf16 %v4477_v30, %v4469_v23  ;;  %v309_v23 = vld [vmem:[#allocation10 + $0x28] sm:$0xff] }
 0x16a   :  { %v3180_v32 = vpack.c.bf16 %v558_v61, %v552_v34  ;;  %v561_v37 = vpop.f32.mrb[12].mxu0  ;;  %v3216_v38 = vpack.c.bf16 %v4482_v62, %v4472_v25  ;;  %v705_v41 = vpop.f32.mrb[12].mxu1  ;;  %v310_v62 = vld [vmem:[#allocation10 + $0x30] sm:$0xff] }
 0x16b   :  { %v563_v43 = vpop.f32.mrb[13].mxu0  ;;  %3133 = vmatpush1.bf16.msra.mxu1 %v3132_v9  ;;  %v707_v44 = vpop.f32.mrb[13].mxu1  ;;  %v4491_v45 = vadd.f32 %v705_v41, %v4417_v36  ;;  %v562_v50 = vadd.f32 %v561_v37, %v4417_v36 }
 0x16c   :  { %3181 = vmatpush1.bf16.msra.mxu0 %v3180_v32  ;;  %3134 = vmatprep.subr.bf16.mxu1 %v4064_v35  ;;  %v4494_v48 = vadd.f32 %v707_v44, %v4422_v39  ;;  %v564_v58 = vadd.f32 %v563_v43, %v4422_v39 }
 0x16d   :  { %3182 = vmatprep.subr.bf16.mxu0 %v4064_v35 }
 0x16e   :  { %v567_v46 = vpop.f32.mrb[14].mxu0  ;;  %v711_v49 = vpop.f32.mrb[14].mxu1 }
 0x16f   :  { %v568_v52 = vadd.f32 %v567_v46, %v4417_v36  ;;  %v569_v54 = vpop.f32.mrb[15].mxu0  ;;  %v4499_v55 = vadd.f32 %v711_v49, %v4417_v36  ;;  %v713_v57 = vpop.f32.mrb[15].mxu1 }
 0x170   :  { %v570_v59 = vadd.f32 %v569_v54, %v4422_v39  ;;  %v4504_v63 = vadd.f32 %v713_v57, %v4422_v39 }
 0x171   :  { %v3135_v2 = vpack.c.bf16 %v568_v52, %v562_v50  ;;  %v3171_v3 = vpack.c.bf16 %v4499_v55, %v4491_v45 }
 0x172   :  { %v3183_v4 = vpack.c.bf16 %v570_v59, %v564_v58  ;;  %v573_v5 = vpop.f32.mrb[16].mxu0  ;;  %v3219_v7 = vpack.c.bf16 %v4504_v63, %v4494_v48  ;;  %v312_v48 = vld [vmem:[#allocation10 + $0x40] sm:$0xff]  ;;  %v315_v63 = vld [vmem:[#allocation10 + $0x58] sm:$0xff] }
 0x173   :  { %v575_v8 = vpop.f32.mrb[17].mxu0  ;;  %3136 = vmatpush1.bf16.msra.mxu1 %v3135_v2  ;;  %v574_v13 = vadd.f32 %v573_v5, %v4417_v36 }
 0x174   :  { %3184 = vmatpush1.bf16.msra.mxu0 %v3183_v4  ;;  %3137 = vmatprep.subr.bf16.mxu1 %v4064_v35  ;;  %v576_v18 = vadd.f32 %v575_v8, %v4422_v39 }
 0x175   :  { %3185 = vmatprep.subr.bf16.mxu0 %v4064_v35 }
 0x176   :  { %v579_v11 = vpop.f32.mrb[18].mxu0 }
 0x177   :  { %v580_v15 = vadd.f32 %v579_v11, %v4417_v36  ;;  %v581_v16 = vpop.f32.mrb[19].mxu0 }
 0x178   :  { %v582_v19 = vadd.f32 %v581_v16, %v4422_v39 }
 0x179   :  { %v3138_v22 = vpack.c.bf16 %v580_v15, %v574_v13 }
 0x17a   :  { %v3186_v24 = vpack.c.bf16 %v582_v19, %v576_v18  ;;  %v585_v26 = vpop.f32.mrb[20].mxu0 }
 0x17b   :  { %v587_v27 = vpop.f32.mrb[21].mxu0  ;;  %3139 = vmatpush1.bf16.msra.mxu1 %v3138_v22  ;;  %v586_v29 = vadd.f32 %v585_v26, %v4417_v36 }
 0x17c   :  { %3187 = vmatpush1.bf16.msra.mxu0 %v3186_v24  ;;  %3140 = vmatprep.subr.bf16.mxu1 %v4064_v35  ;;  %v588_v61 = vadd.f32 %v587_v27, %v4422_v39 }
 0x17d   :  { %3188 = vmatprep.subr.bf16.mxu0 %v4064_v35 }
 0x17e   :  { %v591_v28 = vpop.f32.mrb[22].mxu0 }
 0x17f   :  { %v592_v33 = vadd.f32 %v591_v28, %v4417_v36  ;;  %v593_v34 = vpop.f32.mrb[23].mxu0 }
 0x180   :  { %v594_v9 = vadd.f32 %v593_v34, %v4422_v39 }
 0x181   :  { %v3141_v32 = vpack.c.bf16 %v592_v33, %v586_v29 }
 0x182   :  { %v3189_v37 = vpack.c.bf16 %v594_v9, %v588_v61  ;;  %v597_v41 = vpop.f32.mrb[24].mxu0 }
 0x183   :  { %v599_v43 = vpop.f32.mrb[25].mxu0  ;;  %3142 = vmatpush1.bf16.msra.mxu1 %v3141_v32  ;;  %v598_v46 = vadd.f32 %v597_v41, %v4417_v36 }
 0x184   :  { %3190 = vmatpush1.bf16.msra.mxu0 %v3189_v37  ;;  %3143 = vmatprep.subr.bf16.mxu1 %v4064_v35  ;;  %v600_v52 = vadd.f32 %v599_v43, %v4422_v39 }
 0x185   :  { %3191 = vmatprep.subr.bf16.mxu0 %v4064_v35 }
 0x186   :  { %v603_v44 = vpop.f32.mrb[26].mxu0 }
 0x187   :  { %v604_v49 = vadd.f32 %v603_v44, %v4417_v36  ;;  %v605_v50 = vpop.f32.mrb[27].mxu0 }
 0x188   :  { %v606_v54 = vadd.f32 %v605_v50, %v4422_v39 }
 0x189   :  { %v3144_v57 = vpack.c.bf16 %v604_v49, %v598_v46 }
 0x18a   :  { %v3192_v58 = vpack.c.bf16 %v606_v54, %v600_v52  ;;  %v609_v59 = vpop.f32.mrb[28].mxu0 }
 0x18b   :  { %v611_v2 = vpop.f32.mrb[29].mxu0  ;;  %3145 = vmatpush1.bf16.msra.mxu1 %v3144_v57  ;;  %v610_v5 = vadd.f32 %v609_v59, %v4417_v36 }
 0x18c   :  { %3193 = vmatpush1.bf16.msra.mxu0 %v3192_v58  ;;  %3146 = vmatprep.subr.bf16.mxu1 %v4064_v35  ;;  %v612_v13 = vadd.f32 %v611_v2, %v4422_v39 }
 0x18d   :  { %3194 = vmatprep.subr.bf16.mxu0 %v4064_v35 }
 0x18e   :  { %v615_v4 = vpop.f32.mrb[30].mxu0 }
 0x18f   :  { %v616_v8 = vadd.f32 %v615_v4, %v4417_v36  ;;  %v617_v11 = vpop.f32.mrb[31].mxu0 }
 0x190   :  { %v618_v15 = vadd.f32 %v617_v11, %v4422_v39 }
 0x191   :  { %v3147_v16 = vpack.c.bf16 %v616_v8, %v610_v5 }
 0x192   :  { %v3195_v18 = vpack.c.bf16 %v618_v15, %v612_v13  ;;  %v621_v19 = vpop.f32.mrb[32].mxu0 }
 0x193   :  { %v623_v22 = vpop.f32.mrb[33].mxu0  ;;  %3148 = vmatpush1.bf16.msra.mxu1 %v3147_v16  ;;  %v622_v26 = vadd.f32 %v621_v19, %v4417_v36 }
 0x194   :  { %3196 = vmatpush1.bf16.msra.mxu0 %v3195_v18  ;;  %3149 = vmatprep.subr.bf16.mxu1 %v4064_v35  ;;  %v624_v29 = vadd.f32 %v623_v22, %v4422_v39 }
 0x195   :  { %3197 = vmatprep.subr.bf16.mxu0 %v4064_v35 }
 0x196   :  { %v627_v24 = vpop.f32.mrb[34].mxu0 }
 0x197   :  { %v628_v27 = vadd.f32 %v627_v24, %v4417_v36  ;;  %v629_v28 = vpop.f32.mrb[35].mxu0 }
 0x198   :  { %v630_v33 = vadd.f32 %v629_v28, %v4422_v39 }
 0x199   :  { %v3150_v34 = vpack.c.bf16 %v628_v27, %v622_v26 }
 0x19a   :  { %v3198_v61 = vpack.c.bf16 %v630_v33, %v624_v29  ;;  %v633_v9 = vpop.f32.mrb[36].mxu0  ;;  %v97_v33 = vld [vmem:[#allocation2 + $0x10] sm:$0xff] }
 0x19b   :  { %v635_v32 = vpop.f32.mrb[37].mxu0  ;;  %3151 = vmatpush1.bf16.msra.mxu1 %v3150_v34  ;;  %v634_v41 = vadd.f32 %v633_v9, %v4417_v36  ;;  %v164_v9 = vld [vmem:[#allocation5 + $0x28] sm:$0xff] }
 0x19c   :  { %3199 = vmatpush1.bf16.msra.mxu0 %v3198_v61  ;;  %3152 = vmatprep.subr.bf16.mxu1 %v4064_v35  ;;  %v636_v46 = vadd.f32 %v635_v32, %v4422_v39  ;;  %v161_v61 = vld [vmem:[#allocation5 + $0x10] sm:$0xff]  ;;  %v100_v32 = vld [vmem:[#allocation2 + $0x28] sm:$0xff] }
 0x19d   :  { %3200 = vmatprep.subr.bf16.mxu0 %v4064_v35 }
 0x19e   :  { %v639_v37 = vpop.f32.mrb[38].mxu0 }
 0x19f   :  { %v640_v43 = vadd.f32 %v639_v37, %v4417_v36  ;;  %v641_v44 = vpop.f32.mrb[39].mxu0 }
 0x1a0   :  { %v642_v49 = vadd.f32 %v641_v44, %v4422_v39  ;;  %v316_v44 = vld [vmem:[#allocation10 + $0x60] sm:$0xff] }
 0x1a1   :  { %v3153_v50 = vpack.c.bf16 %v640_v43, %v634_v41 }
 0x1a2   :  { %v3201_v52 = vpack.c.bf16 %v642_v49, %v636_v46  ;;  %v645_v54 = vpop.f32.mrb[40].mxu0  ;;  %v319_v46 = vld [vmem:[#allocation10 + $0x78] sm:$0xff] }
 0x1a3   :  { %v647_v57 = vpop.f32.mrb[41].mxu0  ;;  %3154 = vmatpush1.bf16.msra.mxu1 %v3153_v50  ;;  %v646_v59 = vadd.f32 %v645_v54, %v4417_v36  ;;  %v323_v49 = vld [vmem:[#allocation10 + $0x98] sm:$0xff]  ;;  %v3289_v50 = vpack.c.bf16 %v315_v63, %v312_v48  ;;  %v326_v54 = vld [vmem:[#allocation10 + $0xb0] sm:$0xff]  ;;  %v103_v48 = vld [vmem:[#allocation2 + $0x40] sm:$0xff] }
 0x1a4   :  { %3202 = vmatpush1.bf16.msra.mxu0 %v3201_v52  ;;  %3155 = vmatprep.subr.bf16.mxu1 %v4064_v35  ;;  %v648_v5 = vadd.f32 %v647_v57, %v4422_v39  ;;  %v318_v57 = vld [vmem:[#allocation10 + $0x70] sm:$0xff] }
 0x1a5   :  { %3203 = vmatprep.subr.bf16.mxu0 %v4064_v35 }
 0x1a6   :  { %v651_v58 = vpop.f32.mrb[42].mxu0 }
 0x1a7   :  { %v652_v2 = vadd.f32 %v651_v58, %v4417_v36  ;;  %v653_v4 = vpop.f32.mrb[43].mxu0  ;;  %v321_v58 = vld [vmem:[#allocation10 + $0x88] sm:$0xff] }
 0x1a8   :  { %v654_v8 = vadd.f32 %v653_v4, %v4422_v39 }
 0x1a9   :  { %v3156_v11 = vpack.c.bf16 %v652_v2, %v646_v59  ;;  %v99_v2 = vld [vmem:[#allocation2 + $0x20] sm:$0xff] }
 0x1aa   :  { %v3204_v13 = vpack.c.bf16 %v654_v8, %v648_v5  ;;  %v657_v15 = vpop.f32.mrb[44].mxu0  ;;  %v452_v5 = vsub.s32 4, %v4405_v10  ;;  %v163_v8 = vld [vmem:[#allocation5 + $0x20] sm:$0xff] }
 0x1ab   :  { %v659_v16 = vpop.f32.mrb[45].mxu0  ;;  %3157 = vmatpush1.bf16.msra.mxu1 %v3156_v11  ;;  %v658_v19 = vadd.f32 %v657_v15, %v4417_v36  ;;  %v166_v11 = vld [vmem:[#allocation5 + $0x38] sm:$0xff]  ;;  %v3231_v15 = vpack.c.bf16 %v319_v46, %v316_v44 }
 0x1ac   :  { %3205 = vmatpush1.bf16.msra.mxu0 %v3204_v13  ;;  %3158 = vmatprep.subr.bf16.mxu1 %v4064_v35  ;;  %v660_v26 = vadd.f32 %v659_v16, %v4422_v39  ;;  %v102_v13 = vld [vmem:[#allocation2 + $0x38] sm:$0xff] }
 0x1ad   :  { %3206 = vmatprep.subr.bf16.mxu0 %v4064_v35 }
 0x1ae   :  { %v663_v18 = vpop.f32.mrb[46].mxu0 }
 0x1af   :  { %v664_v22 = vadd.f32 %v663_v18, %v4417_v36  ;;  %v665_v24 = vpop.f32.mrb[47].mxu0  ;;  %v305_v36 = vld [vmem:[#allocation10 + $0x8] sm:$0xff]  ;;  %v3233_v18 = vpack.c.bf16 %v326_v54, %v323_v49  ;;  %v334_v49 = vld [vmem:[#allocation10 + $0xf0] sm:$0xff] }
 0x1b0   :  { %v666_v27 = vadd.f32 %v665_v24, %v4422_v39  ;;  %v308_v39 = vld [vmem:[#allocation10 + $0x20] sm:$0xff]  ;;  %v329_v24 = vld [vmem:[#allocation10 + $0xc8] sm:$0xff] }
 0x1b1   :  { %v3159_v28 = vpack.c.bf16 %v664_v22, %v658_v19  ;;  %v3221_v40 = vpack.c.bf16 %v308_v39, %v305_v36  ;;  %v322_v19 = vld [vmem:[#allocation10 + $0x90] sm:$0xff]  ;;  %v325_v22 = vld [vmem:[#allocation10 + $0xa8] sm:$0xff]  ;;  %v327_v36 = vld [vmem:[#allocation10 + $0xb8] sm:$0xff] }
 0x1b2   :  { %v3207_v29 = vpack.c.bf16 %v666_v27, %v660_v26  ;;  %v4587_v6 = vpop.f32.mrb[48].mxu0  ;;  %v3292_v26 = vpack.c.bf16 %v321_v58, %v318_v57  ;;  %v341_v54 = vld [vmem:[#allocation10 + $0x128] sm:$0xff] }
 0x1b3   :  { %3160 = vmatpush1.bf16.msra.mxu1 %v3159_v28  ;;  %v4592_v25 = vpop.f32.mrb[49].mxu0  ;;  %v332_v28 = vld [vmem:[#allocation10 + $0xe0] sm:$0xff] }
 0x1b4   :  { %3208 = vmatpush1.bf16.msra.mxu0 %v3207_v29  ;;  %3161 = vmatprep.subr.bf16.mxu1 %v4064_v35  ;;  %v324_v29 = vld [vmem:[#allocation10 + $0xa0] sm:$0xff] }
 0x1b5   :  { %3209 = vmatprep.subr.bf16.mxu0 %v4064_v35 }
 0x1b6   :  { %v4595_v55 = vpop.f32.mrb[50].mxu0 }
 0x1b7   :  { %3163 = vmatpush1.bf16.msra.mxu1 %v3162_v53  ;;  %v314_v53 = vld [vmem:[#allocation10 + $0x50] sm:$0xff] }
 0x1b8   :  { %3211 = vmatpush1.bf16.msra.mxu0 %v3210_v56  ;;  %3164 = vmatprep.subr.bf16.mxu1 %v4064_v35  ;;  %v159_v56 = vld [vmem:[#allocation5] sm:$0xff]  ;;  %v3225_v30 = vpack.c.bf16 %v314_v53, %v311_v51  ;;  %v168_v51 = vld [vmem:[#allocation5 + $0x48] sm:$0xff] }
 0x1b9   :  { %3212 = vmatprep.subr.bf16.mxu0 %v4064_v35  ;;  %v104_v53 = vld [vmem:[#allocation2 + $0x48] sm:$0xff] }
 0x1bb   :  { %3166 = vmatpush1.bf16.msra.mxu1 %v3165_v14  ;;  %v3223_v14 = vpack.c.bf16 %v307_v47, %v304_v42  ;;  %v165_v47 = vld [vmem:[#allocation5 + $0x30] sm:$0xff] }
 0x1bc   :  { %3214 = vmatpush1.bf16.msra.mxu0 %v3213_v17  ;;  %3167 = vmatprep.subr.bf16.mxu1 %v4064_v35  ;;  %v306_v17 = vld [vmem:[#allocation10 + $0x10] sm:$0xff] }
 0x1bd   :  { %3215 = vmatprep.subr.bf16.mxu0 %v4064_v35  ;;  %v3286_v45 = vpack.c.bf16 %v309_v23, %v306_v17  ;;  %v331_v17 = vld [vmem:[#allocation10 + $0xd8] sm:$0xff] }
 0x1be   :  { %v335_v23 = vld [vmem:[#allocation10 + $0xf8] sm:$0xff] }
 0x1bf   :  { %3169 = vmatpush1.bf16.msra.mxu1 %v3168_v31  ;;  %v313_v31 = vld [vmem:[#allocation10 + $0x48] sm:$0xff] }
 0x1c0   :  { %3217 = vmatpush1.bf16.msra.mxu0 %v3216_v38  ;;  %3170 = vmatprep.subr.bf16.mxu1 %v4064_v35  ;;  %v317_v38 = vld [vmem:[#allocation10 + $0x68] sm:$0xff]  ;;  %v3227_v37 = vpack.c.bf16 %v313_v31, %v310_v62  ;;  %v338_v31 = vld [vmem:[#allocation10 + $0x110] sm:$0xff] }
 0x1c1   :  { %3218 = vmatprep.subr.bf16.mxu0 %v4064_v35  ;;  %v3241_v46 = vpack.c.bf16 %v338_v31, %v335_v23  ;;  %v174_v31 = vld [vmem:[#allocation5 + $0x78] sm:$0xff] }
 0x1c3   :  { %3172 = vmatpush1.bf16.msra.mxu1 %v3171_v3  ;;  %v320_v3 = vld [vmem:[#allocation10 + $0x80] sm:$0xff] }
 0x1c4   :  { %3220 = vmatpush1.bf16.msra.mxu0 %v3219_v7  ;;  %3222 = vmatprep.subr.bf16.mxu1 %v3221_v40  ;;  %v4597_v7 = vpop.f32.mrb[51].mxu0  ;;  %v3229_v43 = vpack.c.bf16 %v320_v3, %v317_v38  ;;  %v101_v40 = vld [vmem:[#allocation2 + $0x30] sm:$0xff] }
 0x1c5   :  { %3285 = vmatprep.subr.bf16.mxu0 %v4064_v35  ;;  %v4599_v34 = vpop.f32.mrb[52].mxu0  ;;  %v330_v38 = vld [vmem:[#allocation10 + $0xd0] sm:$0xff] }
 0x1c6   :  { %1263 = vmatmul.mubr.f32.vlgmr.msra.gmra.mrb[80].mxu1 %v95_v60  ;;  %v4601_v41 = vpop.f32.mrb[53].mxu0  ;;  %v4621_v60 = vrot.slane %v4411_v21, %v452_v5  ;;  %v336_v5 = vld [vmem:[#allocation10 + $0x100] sm:$0xff] }
 0x1c7   :  { %1488 = vmatmul.mubr.f32.vlgmr.msra.gmra.mrb[80].mxu0 %v159_v56  ;;  %1267 = vmatprep.mubr.f32.mxu1 %v98_v12  ;;  %v4603_v52 = vpop.f32.mrb[54].mxu0  ;;  %v3235_v56 = vpack.c.bf16 %v325_v22, %v322_v19  ;;  %v3237_v12 = vpack.c.bf16 %v332_v28, %v329_v24  ;;  %v169_v19 = vld [vmem:[#allocation5 + $0x50] sm:$0xff]  ;;  %v172_v22 = vld [vmem:[#allocation5 + $0x68] sm:$0xff] }
 0x1c8   :  { %1492 = vmatprep.mubr.f32.mxu0 %v162_v1  ;;  %3224 = vmatpush1.bf16.msra.mxu1 %v3223_v14  ;;  %v4606_v59 = vpop.f32.mrb[55].mxu0  ;;  %v328_v14 = vld [vmem:[#allocation10 + $0xc0] sm:$0xff]  ;;  %v108_v24 = vld [vmem:[#allocation2 + $0x68] sm:$0xff] }
 0x1c9   :  { %3226 = vmatprep.subr.bf16.mxu1 %v3225_v30  ;;  %3287 = vmatpush1.bf16.msra.mxu0 %v3286_v45  ;;  %v4608_v4 = vpop.f32.mrb[56].mxu0  ;;  %v3295_v30 = vpack.c.bf16 %v327_v36, %v324_v29  ;;  %v333_v45 = vld [vmem:[#allocation10 + $0xe8] sm:$0xff]  ;;  %v340_v36 = vld [vmem:[#allocation10 + $0x120] sm:$0xff] }
 0x1ca   :  { %1268 = vmatmul.mubr.f32.gmra.mrb[82].mxu1 %v97_v33  ;;  %3288 = vmatprep.subr.bf16.mxu0 %v4064_v35  ;;  %v4611_v16 = vpop.f32.mrb[57].mxu0  ;;  %v3298_v57 = vpack.c.bf16 %v333_v45, %v330_v38  ;;  %v110_v38 = vld [vmem:[#allocation2 + $0x78] sm:$0xff] }
 0x1cb   :  { %1493 = vmatmul.mubr.f32.gmra.mrb[82].mxu0 %v161_v61  ;;  %1272 = vmatprep.mubr.f32.mxu1 %v100_v32  ;;  %v4613_v27 = vpop.f32.mrb[58].mxu0  ;;  %v167_v61 = vld [vmem:[#allocation5 + $0x40] sm:$0xff]  ;;  %v106_v32 = vld [vmem:[#allocation2 + $0x58] sm:$0xff] }
 0x1cc   :  { %1497 = vmatprep.mubr.f32.mxu0 %v164_v9  ;;  %3228 = vmatpush1.bf16.msra.mxu1 %v3227_v37  ;;  %v4616_v39 = vpop.f32.mrb[59].mxu0  ;;  %v170_v9 = vld [vmem:[#allocation5 + $0x58] sm:$0xff]  ;;  %v3239_v37 = vpack.c.bf16 %v331_v17, %v328_v14  ;;  %v107_v17 = vld [vmem:[#allocation2 + $0x60] sm:$0xff] }
 0x1cd   :  { %3230 = vmatprep.subr.bf16.mxu1 %v3229_v43  ;;  %3290 = vmatpush1.bf16.msra.mxu0 %v3289_v50  ;;  %v4618_v42 = vpop.f32.mrb[60].mxu0  ;;  %v337_v50 = vld [vmem:[#allocation10 + $0x108] sm:$0xff] }
 0x1ce   :  { %1273 = vmatmul.mubr.f32.gmra.mrb[84].mxu1 %v99_v2  ;;  %3291 = vmatprep.subr.bf16.mxu0 %v4064_v35  ;;  %v4623_v1 = vpop.f32.mrb[61].mxu0  ;;  %v344_v2 = vld [vmem:[#allocation10 + $0x140] sm:$0xff] }
 0x1cf   :  { %1498 = vmatmul.mubr.f32.gmra.mrb[84].mxu0 %v163_v8  ;;  %1277 = vmatprep.mubr.f32.mxu1 %v102_v13  ;;  %v3004_v62 = vpop.f32.mrb[62].mxu0  ;;  %v339_v8 = vld [vmem:[#allocation10 + $0x118] sm:$0xff]  ;;  %v105_v13 = vld [vmem:[#allocation2 + $0x50] sm:$0xff]  ;;  %v3245_v29 = vpack.c.bf16 %v344_v2, %v341_v54 }
 0x1d0   :  { %1502 = vmatprep.mubr.f32.mxu0 %v166_v11  ;;  %3232 = vmatpush1.bf16.msra.mxu1 %v3231_v15  ;;  %v4627_v3 = vadd.f32 %v3004_v62, %v4621_v60  ;;  %v1109_v21 = vpop.f32.mrb[63].mxu0  ;;  %v171_v62 = vld [vmem:[#allocation5 + $0x60] sm:$0xff]  ;;  %v173_v2 = vld [vmem:[#allocation5 + $0x70] sm:$0xff] }
 0x1d1   :  { %3234 = vmatprep.subr.bf16.mxu1 %v3233_v18  ;;  %3293 = vmatpush1.bf16.msra.mxu0 %v3292_v26  ;;  %v4630_v63 = vadd.f32 %v1109_v21, %v4621_v60  ;;  %v3243_v26 = vpack.c.bf16 %v337_v50, %v334_v49  ;;  %v109_v50 = vld [vmem:[#allocation2 + $0x70] sm:$0xff] }
 0x1d2   :  { %1278 = vmatmul.mubr.f32.gmra.mrb[86].mxu1 %v101_v40  ;;  %3294 = vmatprep.subr.bf16.mxu0 %v4064_v35  ;;  %v3007_v33 = vpop.f32.mrb[64].mxu0  ;;  %v343_v40 = vld [vmem:[#allocation10 + $0x138] sm:$0xff] }
 0x1d3   :  { %1503 = vmatmul.mubr.f32.gmra.mrb[86].mxu0 %v165_v47  ;;  %1282 = vmatprep.mubr.f32.mxu1 %v104_v53  ;;  %v4633_v43 = vadd.f32 %v3007_v33, %v4621_v60  ;;  %v1119_v44 = vpop.f32.mrb[65].mxu0  ;;  %v347_v47 = vld [vmem:[#allocation10 + $0x158] sm:$0xff]  ;;  %v350_v53 = vld [vmem:[#allocation10 + $0x170] sm:$0xff]  ;;  %v3247_v45 = vpack.c.bf16 %v343_v40, %v340_v36  ;;  %v357_v40 = vld [vmem:[#allocation10 + $0x1a8] sm:$0xff] }
 0x1d4   :  { %1507 = vmatprep.mubr.f32.mxu0 %v168_v51  ;;  %3236 = vmatpush1.bf16.msra.mxu1 %v3235_v56  ;;  %v4636_v58 = vadd.f32 %v1119_v44, %v4621_v60  ;;  %v3301_v51 = vpack.c.bf16 %v339_v8, %v336_v5  ;;  %v342_v56 = vld [vmem:[#allocation10 + $0x130] sm:$0xff]  ;;  %v348_v44 = vld [vmem:[#allocation10 + $0x160] sm:$0xff]  ;;  %v176_v5 = vld [vmem:[#allocation5 + $0x88] sm:$0xff] }
 0x1d5   :  { %3238 = vmatprep.subr.bf16.mxu1 %v3237_v12  ;;  %3296 = vmatpush1.bf16.msra.mxu0 %v3295_v30  ;;  %v345_v12 = vld [vmem:[#allocation10 + $0x148] sm:$0xff]  ;;  %v346_v33 = vld [vmem:[#allocation10 + $0x150] sm:$0xff] }
 0x1d6   :  { %1283 = vmatmul.mubr.f32.gmra.mrb[88].mxu1 %v103_v48  ;;  %3297 = vmatprep.subr.bf16.mxu0 %v4064_v35  ;;  %v3010_v11 = vpop.f32.mrb[66].mxu0  ;;  %v3249_v48 = vpack.c.bf16 %v350_v53, %v347_v47  ;;  %v112_v8 = vld [vmem:[#allocation2 + $0x88] sm:$0xff]  ;;  %v354_v36 = vld [vmem:[#allocation10 + $0x190] sm:$0xff] }
 0x1d7   :  { %1508 = vmatmul.mubr.f32.gmra.mrb[88].mxu0 %v167_v61  ;;  %1287 = vmatprep.mubr.f32.mxu1 %v106_v32  ;;  %v4640_v15 = vadd.f32 %v3010_v11, %v4621_v60  ;;  %v1129_v18 = vpop.f32.mrb[67].mxu0  ;;  %v349_v61 = vld [vmem:[#allocation10 + $0x168] sm:$0xff]  ;;  %v3304_v32 = vpack.c.bf16 %v345_v12, %v342_v56  ;;  %v175_v12 = vld [vmem:[#allocation5 + $0x80] sm:$0xff] }
 0x1d8   :  { %1512 = vmatprep.mubr.f32.mxu0 %v170_v9  ;;  %3240 = vmatpush1.bf16.msra.mxu1 %v3239_v37  ;;  %v4643_v28 = vadd.f32 %v1129_v18, %v4621_v60  ;;  %v353_v9 = vld [vmem:[#allocation10 + $0x188] sm:$0xff]  ;;  %v356_v37 = vld [vmem:[#allocation10 + $0x1a0] sm:$0xff]  ;;  %v3251_v11 = vpack.c.bf16 %v349_v61, %v346_v33  ;;  %v3310_v33 = vpack.c.bf16 %v357_v40, %v354_v36  ;;  %v366_v36 = vld [vmem:[#allocation10 + $0x1f0] sm:$0xff] }
 0x1d9   :  { %3242 = vmatprep.subr.bf16.mxu1 %v3241_v46  ;;  %3299 = vmatpush1.bf16.msra.mxu0 %v3298_v57  ;;  %v351_v46 = vld [vmem:[#allocation10 + $0x178] sm:$0xff]  ;;  %v3253_v18 = vpack.c.bf16 %v356_v37, %v353_v9  ;;  %v368_v61 = vld [vmem:[#allocation10 + $0x200] sm:$0xff]  ;;  %v369_v40 = vld [vmem:[#allocation10 + $0x208] sm:$0xff] }
 0x1da   :  { %1288 = vmatmul.mubr.f32.gmra.mrb[90].mxu1 %v105_v13  ;;  %3300 = vmatprep.subr.bf16.mxu0 %v4064_v35  ;;  %v3013_v14 = vpop.f32.mrb[68].mxu0  ;;  %v360_v9 = vld [vmem:[#allocation10 + $0x1c0] sm:$0xff] }
 0x1db   :  { %1513 = vmatmul.mubr.f32.gmra.mrb[90].mxu0 %v169_v19  ;;  %1292 = vmatprep.mubr.f32.mxu1 %v108_v24  ;;  %v4647_v23 = vadd.f32 %v3013_v14, %v4621_v60  ;;  %v1139_v30 = vpop.f32.mrb[69].mxu0  ;;  %v352_v19 = vld [vmem:[#allocation10 + $0x180] sm:$0xff]  ;;  %v359_v24 = vld [vmem:[#allocation10 + $0x1b8] sm:$0xff] }
 0x1dc   :  { %1517 = vmatprep.mubr.f32.mxu0 %v172_v22  ;;  %3244 = vmatpush1.bf16.msra.mxu1 %v3243_v26  ;;  %v4650_v21 = vadd.f32 %v1139_v30, %v4621_v60  ;;  %v355_v22 = vld [vmem:[#allocation10 + $0x198] sm:$0xff]  ;;  %v3307_v26 = vpack.c.bf16 %v351_v46, %v348_v44  ;;  %v113_v44 = vld [vmem:[#allocation2 + $0x90] sm:$0xff] }
 0x1dd   :  { %3246 = vmatprep.subr.bf16.mxu1 %v3245_v29  ;;  %3302 = vmatpush1.bf16.msra.mxu0 %v3301_v51  ;;  %v362_v29 = vld [vmem:[#allocation10 + $0x1d0] sm:$0xff]  ;;  %v111_v51 = vld [vmem:[#allocation2 + $0x80] sm:$0xff]  ;;  %v178_v14 = vld [vmem:[#allocation5 + $0x98] sm:$0xff]  ;;  %v3255_v30 = vpack.c.bf16 %v355_v22, %v352_v19 }
 0x1de   :  { %1293 = vmatmul.mubr.f32.gmra.mrb[92].mxu1 %v107_v17  ;;  %3303 = vmatprep.subr.bf16.mxu0 %v4064_v35  ;;  %v3016_v49 = vpop.f32.mrb[70].mxu0  ;;  %v114_v17 = vld [vmem:[#allocation2 + $0x98] sm:$0xff] }
 0x1df   :  { %1518 = vmatmul.mubr.f32.gmra.mrb[92].mxu0 %v171_v62  ;;  %1297 = vmatprep.mubr.f32.mxu1 %v110_v38  ;;  %v4654_v54 = vadd.f32 %v3016_v49, %v4621_v60  ;;  %v1149_v57 = vpop.f32.mrb[71].mxu0  ;;  %v358_v38 = vld [vmem:[#allocation10 + $0x1b0] sm:$0xff]  ;;  %v367_v19 = vld [vmem:[#allocation10 + $0x1f8] sm:$0xff] }
 0x1e0   :  { %1522 = vmatprep.mubr.f32.mxu0 %v174_v31  ;;  %3248 = vmatpush1.bf16.msra.mxu1 %v3247_v45  ;;  %v4657_v13 = vadd.f32 %v1149_v57, %v4621_v60  ;;  %v3257_v31 = vpack.c.bf16 %v362_v29, %v359_v24  ;;  %v361_v45 = vld [vmem:[#allocation10 + $0x1c8] sm:$0xff]  ;;  %v371_v22 = vld [vmem:[#allocation10 + $0x218] sm:$0xff] }
 0x1e1   :  { %3250 = vmatprep.subr.bf16.mxu1 %v3249_v48  ;;  %3305 = vmatpush1.bf16.msra.mxu0 %v3304_v32  ;;  %v365_v48 = vld [vmem:[#allocation10 + $0x1e8] sm:$0xff]  ;;  %v363_v32 = vld [vmem:[#allocation10 + $0x1d8] sm:$0xff] }
 0x1e2   :  { %1298 = vmatmul.mubr.f32.gmra.mrb[94].mxu1 %v109_v50  ;;  %3306 = vmatprep.subr.bf16.mxu0 %v4064_v35  ;;  %v3019_v47 = vpop.f32.mrb[72].mxu0  ;;  %v177_v50 = vld [vmem:[#allocation5 + $0x90] sm:$0xff]  ;;  %v180_v57 = vld [vmem:[#allocation5 + $0xa8] sm:$0xff]  ;;  %v3313_v24 = vpack.c.bf16 %v363_v32, %v360_v9  ;;  %v380_v9 = vld [vmem:[#allocation10 + $0x260] sm:$0xff] }
 0x1e3   :  { %1523 = vmatmul.mubr.f32.gmra.mrb[94].mxu0 %v173_v2  ;;  %1302 = vmatprep.mubr.f32.mxu1 %v112_v8  ;;  %v4661_v53 = vadd.f32 %v3019_v47, %v4621_v60  ;;  %v1159_v56 = vpop.f32.mrb[73].mxu0  ;;  %v116_v2 = vld [vmem:[#allocation2 + $0xa8] sm:$0xff]  ;;  %v115_v47 = vld [vmem:[#allocation2 + $0xa0] sm:$0xff] }
 0x1e4   :  { %1527 = vmatprep.mubr.f32.mxu0 %v176_v5  ;;  %3252 = vmatpush1.bf16.msra.mxu1 %v3251_v11  ;;  %v4664_v62 = vadd.f32 %v1159_v56, %v4621_v60  ;;  %v3259_v5 = vpack.c.bf16 %v361_v45, %v358_v38  ;;  %v3261_v11 = vpack.c.bf16 %v368_v61, %v365_v48  ;;  %v370_v45 = vld [vmem:[#allocation10 + $0x210] sm:$0xff]  ;;  %v373_v48 = vld [vmem:[#allocation10 + $0x228] sm:$0xff] }
 0x1e5   :  { %3254 = vmatprep.subr.bf16.mxu1 %v3253_v18  ;;  %3308 = vmatpush1.bf16.msra.mxu0 %v3307_v26  ;;  %v364_v18 = vld [vmem:[#allocation10 + $0x1e0] sm:$0xff]  ;;  %v374_v26 = vld [vmem:[#allocation10 + $0x230] sm:$0xff]  ;;  %v377_v61 = vld [vmem:[#allocation10 + $0x248] sm:$0xff] }
 0x1e6   :  { %1303 = vmatmul.mubr.f32.gmra.mrb[96].mxu1 %v111_v51  ;;  %3309 = vmatprep.subr.bf16.mxu0 %v4064_v35  ;;  %v3022_v37 = vpop.f32.mrb[74].mxu0  ;;  %v3265_v38 = vpack.c.bf16 %v374_v26, %v371_v22  ;;  %v379_v22 = vld [vmem:[#allocation10 + $0x258] sm:$0xff]  ;;  %v386_v26 = vld [vmem:[#allocation10 + $0x290] sm:$0xff] }
 0x1e7   :  { %1528 = vmatmul.mubr.f32.gmra.mrb[96].mxu0 %v175_v12  ;;  %1307 = vmatprep.mubr.f32.mxu1 %v114_v17  ;;  %v4668_v46 = vadd.f32 %v3022_v37, %v4621_v60  ;;  %v1169_v49 = vpop.f32.mrb[75].mxu0  ;;  %v179_v12 = vld [vmem:[#allocation5 + $0xa0] sm:$0xff]  ;;  %v3263_v17 = vpack.c.bf16 %v367_v19, %v364_v18  ;;  %v117_v37 = vld [vmem:[#allocation2 + $0xb0] sm:$0xff]  ;;  %v3269_v18 = vpack.c.bf16 %v380_v9, %v377_v61  ;;  %v188_v9 = vld [vmem:[#allocation5 + $0xe8] sm:$0xff] }
 0x1e8   :  { %1532 = vmatprep.mubr.f32.mxu0 %v178_v14  ;;  %3256 = vmatpush1.bf16.msra.mxu1 %v3255_v30  ;;  %v4671_v8 = vadd.f32 %v1169_v49, %v4621_v60  ;;  %v118_v14 = vld [vmem:[#allocation2 + $0xb8] sm:$0xff]  ;;  %v376_v19 = vld [vmem:[#allocation10 + $0x240] sm:$0xff] }
 0x1e9   :  { %5100 = vst [vmem:[#allocation16_spill] sm:$0xff] %v4668_v46  ;;  %3258 = vmatprep.subr.bf16.mxu1 %v3257_v31  ;;  %3311 = vmatpush1.bf16.msra.mxu0 %v3310_v33  ;;  %v182_v31 = vld [vmem:[#allocation5 + $0xb8] sm:$0xff]  ;;  %v3316_v33 = vpack.c.bf16 %v369_v40, %v366_v36  ;;  %v183_v36 = vld [vmem:[#allocation5 + $0xc0] sm:$0xff] }
 0x1ea   :  { %1308 = vmatmul.mubr.f32.gmra.mrb[98].mxu1 %v113_v44  ;;  %3312 = vmatprep.subr.bf16.mxu0 %v4064_v35  ;;  %v3025_v29 = vpop.f32.mrb[76].mxu0  ;;  %v122_v40 = vld [vmem:[#allocation2 + $0xd8] sm:$0xff] }
 0x1eb   :  { %1533 = vmatmul.mubr.f32.gmra.mrb[98].mxu0 %v177_v50  ;;  %1312 = vmatprep.mubr.f32.mxu1 %v116_v2  ;;  %v4675_v51 = vadd.f32 %v3025_v29, %v4621_v60  ;;  %v1179_v56 = vpop.f32.mrb[77].mxu0  ;;  %v181_v50 = vld [vmem:[#allocation5 + $0xb0] sm:$0xff]  ;;  %v3267_v2 = vpack.c.bf16 %v373_v48, %v370_v45  ;;  %v119_v29 = vld [vmem:[#allocation2 + $0xc0] sm:$0xff] }
 0x1ec   :  { %1537 = vmatprep.mubr.f32.mxu0 %v180_v57  ;;  %3260 = vmatpush1.bf16.msra.mxu1 %v3259_v5  ;;  %v4678_v30 = vadd.f32 %v1179_v56, %v4621_v60  ;;  %v120_v57 = vld [vmem:[#allocation2 + $0xc8] sm:$0xff]  ;;  %v186_v56 = vld [vmem:[#allocation5 + $0xd8] sm:$0xff]  ;;  %v121_v45 = vld [vmem:[#allocation2 + $0xd0] sm:$0xff] }
 0x1ed   :  { %5101 = vst [vmem:[#allocation17_spill] sm:$0xff] %v4675_v51  ;;  %3262 = vmatprep.subr.bf16.mxu1 %v3261_v11  ;;  %3314 = vmatpush1.bf16.msra.mxu0 %v3313_v24  ;;  %v184_v11 = vld [vmem:[#allocation5 + $0xc8] sm:$0xff]  ;;  %v383_v24 = vld [vmem:[#allocation10 + $0x278] sm:$0xff]  ;;  %v185_v48 = vld [vmem:[#allocation5 + $0xd0] sm:$0xff] }
 0x1ee   :  { %5102 = vst [vmem:[#allocation18_spill] sm:$0xff] %v4678_v30  ;;  %1313 = vmatmul.mubr.f32.gmra.mrb[100].mxu1 %v115_v47  ;;  %3315 = vmatprep.subr.bf16.mxu0 %v4064_v35  ;;  %v3028_v32 = vpop.f32.mrb[78].mxu0  ;;  %v3271_v47 = vpack.c.bf16 %v379_v22, %v376_v19  ;;  %v190_v22 = vld [vmem:[#allocation5 + $0xf8] sm:$0xff] }
 0x1ef   :  { %1538 = vmatmul.mubr.f32.gmra.mrb[100].mxu0 %v179_v12  ;;  %1317 = vmatprep.mubr.f32.mxu1 %v118_v14  ;;  %v4682_v44 = vadd.f32 %v3028_v32, %v4621_v60  ;;  %v1189_v49 = vpop.f32.mrb[79].mxu0  ;;  %v3273_v12 = vpack.c.bf16 %v386_v26, %v383_v24  ;;  %v382_v14 = vld [vmem:[#allocation10 + $0x270] sm:$0xff] }
 0x1f0   :  { %1542 = vmatprep.mubr.f32.mxu0 %v182_v31  ;;  %3264 = vmatpush1.bf16.msra.mxu1 %v3263_v17  ;;  %v4685_v5 = vadd.f32 %v1189_v49, %v4621_v60  ;;  %v385_v17 = vld [vmem:[#allocation10 + $0x288] sm:$0xff]  ;;  %v391_v49 = vld [vmem:[#allocation10 + $0x2b8] sm:$0xff]  ;;  %v394_v26 = vld [vmem:[#allocation10 + $0x2d0] sm:$0xff] }
 0x1f1   :  { %5103 = vst [vmem:[#allocation19_spill] sm:$0xff] %v4682_v44  ;;  %3266 = vmatprep.subr.bf16.mxu1 %v3265_v38  ;;  %3317 = vmatpush1.bf16.msra.mxu0 %v3316_v33  ;;  %v389_v31 = vld [vmem:[#allocation10 + $0x2a8] sm:$0xff]  ;;  %v392_v38 = vld [vmem:[#allocation10 + $0x2c0] sm:$0xff]  ;;  %v3275_v61 = vpack.c.bf16 %v385_v17, %v382_v14 }
 0x1f2   :  { %5104 = vst [vmem:[#allocation20_spill] sm:$0xff] %v4685_v5  ;;  %1318 = vmatmul.mubr.f32.gmra.mrb[102].mxu1 %v117_v37  ;;  %3318 = vmatprep.subr.bf16.mxu0 %v4064_v35  ;;  %v124_v33 = vld [vmem:[#allocation2 + $0xe8] sm:$0xff]  ;;  %v3277_v32 = vpack.c.bf16 %v392_v38, %v389_v31  ;;  %v388_v37 = vld [vmem:[#allocation10 + $0x2a0] sm:$0xff]  ;;  %v130_v31 = vld [vmem:[#allocation2 + $0x118] sm:$0xff] }
 0x1f3   :  { %1543 = vmatmul.mubr.f32.gmra.mrb[102].mxu0 %v181_v50  ;;  %1322 = vmatprep.mubr.f32.mxu1 %v120_v57  ;;  %v395_v50 = vld [vmem:[#allocation10 + $0x2d8] sm:$0xff]  ;;  %v398_v57 = vld [vmem:[#allocation10 + $0x2f0] sm:$0xff]  ;;  %v3279_v19 = vpack.c.bf16 %v391_v49, %v388_v37  ;;  %v127_v14 = vld [vmem:[#allocation2 + $0x100] sm:$0xff] }
 0x1f4   :  { %1547 = vmatprep.mubr.f32.mxu0 %v184_v11  ;;  %3268 = vmatpush1.bf16.msra.mxu1 %v3267_v2  ;;  %v123_v2 = vld [vmem:[#allocation2 + $0xe0] sm:$0xff]  ;;  %v3281_v24 = vpack.c.bf16 %v398_v57, %v395_v50  ;;  %v194_v38 = vld [vmem:[#allocation5 + $0x118] sm:$0xff]  ;;  %v196_v37 = vld [vmem:[#allocation5 + $0x128] sm:$0xff] }
 0x1f5   :  { %3270 = vmatprep.subr.bf16.mxu1 %v3269_v18  ;;  %v187_v11 = vld [vmem:[#allocation5 + $0xe0] sm:$0xff]  ;;  %v126_v18 = vld [vmem:[#allocation2 + $0xf8] sm:$0xff]  ;;  %v378_v49 = vld [vmem:[#allocation10 + $0x250] sm:$0xff] }
 0x1f6   :  { %1323 = vmatmul.mubr.f32.gmra.mrb[104].mxu1 %v119_v29  ;;  %v397_v29 = vld [vmem:[#allocation10 + $0x2e8] sm:$0xff]  ;;  %v191_v17 = vld [vmem:[#allocation5 + $0x100] sm:$0xff] }
 0x1f7   :  { %1548 = vmatmul.mubr.f32.gmra.mrb[104].mxu0 %v183_v36  ;;  %1327 = vmatprep.mubr.f32.mxu1 %v122_v40  ;;  %v125_v36 = vld [vmem:[#allocation2 + $0xf0] sm:$0xff]  ;;  %v381_v50 = vld [vmem:[#allocation10 + $0x268] sm:$0xff]  ;;  %v131_v57 = vld [vmem:[#allocation2 + $0x120] sm:$0xff] }
 0x1f8   :  { %1552 = vmatprep.mubr.f32.mxu0 %v186_v56  ;;  %3272 = vmatpush1.bf16.msra.mxu1 %v3271_v47  ;;  %v189_v40 = vld [vmem:[#allocation5 + $0xf0] sm:$0xff]  ;;  %v128_v47 = vld [vmem:[#allocation2 + $0x108] sm:$0xff]  ;;  %v3283_v56 = vpack.c.bf16 %v397_v29, %v394_v26 }
 0x1f9   :  { %3274 = vmatprep.subr.bf16.mxu1 %v3273_v12  ;;  %v192_v12 = vld [vmem:[#allocation5 + $0x108] sm:$0xff]  ;;  %v133_v26 = vld [vmem:[#allocation2 + $0x130] sm:$0xff] }
 0x1fa   :  { %1328 = vmatmul.mubr.f32.gmra.mrb[106].mxu1 %v121_v45  ;;  %v372_v45 = vld [vmem:[#allocation10 + $0x220] sm:$0xff] }
 0x1fb   :  { %1553 = vmatmul.mubr.f32.gmra.mrb[106].mxu0 %v185_v48  ;;  %1332 = vmatprep.mubr.f32.mxu1 %v124_v33  ;;  %v375_v48 = vld [vmem:[#allocation10 + $0x238] sm:$0xff]  ;;  %v129_v33 = vld [vmem:[#allocation2 + $0x110] sm:$0xff] }
 0x1fc   :  { %1557 = vmatprep.mubr.f32.mxu0 %v188_v9  ;;  %3276 = vmatpush1.bf16.msra.mxu1 %v3275_v61  ;;  %v3319_v61 = vpack.c.bf16 %v375_v48, %v372_v45  ;;  %v193_v9 = vld [vmem:[#allocation5 + $0x110] sm:$0xff]  ;;  %v202_v45 = vld [vmem:[#allocation5 + $0x158] sm:$0xff]  ;;  %v396_v48 = vld [vmem:[#allocation10 + $0x2e0] sm:$0xff] }
 0x1fd   :  { %3278 = vmatprep.subr.bf16.mxu1 %v3277_v32  ;;  %v132_v32 = vld [vmem:[#allocation2 + $0x128] sm:$0xff] }
 0x1fe   :  { %1333 = vmatmul.mubr.f32.gmra.mrb[108].mxu1 %v123_v2  ;;  %3320 = vmatpush1.bf16.msra.mxu0 %v3319_v61  ;;  %v3322_v2 = vpack.c.bf16 %v381_v50, %v378_v49  ;;  %v137_v61 = vld [vmem:[#allocation2 + $0x150] sm:$0xff]  ;;  %v204_v49 = vld [vmem:[#allocation5 + $0x168] sm:$0xff]  ;;  %v139_v50 = vld [vmem:[#allocation2 + $0x160] sm:$0xff] }
 0x1ff   :  { %1558 = vmatmul.mubr.f32.gmra.mrb[108].mxu0 %v187_v11  ;;  %1337 = vmatprep.mubr.f32.mxu1 %v126_v18  ;;  %v195_v11 = vld [vmem:[#allocation5 + $0x120] sm:$0xff]  ;;  %v134_v18 = vld [vmem:[#allocation2 + $0x138] sm:$0xff] }
 0x200   :  { %1562 = vmatprep.mubr.f32.mxu0 %v190_v22  ;;  %3280 = vmatpush1.bf16.msra.mxu1 %v3279_v19  ;;  %v198_v19 = vld [vmem:[#allocation5 + $0x138] sm:$0xff]  ;;  %v384_v22 = vld [vmem:[#allocation10 + $0x280] sm:$0xff] }
 0x201   :  { %3282 = vmatprep.subr.bf16.mxu1 %v3281_v24  ;;  %3321 = vmatprep.subr.bf16.mxu0 %v4064_v35  ;;  %v387_v24 = vld [vmem:[#allocation10 + $0x298] sm:$0xff] }
 0x202   :  { %1338 = vmatmul.mubr.f32.gmra.mrb[110].mxu1 %v125_v36  ;;  %3323 = vmatpush1.bf16.msra.mxu0 %v3322_v2  ;;  %v3325_v29 = vpack.c.bf16 %v387_v24, %v384_v22  ;;  %v197_v36 = vld [vmem:[#allocation5 + $0x130] sm:$0xff]  ;;  %v142_v2 = vld [vmem:[#allocation2 + $0x178] sm:$0xff]  ;;  %v208_v22 = vld [vmem:[#allocation5 + $0x188] sm:$0xff] }
 0x203   :  { %1563 = vmatmul.mubr.f32.gmra.mrb[110].mxu0 %v189_v40  ;;  %1342 = vmatprep.mubr.f32.mxu1 %v128_v47  ;;  %v136_v40 = vld [vmem:[#allocation2 + $0x148] sm:$0xff]  ;;  %v143_v24 = vld [vmem:[#allocation2 + $0x180] sm:$0xff] }
 0x204   :  { %1567 = vmatprep.mubr.f32.mxu0 %v192_v12  ;;  %3284 = vmatpush1.bf16.msra.mxu1 %v3283_v56  ;;  %v200_v47 = vld [vmem:[#allocation5 + $0x148] sm:$0xff]  ;;  %v390_v56 = vld [vmem:[#allocation10 + $0x2b0] sm:$0xff] }
 0x205   :  { %3324 = vmatprep.subr.bf16.mxu0 %v4064_v35  ;;  %v393_v12 = vld [vmem:[#allocation10 + $0x2c8] sm:$0xff] }
 0x206   :  { %1343 = vmatmul.mubr.f32.gmra.mrb[112].mxu1 %v127_v14  ;;  %3326 = vmatpush1.bf16.msra.mxu0 %v3325_v29  ;;  %v135_v14 = vld [vmem:[#allocation2 + $0x140] sm:$0xff]  ;;  %v146_v29 = vld [vmem:[#allocation2 + $0x198] sm:$0xff] }
 0x207   :  { %1568 = vmatmul.mubr.f32.gmra.mrb[112].mxu0 %v191_v17  ;;  %1347 = vmatprep.mubr.f32.mxu1 %v130_v31  ;;  %v3328_v17 = vpack.c.bf16 %v393_v12, %v390_v56  ;;  %v199_v31 = vld [vmem:[#allocation5 + $0x140] sm:$0xff]  ;;  %v148_v56 = vld [vmem:[#allocation2 + $0x1a8] sm:$0xff] }
 0x208   :  { %1572 = vmatprep.mubr.f32.mxu0 %v194_v38  ;;  %3327 = vmatprep.subr.bf16.mxu0 %v4064_v35  ;;  %v138_v38 = vld [vmem:[#allocation2 + $0x158] sm:$0xff]  ;;  %v212_v12 = vld [vmem:[#allocation5 + $0x1a8] sm:$0xff] }
 0x20a   :  { %1348 = vmatmul.mubr.f32.gmra.mrb[114].mxu1 %v129_v33  ;;  %3329 = vmatpush1.bf16.msra.mxu0 %v3328_v17  ;;  %v399_v33 = vld [vmem:[#allocation10 + $0x2f8] sm:$0xff]  ;;  %v211_v17 = vld [vmem:[#allocation5 + $0x1a0] sm:$0xff] }
 0x20b   :  { %1573 = vmatmul.mubr.f32.gmra.mrb[114].mxu0 %v193_v9  ;;  %1352 = vmatprep.mubr.f32.mxu1 %v132_v32  ;;  %v3331_v9 = vpack.c.bf16 %v399_v33, %v396_v48  ;;  %v201_v32 = vld [vmem:[#allocation5 + $0x150] sm:$0xff]  ;;  %v152_v33 = vld [vmem:[#allocation2 + $0x1c8] sm:$0xff] }
 0x20c   :  { %1577 = vmatprep.mubr.f32.mxu0 %v196_v37  ;;  %3330 = vmatprep.subr.bf16.mxu0 %v4064_v35  ;;  %v140_v37 = vld [vmem:[#allocation2 + $0x168] sm:$0xff]  ;;  %v141_v35 = vld [vmem:[#allocation2 + $0x170] sm:$0xff] }
 0x20d   :  { %v213_v48 = vld [vmem:[#allocation5 + $0x1b0] sm:$0xff] }
 0x20e   :  { %1353 = vmatmul.mubr.f32.gmra.mrb[116].mxu1 %v131_v57  ;;  %3332 = vmatpush1.bf16.msra.mxu0 %v3331_v9  ;;  %v203_v57 = vld [vmem:[#allocation5 + $0x160] sm:$0xff] }
 0x20f   :  { %1578 = vmatmul.mubr.f32.gmra.mrb[116].mxu0 %v195_v11  ;;  %1357 = vmatprep.mubr.f32.mxu1 %v134_v18  ;;  %v206_v11 = vld [vmem:[#allocation5 + $0x178] sm:$0xff]  ;;  %v205_v18 = vld [vmem:[#allocation5 + $0x170] sm:$0xff]  ;;  %v151_v9 = vld [vmem:[#allocation2 + $0x1c0] sm:$0xff] }
 0x210   :  { %1582 = vmatprep.mubr.f32.mxu0 %v198_v19  ;;  %v144_v19 = vld [vmem:[#allocation2 + $0x188] sm:$0xff] }
 0x212   :  { %1358 = vmatmul.mubr.f32.gmra.mrb[118].mxu1 %v133_v26  ;;  %v207_v26 = vld [vmem:[#allocation5 + $0x180] sm:$0xff] }
 0x213   :  { %1583 = vmatmul.mubr.f32.gmra.mrb[118].mxu0 %v197_v36  ;;  %1362 = vmatprep.mubr.f32.mxu1 %v136_v40  ;;  %v210_v36 = vld [vmem:[#allocation5 + $0x198] sm:$0xff]  ;;  %v145_v40 = vld [vmem:[#allocation2 + $0x190] sm:$0xff] }
 0x214   :  { %1587 = vmatprep.mubr.f32.mxu0 %v200_v47  ;;  %v209_v47 = vld [vmem:[#allocation5 + $0x190] sm:$0xff] }
 0x216   :  { %1363 = vmatmul.mubr.f32.gmra.mrb[120].mxu1 %v135_v14  ;;  %v147_v14 = vld [vmem:[#allocation2 + $0x1a0] sm:$0xff] }
 0x217   :  { %1588 = vmatmul.mubr.f32.gmra.mrb[120].mxu0 %v199_v31  ;;  %1367 = vmatprep.mubr.f32.mxu1 %v138_v38  ;;  %v150_v31 = vld [vmem:[#allocation2 + $0x1b8] sm:$0xff] }
 0x218   :  { %1592 = vmatprep.mubr.f32.mxu0 %v202_v45  ;;  %v214_v38 = vld [vmem:[#allocation5 + $0x1b8] sm:$0xff]  ;;  %v149_v45 = vld [vmem:[#allocation2 + $0x1b0] sm:$0xff] }
 0x21a   :  { %1368 = vmatmul.mubr.f32.gmra.mrb[122].mxu1 %v137_v61  ;;  %v216_v61 = vld [vmem:[#allocation5 + $0x1c8] sm:$0xff] }
 0x21b   :  { %1593 = vmatmul.mubr.f32.gmra.mrb[122].mxu0 %v201_v32  ;;  %1372 = vmatprep.mubr.f32.mxu1 %v140_v37  ;;  %v215_v32 = vld [vmem:[#allocation5 + $0x1c0] sm:$0xff]  ;;  %v154_v37 = vld [vmem:[#allocation2 + $0x1d8] sm:$0xff] }
 0x21c   :  { %1597 = vmatprep.mubr.f32.mxu0 %v204_v49  ;;  %v218_v49 = vld [vmem:[#allocation5 + $0x1d8] sm:$0xff] }
 0x21e   :  { %1373 = vmatmul.mubr.f32.gmra.mrb[124].mxu1 %v139_v50  ;;  %v153_v50 = vld [vmem:[#allocation2 + $0x1d0] sm:$0xff] }
 0x21f   :  { %1598 = vmatmul.mubr.f32.gmra.mrb[124].mxu0 %v203_v57  ;;  %1377 = vmatprep.mubr.f32.mxu1 %v142_v2  ;;  %v217_v57 = vld [vmem:[#allocation5 + $0x1d0] sm:$0xff]  ;;  %v156_v2 = vld [vmem:[#allocation2 + $0x1e8] sm:$0xff] }
 0x220   :  { %1602 = vmatprep.mubr.f32.mxu0 %v206_v11  ;;  %v220_v11 = vld [vmem:[#allocation5 + $0x1e8] sm:$0xff] }
 0x222   :  { %1378 = vmatmul.mubr.f32.gmra.mrb[126].mxu1 %v141_v35  ;;  %v155_v35 = vld [vmem:[#allocation2 + $0x1e0] sm:$0xff] }
 0x223   :  { %1603 = vmatmul.mubr.f32.gmra.mrb[126].mxu0 %v205_v18  ;;  %1382 = vmatprep.mubr.f32.mxu1 %v144_v19  ;;  %v219_v18 = vld [vmem:[#allocation5 + $0x1e0] sm:$0xff]  ;;  %v158_v19 = vld [vmem:[#allocation2 + $0x1f8] sm:$0xff] }
 0x224   :  { %1607 = vmatprep.mubr.f32.mxu0 %v208_v22  ;;  %v222_v22 = vld [vmem:[#allocation5 + $0x1f8] sm:$0xff] }
 0x226   :  { %1383 = vmatmul.mubr.f32.gmra.mrb[128].mxu1 %v143_v24  ;;  %v157_v24 = vld [vmem:[#allocation2 + $0x1f0] sm:$0xff] }
 0x227   :  { %1608 = vmatmul.mubr.f32.gmra.mrb[128].mxu0 %v207_v26  ;;  %1387 = vmatprep.mubr.f32.mxu1 %v146_v29  ;;  %v221_v26 = vld [vmem:[#allocation5 + $0x1f0] sm:$0xff] }
 0x228   :  { %1612 = vmatprep.mubr.f32.mxu0 %v210_v36 }
 0x22a   :  { %1388 = vmatmul.mubr.f32.gmra.mrb[130].mxu1 %v145_v40 }
 0x22b   :  { %1613 = vmatmul.mubr.f32.gmra.mrb[130].mxu0 %v209_v47  ;;  %1392 = vmatprep.mubr.f32.mxu1 %v148_v56 }
 0x22c   :  { %1617 = vmatprep.mubr.f32.mxu0 %v212_v12 }
 0x22e   :  { %1393 = vmatmul.mubr.f32.gmra.mrb[132].mxu1 %v147_v14 }
 0x22f   :  { %1618 = vmatmul.mubr.f32.gmra.mrb[132].mxu0 %v211_v17  ;;  %1397 = vmatprep.mubr.f32.mxu1 %v150_v31 }
 0x230   :  { %1622 = vmatprep.mubr.f32.mxu0 %v214_v38 }
 0x232   :  { %1398 = vmatmul.mubr.f32.gmra.mrb[134].mxu1 %v149_v45 }
 0x233   :  { %1623 = vmatmul.mubr.f32.gmra.mrb[134].mxu0 %v213_v48  ;;  %1402 = vmatprep.mubr.f32.mxu1 %v152_v33 }
 0x234   :  { %1627 = vmatprep.mubr.f32.mxu0 %v216_v61 }
 0x236   :  { %1403 = vmatmul.mubr.f32.gmra.mrb[136].mxu1 %v151_v9 }
 0x237   :  { %1628 = vmatmul.mubr.f32.gmra.mrb[136].mxu0 %v215_v32  ;;  %1407 = vmatprep.mubr.f32.mxu1 %v154_v37 }
 0x238   :  { %1632 = vmatprep.mubr.f32.mxu0 %v218_v49 }
 0x23a   :  { %1408 = vmatmul.mubr.f32.gmra.mrb[138].mxu1 %v153_v50 }
 0x23b   :  { %1633 = vmatmul.mubr.f32.gmra.mrb[138].mxu0 %v217_v57  ;;  %1412 = vmatprep.mubr.f32.mxu1 %v156_v2 }
 0x23c   :  { %1637 = vmatprep.mubr.f32.mxu0 %v220_v11 }
 0x23e   :  { %1413 = vmatmul.mubr.f32.gmra.mrb[140].mxu1 %v155_v35 }
 0x23f   :  { %1638 = vmatmul.mubr.f32.gmra.mrb[140].mxu0 %v219_v18  ;;  %1417 = vmatprep.mubr.f32.mxu1 %v158_v19 }
 0x240   :  { %1642 = vmatprep.mubr.f32.mxu0 %v222_v22 }
 0x242   :  { %1418 = vmatmul.mubr.f32.gmra.mrb[142].mxu1 %v157_v24 }
 0x243   :  { %1643 = vmatmul.mubr.f32.gmra.mrb[142].mxu0 %v221_v26 }
 0x299   :  { %v1264_v29 = vpop.f32.mrb[80].mxu1 }
 0x29a   :  { %v1489_v36 = vpop.f32.mrb[80].mxu0  ;;  %v1266_v40 = vpop.f32.mrb[81].mxu1 }
 0x29b   :  { %1728 = vmatprep.mubr.f32.mxu1 %v1489_v36  ;;  %v1491_v47 = vpop.f32.mrb[81].mxu0  ;;  %1985 = vmatprep.mubr.f32.mxu0 %v1489_v36 }
 0x29c   :  { %1729 = vmatmul.mubr.f32.vlgmr.msra.gmra.mrb[16].mxu1 %v1264_v29  ;;  %1986 = vmatmul.mubr.f32.vlgmr.msra.gmra.mrb[144].mxu0 %v1264_v29 }
 0x29d   :  { %v1269_v56 = vpop.f32.mrb[82].mxu1 }
 0x29e   :  { %v1494_v12 = vpop.f32.mrb[82].mxu0  ;;  %v1271_v14 = vpop.f32.mrb[83].mxu1 }
 0x29f   :  { %1734 = vmatprep.mubr.f32.mxu1 %v1494_v12  ;;  %v1496_v17 = vpop.f32.mrb[83].mxu0  ;;  %1990 = vmatprep.mubr.f32.mxu0 %v1494_v12 }
 0x2a0   :  { %1735 = vmatmul.mubr.f32.gmra.mrb[18].mxu1 %v1269_v56  ;;  %1991 = vmatmul.mubr.f32.gmra.mrb[146].mxu0 %v1269_v56 }
 0x2a1   :  { %v1274_v31 = vpop.f32.mrb[84].mxu1 }
 0x2a2   :  { %v1499_v38 = vpop.f32.mrb[84].mxu0  ;;  %v1276_v45 = vpop.f32.mrb[85].mxu1 }
 0x2a3   :  { %1740 = vmatprep.mubr.f32.mxu1 %v1499_v38  ;;  %v1501_v48 = vpop.f32.mrb[85].mxu0  ;;  %1995 = vmatprep.mubr.f32.mxu0 %v1499_v38 }
 0x2a4   :  { %1741 = vmatmul.mubr.f32.gmra.mrb[20].mxu1 %v1274_v31  ;;  %1996 = vmatmul.mubr.f32.gmra.mrb[148].mxu0 %v1274_v31 }
 0x2a5   :  { %v1279_v33 = vpop.f32.mrb[86].mxu1 }
 0x2a6   :  { %v1504_v61 = vpop.f32.mrb[86].mxu0  ;;  %v1281_v9 = vpop.f32.mrb[87].mxu1 }
 0x2a7   :  { %1746 = vmatprep.mubr.f32.mxu1 %v1504_v61  ;;  %v1506_v32 = vpop.f32.mrb[87].mxu0  ;;  %2000 = vmatprep.mubr.f32.mxu0 %v1504_v61 }
 0x2a8   :  { %1747 = vmatmul.mubr.f32.gmra.mrb[22].mxu1 %v1279_v33  ;;  %2001 = vmatmul.mubr.f32.gmra.mrb[150].mxu0 %v1279_v33 }
 0x2a9   :  { %v1284_v37 = vpop.f32.mrb[88].mxu1 }
 0x2aa   :  { %v1509_v49 = vpop.f32.mrb[88].mxu0  ;;  %v1286_v50 = vpop.f32.mrb[89].mxu1 }
 0x2ab   :  { %1752 = vmatprep.mubr.f32.mxu1 %v1509_v49  ;;  %v1511_v57 = vpop.f32.mrb[89].mxu0  ;;  %2005 = vmatprep.mubr.f32.mxu0 %v1509_v49 }
 0x2ac   :  { %1753 = vmatmul.mubr.f32.gmra.mrb[24].mxu1 %v1284_v37  ;;  %2006 = vmatmul.mubr.f32.gmra.mrb[152].mxu0 %v1284_v37 }
 0x2ad   :  { %v1289_v2 = vpop.f32.mrb[90].mxu1 }
 0x2ae   :  { %v1514_v11 = vpop.f32.mrb[90].mxu0  ;;  %v1291_v35 = vpop.f32.mrb[91].mxu1 }
 0x2af   :  { %1758 = vmatprep.mubr.f32.mxu1 %v1514_v11  ;;  %v1516_v18 = vpop.f32.mrb[91].mxu0  ;;  %2010 = vmatprep.mubr.f32.mxu0 %v1514_v11 }
 0x2b0   :  { %1759 = vmatmul.mubr.f32.gmra.mrb[26].mxu1 %v1289_v2  ;;  %2011 = vmatmul.mubr.f32.gmra.mrb[154].mxu0 %v1289_v2 }
 0x2b1   :  { %v1294_v19 = vpop.f32.mrb[92].mxu1 }
 0x2b2   :  { %v1519_v22 = vpop.f32.mrb[92].mxu0  ;;  %v1296_v24 = vpop.f32.mrb[93].mxu1 }
 0x2b3   :  { %1764 = vmatprep.mubr.f32.mxu1 %v1519_v22  ;;  %v1521_v26 = vpop.f32.mrb[93].mxu0  ;;  %2015 = vmatprep.mubr.f32.mxu0 %v1519_v22 }
 0x2b4   :  { %1765 = vmatmul.mubr.f32.gmra.mrb[28].mxu1 %v1294_v19  ;;  %2016 = vmatmul.mubr.f32.gmra.mrb[156].mxu0 %v1294_v19 }
 0x2b5   :  { %v1299_v29 = vpop.f32.mrb[94].mxu1 }
 0x2b6   :  { %v1524_v36 = vpop.f32.mrb[94].mxu0  ;;  %v1301_v40 = vpop.f32.mrb[95].mxu1 }
 0x2b7   :  { %1770 = vmatprep.mubr.f32.mxu1 %v1524_v36  ;;  %v1526_v47 = vpop.f32.mrb[95].mxu0  ;;  %2020 = vmatprep.mubr.f32.mxu0 %v1524_v36 }
 0x2b8   :  { %1771 = vmatmul.mubr.f32.gmra.mrb[30].mxu1 %v1299_v29  ;;  %2021 = vmatmul.mubr.f32.gmra.mrb[158].mxu0 %v1299_v29 }
 0x2b9   :  { %v1304_v56 = vpop.f32.mrb[96].mxu1 }
 0x2ba   :  { %v1529_v12 = vpop.f32.mrb[96].mxu0  ;;  %v1306_v14 = vpop.f32.mrb[97].mxu1 }
 0x2bb   :  { %1776 = vmatprep.mubr.f32.mxu1 %v1529_v12  ;;  %v1531_v17 = vpop.f32.mrb[97].mxu0  ;;  %2025 = vmatprep.mubr.f32.mxu0 %v1529_v12 }
 0x2bc   :  { %1777 = vmatmul.mubr.f32.gmra.mrb[32].mxu1 %v1304_v56  ;;  %2026 = vmatmul.mubr.f32.gmra.mrb[160].mxu0 %v1304_v56 }
 0x2bd   :  { %v1309_v31 = vpop.f32.mrb[98].mxu1 }
 0x2be   :  { %v1534_v38 = vpop.f32.mrb[98].mxu0  ;;  %v1311_v45 = vpop.f32.mrb[99].mxu1 }
 0x2bf   :  { %1782 = vmatprep.mubr.f32.mxu1 %v1534_v38  ;;  %v1536_v48 = vpop.f32.mrb[99].mxu0  ;;  %2030 = vmatprep.mubr.f32.mxu0 %v1534_v38 }
 0x2c0   :  { %1783 = vmatmul.mubr.f32.gmra.mrb[34].mxu1 %v1309_v31  ;;  %2031 = vmatmul.mubr.f32.gmra.mrb[162].mxu0 %v1309_v31 }
 0x2c1   :  { %v1314_v33 = vpop.f32.mrb[100].mxu1 }
 0x2c2   :  { %v1539_v61 = vpop.f32.mrb[100].mxu0  ;;  %v1316_v9 = vpop.f32.mrb[101].mxu1 }
 0x2c3   :  { %1788 = vmatprep.mubr.f32.mxu1 %v1539_v61  ;;  %v1541_v32 = vpop.f32.mrb[101].mxu0  ;;  %2035 = vmatprep.mubr.f32.mxu0 %v1539_v61 }
 0x2c4   :  { %1789 = vmatmul.mubr.f32.gmra.mrb[36].mxu1 %v1314_v33  ;;  %2036 = vmatmul.mubr.f32.gmra.mrb[164].mxu0 %v1314_v33 }
 0x2c5   :  { %v1319_v37 = vpop.f32.mrb[102].mxu1 }
 0x2c6   :  { %v1544_v49 = vpop.f32.mrb[102].mxu0  ;;  %v1321_v50 = vpop.f32.mrb[103].mxu1 }
 0x2c7   :  { %1794 = vmatprep.mubr.f32.mxu1 %v1544_v49  ;;  %v1546_v57 = vpop.f32.mrb[103].mxu0  ;;  %2040 = vmatprep.mubr.f32.mxu0 %v1544_v49 }
 0x2c8   :  { %1795 = vmatmul.mubr.f32.gmra.mrb[38].mxu1 %v1319_v37  ;;  %2041 = vmatmul.mubr.f32.gmra.mrb[166].mxu0 %v1319_v37 }
 0x2c9   :  { %v1324_v2 = vpop.f32.mrb[104].mxu1 }
 0x2ca   :  { %v1549_v11 = vpop.f32.mrb[104].mxu0  ;;  %v1326_v35 = vpop.f32.mrb[105].mxu1 }
 0x2cb   :  { %1800 = vmatprep.mubr.f32.mxu1 %v1549_v11  ;;  %v1551_v18 = vpop.f32.mrb[105].mxu0  ;;  %2045 = vmatprep.mubr.f32.mxu0 %v1549_v11 }
 0x2cc   :  { %1801 = vmatmul.mubr.f32.gmra.mrb[40].mxu1 %v1324_v2  ;;  %2046 = vmatmul.mubr.f32.gmra.mrb[168].mxu0 %v1324_v2 }
 0x2cd   :  { %v1329_v19 = vpop.f32.mrb[106].mxu1 }
 0x2ce   :  { %v1554_v22 = vpop.f32.mrb[106].mxu0  ;;  %v1331_v24 = vpop.f32.mrb[107].mxu1 }
 0x2cf   :  { %1806 = vmatprep.mubr.f32.mxu1 %v1554_v22  ;;  %v1556_v26 = vpop.f32.mrb[107].mxu0  ;;  %2050 = vmatprep.mubr.f32.mxu0 %v1554_v22 }
 0x2d0   :  { %1807 = vmatmul.mubr.f32.gmra.mrb[42].mxu1 %v1329_v19  ;;  %2051 = vmatmul.mubr.f32.gmra.mrb[170].mxu0 %v1329_v19 }
 0x2d1   :  { %v1334_v29 = vpop.f32.mrb[108].mxu1 }
 0x2d2   :  { %v1559_v36 = vpop.f32.mrb[108].mxu0  ;;  %v1336_v40 = vpop.f32.mrb[109].mxu1 }
 0x2d3   :  { %1812 = vmatprep.mubr.f32.mxu1 %v1559_v36  ;;  %v1561_v47 = vpop.f32.mrb[109].mxu0  ;;  %2055 = vmatprep.mubr.f32.mxu0 %v1559_v36 }
 0x2d4   :  { %1813 = vmatmul.mubr.f32.gmra.mrb[44].mxu1 %v1334_v29  ;;  %2056 = vmatmul.mubr.f32.gmra.mrb[172].mxu0 %v1334_v29 }
 0x2d5   :  { %v1339_v56 = vpop.f32.mrb[110].mxu1 }
 0x2d6   :  { %v1564_v12 = vpop.f32.mrb[110].mxu0  ;;  %v1341_v14 = vpop.f32.mrb[111].mxu1 }
 0x2d7   :  { %1818 = vmatprep.mubr.f32.mxu1 %v1564_v12  ;;  %v1566_v17 = vpop.f32.mrb[111].mxu0  ;;  %2060 = vmatprep.mubr.f32.mxu0 %v1564_v12 }
 0x2d8   :  { %1819 = vmatmul.mubr.f32.gmra.mrb[46].mxu1 %v1339_v56  ;;  %2061 = vmatmul.mubr.f32.gmra.mrb[174].mxu0 %v1339_v56 }
 0x2d9   :  { %v1344_v31 = vpop.f32.mrb[112].mxu1 }
 0x2da   :  { %v1569_v38 = vpop.f32.mrb[112].mxu0  ;;  %v1346_v45 = vpop.f32.mrb[113].mxu1 }
 0x2db   :  { %1824 = vmatprep.mubr.f32.mxu1 %v1569_v38  ;;  %v1571_v48 = vpop.f32.mrb[113].mxu0  ;;  %2065 = vmatprep.mubr.f32.mxu0 %v1569_v38 }
 0x2dc   :  { %1825 = vmatmul.mubr.f32.gmra.mrb[48].mxu1 %v1344_v31  ;;  %2066 = vmatmul.mubr.f32.gmra.mrb[176].mxu0 %v1344_v31 }
 0x2dd   :  { %v1349_v33 = vpop.f32.mrb[114].mxu1 }
 0x2de   :  { %v1574_v61 = vpop.f32.mrb[114].mxu0  ;;  %v1351_v9 = vpop.f32.mrb[115].mxu1 }
 0x2df   :  { %1830 = vmatprep.mubr.f32.mxu1 %v1574_v61  ;;  %v1576_v32 = vpop.f32.mrb[115].mxu0  ;;  %2070 = vmatprep.mubr.f32.mxu0 %v1574_v61 }
 0x2e0   :  { %1831 = vmatmul.mubr.f32.gmra.mrb[50].mxu1 %v1349_v33  ;;  %2071 = vmatmul.mubr.f32.gmra.mrb[178].mxu0 %v1349_v33 }
 0x2e1   :  { %v1354_v37 = vpop.f32.mrb[116].mxu1 }
 0x2e2   :  { %v1579_v49 = vpop.f32.mrb[116].mxu0  ;;  %v1356_v50 = vpop.f32.mrb[117].mxu1 }
 0x2e3   :  { %1836 = vmatprep.mubr.f32.mxu1 %v1579_v49  ;;  %v1581_v57 = vpop.f32.mrb[117].mxu0  ;;  %2075 = vmatprep.mubr.f32.mxu0 %v1579_v49 }
 0x2e4   :  { %1837 = vmatmul.mubr.f32.gmra.mrb[52].mxu1 %v1354_v37  ;;  %2076 = vmatmul.mubr.f32.gmra.mrb[180].mxu0 %v1354_v37 }
 0x2e5   :  { %v1359_v2 = vpop.f32.mrb[118].mxu1 }
 0x2e6   :  { %v1584_v11 = vpop.f32.mrb[118].mxu0  ;;  %v1361_v35 = vpop.f32.mrb[119].mxu1 }
 0x2e7   :  { %1842 = vmatprep.mubr.f32.mxu1 %v1584_v11  ;;  %v1586_v18 = vpop.f32.mrb[119].mxu0  ;;  %2080 = vmatprep.mubr.f32.mxu0 %v1584_v11 }
 0x2e8   :  { %1843 = vmatmul.mubr.f32.gmra.mrb[54].mxu1 %v1359_v2  ;;  %2081 = vmatmul.mubr.f32.gmra.mrb[182].mxu0 %v1359_v2 }
 0x2e9   :  { %v1364_v19 = vpop.f32.mrb[120].mxu1 }
 0x2ea   :  { %v1589_v22 = vpop.f32.mrb[120].mxu0  ;;  %v1366_v24 = vpop.f32.mrb[121].mxu1 }
 0x2eb   :  { %1848 = vmatprep.mubr.f32.mxu1 %v1589_v22  ;;  %v1591_v26 = vpop.f32.mrb[121].mxu0  ;;  %2085 = vmatprep.mubr.f32.mxu0 %v1589_v22 }
 0x2ec   :  { %1849 = vmatmul.mubr.f32.gmra.mrb[56].mxu1 %v1364_v19  ;;  %2086 = vmatmul.mubr.f32.gmra.mrb[184].mxu0 %v1364_v19 }
 0x2ed   :  { %v1369_v29 = vpop.f32.mrb[122].mxu1 }
 0x2ee   :  { %v1594_v36 = vpop.f32.mrb[122].mxu0  ;;  %v1371_v40 = vpop.f32.mrb[123].mxu1 }
 0x2ef   :  { %1854 = vmatprep.mubr.f32.mxu1 %v1594_v36  ;;  %v1596_v47 = vpop.f32.mrb[123].mxu0  ;;  %2090 = vmatprep.mubr.f32.mxu0 %v1594_v36 }
 0x2f0   :  { %1855 = vmatmul.mubr.f32.gmra.mrb[58].mxu1 %v1369_v29  ;;  %2091 = vmatmul.mubr.f32.gmra.mrb[186].mxu0 %v1369_v29 }
 0x2f1   :  { %v1374_v56 = vpop.f32.mrb[124].mxu1 }
 0x2f2   :  { %v1599_v12 = vpop.f32.mrb[124].mxu0  ;;  %v1376_v14 = vpop.f32.mrb[125].mxu1 }
 0x2f3   :  { %1860 = vmatprep.mubr.f32.mxu1 %v1599_v12  ;;  %v1601_v17 = vpop.f32.mrb[125].mxu0  ;;  %2095 = vmatprep.mubr.f32.mxu0 %v1599_v12 }
 0x2f4   :  { %1861 = vmatmul.mubr.f32.gmra.mrb[60].mxu1 %v1374_v56  ;;  %2096 = vmatmul.mubr.f32.gmra.mrb[188].mxu0 %v1374_v56 }
 0x2f5   :  { %v1379_v31 = vpop.f32.mrb[126].mxu1 }
 0x2f6   :  { %v1604_v38 = vpop.f32.mrb[126].mxu0  ;;  %v1381_v45 = vpop.f32.mrb[127].mxu1 }
 0x2f7   :  { %1866 = vmatprep.mubr.f32.mxu1 %v1604_v38  ;;  %v1606_v48 = vpop.f32.mrb[127].mxu0  ;;  %2100 = vmatprep.mubr.f32.mxu0 %v1604_v38 }
 0x2f8   :  { %1867 = vmatmul.mubr.f32.gmra.mrb[62].mxu1 %v1379_v31  ;;  %2101 = vmatmul.mubr.f32.gmra.mrb[190].mxu0 %v1379_v31 }
 0x2f9   :  { %v1384_v33 = vpop.f32.mrb[128].mxu1 }
 0x2fa   :  { %v1609_v61 = vpop.f32.mrb[128].mxu0  ;;  %v1386_v9 = vpop.f32.mrb[129].mxu1 }
 0x2fb   :  { %1872 = vmatprep.mubr.f32.mxu1 %v1609_v61  ;;  %v1611_v32 = vpop.f32.mrb[129].mxu0  ;;  %2105 = vmatprep.mubr.f32.mxu0 %v1609_v61 }
 0x2fc   :  { %1873 = vmatmul.mubr.f32.gmra.mrb[64].mxu1 %v1384_v33  ;;  %2106 = vmatmul.mubr.f32.gmra.mrb[192].mxu0 %v1384_v33 }
 0x2fd   :  { %v1389_v37 = vpop.f32.mrb[130].mxu1 }
 0x2fe   :  { %v1614_v49 = vpop.f32.mrb[130].mxu0  ;;  %v1391_v50 = vpop.f32.mrb[131].mxu1 }
 0x2ff   :  { %1878 = vmatprep.mubr.f32.mxu1 %v1614_v49  ;;  %v1616_v57 = vpop.f32.mrb[131].mxu0  ;;  %2110 = vmatprep.mubr.f32.mxu0 %v1614_v49  ;;  %v4696_v49 = vld [vmem:[%s5098_s6] sm:$0x7]  ;;  %v448_v50 = vsub.s32 3, %v4405_v10 }
 0x300   :  { %1879 = vmatmul.mubr.f32.gmra.mrb[66].mxu1 %v1389_v37  ;;  %2111 = vmatmul.mubr.f32.gmra.mrb[194].mxu0 %v1389_v37  ;;  %v444_v37 = vsub.s32 2, %v4405_v10  ;;  %v3877_v57 = vld [vmem:[%s5096_s4] sm:$0x1f]  ;;  %v1040_v10 = vadd.f32 %v4592_v25, %v4621_v60  ;;  %s4065_s4 = smov [#allocation11]  }
 0x301   :  { %v1394_v2 = vpop.f32.mrb[132].mxu1  ;;  %s2823_s6 = sshll.u32 %s4065_s4, 4  ;;  %s2824_s6 = int_to_ptr.vmem [resolvable:$true] %s2823_s6 }
 0x302   :  { %v1619_v11 = vpop.f32.mrb[132].mxu0  ;;  %v1396_v35 = vpop.f32.mrb[133].mxu1  ;;  %s4020_s24 = scalar_lea.vmem %s2824_s6, 4096  ;;  %p4025_p13 = scmp.lt.s32.totalorder %s2824_s6, %s2824_s6 }
 0x303   :  { %1884 = vmatprep.mubr.f32.mxu1 %v1619_v11  ;;  %v1621_v18 = vpop.f32.mrb[133].mxu0  ;;  %2115 = vmatprep.mubr.f32.mxu0 %v1619_v11  ;;  %v1652_v11 = vrot.slane %v4696_v49, %v436_v20  ;;  %v449_v35 = vrot.slane %v3877_v57, %v448_v50  ;;  %p4021_p12 = scmp.ne.s32.totalorder %s2824_s6, %s4020_s24  ;;  %p4026_p0 = scmp.lt.s32.totalorder %s4020_s24, %s4020_s24 }
 0x304   :  { %1885 = vmatmul.mubr.f32.gmra.mrb[68].mxu1 %v1394_v2  ;;  %2116 = vmatmul.mubr.f32.gmra.mrb[196].mxu0 %v1394_v2  ;;  %v445_v2 = vrot.slane %v3877_v57, %v444_v37  ;;  %v1656_v18 = vrot.slane %v4696_v49, %v440_v0 }
 0x305   :  { %v1399_v19 = vpop.f32.mrb[134].mxu1  ;;  %p4027_p1 = por %p4026_p0, %p4025_p13 }
 0x306   :  { %v1624_v22 = vpop.f32.mrb[134].mxu0  ;;  %v1401_v24 = vpop.f32.mrb[135].mxu1 }
 0x307   :  { %1890 = vmatprep.mubr.f32.mxu1 %v1624_v22  ;;  %v1626_v26 = vpop.f32.mrb[135].mxu0  ;;  %2120 = vmatprep.mubr.f32.mxu0 %v1624_v22  ;;  %v4712_v24 = vadd.f32 %v1656_v18, %v449_v35  ;;  %p4028_p2 = pnand %p4027_p1, %p4021_p12 }
 0x308   :  { %1891 = vmatmul.mubr.f32.gmra.mrb[70].mxu1 %v1399_v19  ;;  %2121 = vmatmul.mubr.f32.gmra.mrb[198].mxu0 %v1399_v19  ;;  %v4710_v19 = vadd.f32 %v1652_v11, %v445_v2 }
 0x309   :  { %v1404_v29 = vpop.f32.mrb[136].mxu1 }
 0x30a   :  { %v1629_v36 = vpop.f32.mrb[136].mxu0  ;;  %v1406_v40 = vpop.f32.mrb[137].mxu1 }
 0x30b   :  { %1896 = vmatprep.mubr.f32.mxu1 %v1629_v36  ;;  %v1631_v47 = vpop.f32.mrb[137].mxu0  ;;  %2125 = vmatprep.mubr.f32.mxu0 %v1629_v36 }
 0x30c   :  { %1897 = vmatmul.mubr.f32.gmra.mrb[72].mxu1 %v1404_v29  ;;  %2126 = vmatmul.mubr.f32.gmra.mrb[200].mxu0 %v1404_v29 }
 0x30d   :  { %v1409_v56 = vpop.f32.mrb[138].mxu1 }
 0x30e   :  { %v1634_v12 = vpop.f32.mrb[138].mxu0  ;;  %v1411_v14 = vpop.f32.mrb[139].mxu1 }
 0x30f   :  { %1902 = vmatprep.mubr.f32.mxu1 %v1634_v12  ;;  %v1636_v17 = vpop.f32.mrb[139].mxu0  ;;  %2130 = vmatprep.mubr.f32.mxu0 %v1634_v12 }
 0x310   :  { %1903 = vmatmul.mubr.f32.gmra.mrb[74].mxu1 %v1409_v56  ;;  %2131 = vmatmul.mubr.f32.gmra.mrb[202].mxu0 %v1409_v56 }
 0x311   :  { %v1414_v31 = vpop.f32.mrb[140].mxu1 }
 0x312   :  { %v1639_v38 = vpop.f32.mrb[140].mxu0  ;;  %v1416_v45 = vpop.f32.mrb[141].mxu1 }
 0x313   :  { %1908 = vmatprep.mubr.f32.mxu1 %v1639_v38  ;;  %v1641_v48 = vpop.f32.mrb[141].mxu0  ;;  %2135 = vmatprep.mubr.f32.mxu0 %v1639_v38 }
 0x314   :  { %1909 = vmatmul.mubr.f32.gmra.mrb[76].mxu1 %v1414_v31  ;;  %2136 = vmatmul.mubr.f32.gmra.mrb[204].mxu0 %v1414_v31 }
 0x315   :  { %v1419_v33 = vpop.f32.mrb[142].mxu1 }
 0x316   :  { %v1644_v61 = vpop.f32.mrb[142].mxu0  ;;  %v1421_v9 = vpop.f32.mrb[143].mxu1 }
 0x317   :  { %1914 = vmatprep.mubr.f32.mxu1 %v1644_v61  ;;  %v1646_v32 = vpop.f32.mrb[143].mxu0  ;;  %2140 = vmatprep.mubr.f32.mxu0 %v1644_v61 }
 0x318   :  { %1915 = vmatmul.mubr.f32.gmra.mrb[78].mxu1 %v1419_v33  ;;  %2141 = vmatmul.mubr.f32.gmra.mrb[206].mxu0 %v1419_v33 }
 0x36f   :  { %v1730_v22 = vpop.f32.mrb[16].mxu1  ;;  %v4714_v26 = vpop.f32.mrb[144].mxu0 }
 0x370   :  { %v3350_v29 = vadd.f32 %v4710_v19, %v1730_v22  ;;  %v1732_v36 = vpop.f32.mrb[17].mxu1  ;;  %v1989_v40 = vpop.f32.mrb[145].mxu0 }
 0x371   :  { %v3352_v56 = vadd.f32 %v4712_v24, %v1732_v36 }
 0x372   :  { %v2837_v47 = vmul.f32 -1.442695, %v3350_v29 }
 0x373   :  { %v1736_v20 = vpop.f32.mrb[18].mxu1  ;;  %v4718_v12 = vpop.f32.mrb[146].mxu0  ;;  %v2869_v45 = vmul.f32 -1.442695, %v3352_v56 }
 0x374   :  { %3557 = vpow2.f32 %v2837_v47  ;;  %v3354_v0 = vadd.f32 %v4710_v19, %v1736_v20  ;;  %v1738_v14 = vpop.f32.mrb[19].mxu1  ;;  %v1994_v17 = vpop.f32.mrb[147].mxu0 }
 0x375   :  { %v3356_v31 = vadd.f32 %v4712_v24, %v1738_v14 }
 0x376   :  { %v2838_v38 = vmul.f32 -1.442695, %v3354_v0 }
 0x377   :  { %v1742_v48 = vpop.f32.mrb[20].mxu1  ;;  %v4722_v33 = vpop.f32.mrb[148].mxu0  ;;  %v2870_v50 = vmul.f32 -1.442695, %v3356_v31 }
 0x378   :  { %3559 = vpow2.f32 %v2838_v38  ;;  %v3358_v61 = vadd.f32 %v4710_v19, %v1742_v48  ;;  %v1744_v9 = vpop.f32.mrb[21].mxu1  ;;  %v1999_v32 = vpop.f32.mrb[149].mxu0 }
 0x379   :  { %v3360_v57 = vadd.f32 %v4712_v24, %v1744_v9  ;;  %3561 = vpow2.f32 %v2869_v45 }
 0x37a   :  { %v2839_v2 = vmul.f32 -1.442695, %v3358_v61 }
 0x37b   :  { %v2871_v11 = vmul.f32 -1.442695, %v3360_v57  ;;  %v1748_v35 = vpop.f32.mrb[22].mxu1  ;;  %v4726_v18 = vpop.f32.mrb[150].mxu0 }
 0x37c   :  { %3563 = vpow2.f32 %v2839_v2  ;;  %v3362_v22 = vadd.f32 %v4710_v19, %v1748_v35  ;;  %v1750_v29 = vpop.f32.mrb[23].mxu1  ;;  %v2004_v36 = vpop.f32.mrb[151].mxu0 }
 0x37d   :  { %3565 = vpow2.f32 %v2870_v50  ;;  %v3364_v56 = vadd.f32 %v4712_v24, %v1750_v29 }
 0x37e   :  { %v3558_v40 = vpop.eup %3557  ;;  %3567 = vpow2.f32 %v2871_v11  ;;  %v2840_v47 = vmul.f32 -1.442695, %v3362_v22 }
 0x37f   :  { %v2274_v20 = vadd.f32 1.0, %v3558_v40  ;;  %v1754_v0 = vpop.f32.mrb[24].mxu1  ;;  %v4730_v14 = vpop.f32.mrb[152].mxu0  ;;  %v2872_v61 = vmul.f32 -1.442695, %v3364_v56 }
 0x380   :  { %3569 = vpow2.f32 %v2840_v47  ;;  %v3366_v17 = vadd.f32 %v4710_v19, %v1754_v0  ;;  %v1756_v31 = vpop.f32.mrb[25].mxu1  ;;  %v2009_v38 = vpop.f32.mrb[153].mxu0  ;;  %v4741_v47 = vrot.slane %v4696_v49, %v444_v37 }
 0x381   :  { %3571 = vrcp.f32 %v2274_v20  ;;  %v3368_v45 = vadd.f32 %v4712_v24, %v1756_v31 }
 0x382   :  { %v3560_v48 = vpop.eup %3559  ;;  %v2841_v9 = vmul.f32 -1.442695, %v3366_v17  ;;  %v1988_v49 = vadd.f32 %v4714_v26, %v4741_v47  ;;  %v1045_v26 = vadd.f32 %v4587_v6, %v4621_v60 }
 0x383   :  { %v2275_v32 = vadd.f32 1.0, %v3560_v48  ;;  %v2873_v50 = vmul.f32 -1.442695, %v3368_v45  ;;  %v1760_v57 = vpop.f32.mrb[26].mxu1  ;;  %v4734_v2 = vpop.f32.mrb[154].mxu0 }
 0x384   :  { %3573 = vpow2.f32 %v2841_v9  ;;  %v3370_v11 = vadd.f32 %v4710_v19, %v1760_v57  ;;  %v1762_v35 = vpop.f32.mrb[27].mxu1  ;;  %v2014_v22 = vpop.f32.mrb[155].mxu0 }
 0x385   :  { %v3562_v29 = vpop.eup %3561  ;;  %3575 = vrcp.f32 %v2275_v32  ;;  %v3372_v36 = vadd.f32 %v4712_v24, %v1762_v35 }
 0x386   :  { %v3564_v40 = vpop.eup %3563  ;;  %3577 = vpow2.f32 %v2872_v61  ;;  %v2842_v56 = vmul.f32 -1.442695, %v3370_v11  ;;  %v2498_v37 = vadd.f32 1.0, %v3562_v29 }
 0x387   :  { %v3566_v20 = vpop.eup %3565  ;;  %v2276_v0 = vadd.f32 1.0, %v3564_v40  ;;  %3579 = vpow2.f32 %v2873_v50  ;;  %v2874_v17 = vmul.f32 -1.442695, %v3372_v36  ;;  %v1766_v31 = vpop.f32.mrb[28].mxu1 }
 0x388   :  { %v4743_v38 = vpop.f32.mrb[156].mxu0  ;;  %v3568_v45 = vpop.eup %3567  ;;  %3581 = vpow2.f32 %v2842_v56  ;;  %v3374_v48 = vadd.f32 %v4710_v19, %v1766_v31  ;;  %v2499_v11 = vadd.f32 1.0, %v3566_v20 }
 0x389   :  { %v1768_v9 = vpop.f32.mrb[29].mxu1  ;;  %v2019_v32 = vpop.f32.mrb[157].mxu0  ;;  %3583 = vrcp.f32 %v2276_v0  ;;  %v2500_v35 = vadd.f32 1.0, %v3568_v45 }
 0x38a   :  { %v3570_v61 = vpop.eup %3569  ;;  %v2843_v50 = vmul.f32 -1.442695, %v3374_v48  ;;  %3585 = vpow2.f32 %v2874_v17  ;;  %v3376_v0 = vadd.f32 %v4712_v24, %v1768_v9  ;;  %v1993_v9 = vadd.f32 %v4718_v12, %v4741_v47 }
 0x38b   :  { %v3572_v57 = vpop.eup %3571  ;;  %v2277_v22 = vadd.f32 1.0, %v3570_v61  ;;  %v1772_v36 = vpop.f32.mrb[30].mxu1 }
 0x38c   :  { %v4750_v40 = vpop.f32.mrb[158].mxu0  ;;  %v2594_v56 = vmul.f32 %v3572_v57, %v1040_v10  ;;  %3587 = vpow2.f32 %v2843_v50  ;;  %v3378_v31 = vadd.f32 %v4710_v19, %v1772_v36  ;;  %v1774_v25 = vpop.f32.mrb[31].mxu1 }
 0x38d   :  { %v2024_v29 = vpop.f32.mrb[159].mxu0  ;;  %3589 = vrcp.f32 %v2277_v22  ;;  %v2875_v22 = vmul.f32 -1.442695, %v3376_v0 }
 0x38e   :  { %v3574_v32 = vpop.eup %3573  ;;  %3591 = vrcp.f32 %v2498_v37  ;;  %v2626_v20 = vadd.f32 %v2594_v56, %v1988_v49  ;;  %v2844_v48 = vmul.f32 -1.442695, %v3378_v31  ;;  %v1050_v37 = vadd.f32 %v4597_v7, %v4621_v60 }
 0x38f   :  { %v3576_v45 = vpop.eup %3575  ;;  %3593 = vrcp.f32 %v2499_v11  ;;  %v2278_v17 = vadd.f32 1.0, %v3574_v32  ;;  %v1778_v61 = vpop.f32.mrb[32].mxu1 }
 0x390   :  { %v4756_v10 = vpop.f32.mrb[160].mxu0  ;;  %v3578_v50 = vpop.eup %3577  ;;  %3595 = vrcp.f32 %v2500_v35  ;;  %v2595_v57 = vmul.f32 %v3576_v45, %v1045_v26  ;;  %v3380_v35 = vadd.f32 %v4712_v24, %v1774_v25  ;;  %v1998_v26 = vadd.f32 %v4722_v33, %v4741_v47 }
 0x391   :  { %v1780_v36 = vpop.f32.mrb[33].mxu1  ;;  %v2029_v29 = vpop.f32.mrb[161].mxu0  ;;  %3597 = vrcp.f32 %v2278_v17  ;;  %v2501_v56 = vadd.f32 1.0, %v3578_v50 }
 0x392   :  { %v3580_v44 = vpop.eup %3579  ;;  %3599 = vtanh.f32 %v2626_v20  ;;  %v2627_v49 = vadd.f32 %v2595_v57, %v1993_v9  ;;  %v3382_v20 = vadd.f32 %v4710_v19, %v1778_v61  ;;  %v2876_v57 = vmul.f32 -1.442695, %v3380_v35 }
 0x393   :  { %v3582_v6 = vpop.eup %3581  ;;  %3601 = vpow2.f32 %v2844_v48  ;;  %v1784_v32 = vpop.f32.mrb[34].mxu1  ;;  %v2502_v0 = vadd.f32 1.0, %v3580_v44  ;;  %v1055_v48 = vadd.f32 %v4595_v55, %v4621_v60  ;;  %v2003_v61 = vadd.f32 %v4726_v18, %v4741_v47 }
 0x394   :  { %v3584_v11 = vpop.eup %3583  ;;  %v2279_v31 = vadd.f32 1.0, %v3582_v6  ;;  %v4763_v12 = vpop.f32.mrb[162].mxu0  ;;  %3603 = vpow2.f32 %v2875_v22  ;;  %v3386_v22 = vadd.f32 %v4710_v19, %v1784_v32  ;;  %v1060_v35 = vadd.f32 %v4601_v41, %v4621_v60 }
 0x395   :  { %v2596_v45 = vmul.f32 %v3584_v11, %v1050_v37  ;;  %v1786_v17 = vpop.f32.mrb[35].mxu1  ;;  %v2034_v29 = vpop.f32.mrb[163].mxu0 }
 0x396   :  { %v3586_v7 = vpop.eup %3585  ;;  %3605 = vrcp.f32 %v2279_v31 }
 0x397   :  { %v3588_v50 = vpop.eup %3587  ;;  %3607 = vtanh.f32 %v2627_v49  ;;  %v2628_v25 = vadd.f32 %v2596_v45, %v1998_v26  ;;  %v1790_v33 = vpop.f32.mrb[36].mxu1  ;;  %v2845_v49 = vmul.f32 -1.442695, %v3382_v20  ;;  %v2503_v32 = vadd.f32 1.0, %v3586_v7 }
 0x398   :  { %v3590_v9 = vpop.eup %3589  ;;  %3609 = vrcp.f32 %v2501_v56  ;;  %v2280_v44 = vadd.f32 1.0, %v3588_v50  ;;  %v4771_v6 = vpop.f32.mrb[164].mxu0  ;;  %v3384_v56 = vadd.f32 %v4712_v24, %v1780_v36  ;;  %v2846_v50 = vmul.f32 -1.442695, %v3386_v22  ;;  %v3878_v22 = vld [vmem:[#allocation7] sm:$0xff] }
 0x399   :  { %v3592_v37 = vpop.eup %3591  ;;  %3611 = vrcp.f32 %v2502_v0  ;;  %v2597_v11 = vmul.f32 %v3590_v9, %v1055_v48  ;;  %v1792_v31 = vpop.f32.mrb[37].mxu1  ;;  %v3390_v18 = vadd.f32 %v4710_v19, %v1790_v33  ;;  %v2008_v36 = vadd.f32 %v4730_v14, %v4741_v47 }
 0x39a   :  { %v2039_v29 = vpop.f32.mrb[165].mxu0  ;;  %v3594_v55 = vpop.eup %3593  ;;  %3613 = vrcp.f32 %v2280_v44  ;;  %v3392_v14 = vadd.f32 %v4712_v24, %v1792_v31 }
 0x39b   :  { %v4776_v26 = vpop.eup %3595  ;;  %3615 = vtanh.f32 %v2628_v25  ;;  %v2629_v45 = vadd.f32 %v2597_v11, %v2003_v61  ;;  %v1796_v48 = vpop.f32.mrb[38].mxu1  ;;  %v3388_v29 = vadd.f32 %v4712_v24, %v1786_v17  ;;  %v2877_v61 = vmul.f32 -1.442695, %v3384_v56 }
 0x39c   :  { %v3598_v0 = vpop.eup %3597  ;;  %3617 = vpow2.f32 %v2876_v57  ;;  %v4781_v9 = vpop.f32.mrb[166].mxu0  ;;  %v1065_v57 = vadd.f32 %v4599_v34, %v4621_v60  ;;  %v2847_v17 = vmul.f32 -1.442695, %v3390_v18 }
 0x39d   :  { %v3600_v44 = vpop.eup %3599  ;;  %3619 = vtanh.f32 %v2629_v45  ;;  %v2598_v20 = vmul.f32 %v3598_v0, %v1060_v35  ;;  %v4786_v41 = vpop.f32.mrb[39].mxu1 }
 0x39e   :  { %v2044_v7 = vpop.f32.mrb[167].mxu0  ;;  %v3602_v25 = vpop.eup %3601  ;;  %v2690_v33 = vsub.f32 %v3878_v22, %v3600_v44  ;;  %3621 = vpow2.f32 %v2845_v49  ;;  %v2878_v22 = vmul.f32 -1.442695, %v3388_v29  ;;  %v2013_v49 = vadd.f32 %v4734_v2, %v4741_v47 }
 0x39f   :  { %v3604_v11 = vpop.eup %3603  ;;  %3623 = vrcp.f32 %v2503_v32  ;;  %v2281_v45 = vadd.f32 1.0, %v3602_v25  ;;  %v2630_v5 = vadd.f32 %v2598_v20, %v2008_v36  ;;  %v3394_v7 = vadd.f32 %v4710_v19, %v1796_v48  ;;  %v1802_v51 = vpop.f32.mrb[40].mxu1 }
 0x3a0   :  { %v3606_v35 = vpop.eup %3605  ;;  %v2722_v0 = vmul.f32 %v3592_v37, %v2690_v33  ;;  %3625 = vpow2.f32 %v2846_v50  ;;  %v4792_v30 = vpop.f32.mrb[168].mxu0  ;;  %v3879_v37 = vld [vmem:[#allocation7 + $0x8] sm:$0xff]  ;;  %v1070_v48 = vadd.f32 %v4606_v59, %v4621_v60  ;;  %v2879_v29 = vmul.f32 -1.442695, %v3392_v14 }
 0x3a1   :  { %v3608_v34 = vpop.eup %3607  ;;  %3627 = vrcp.f32 %v2281_v45  ;;  %v2599_v56 = vmul.f32 %v3606_v35, %v1065_v57  ;;  %v4796_v32 = vpop.f32.mrb[41].mxu1  ;;  %v2848_v57 = vmul.f32 -1.442695, %v3394_v7 }
 0x3a2   :  { %v2049_v36 = vpop.f32.mrb[169].mxu0  ;;  %v3610_v31 = vpop.eup %3609  ;;  %v2754_v20 = vadd.f32 %v3600_v44, %v2722_v0  ;;  %v2691_v50 = vsub.f32 %v3879_v37, %v3608_v34  ;;  %3629 = vtanh.f32 %v2630_v5  ;;  %v2504_v0 = vadd.f32 1.0, %v3604_v11 }
 0x3a3   :  { %v4798_v18 = vpop.eup %3611  ;;  %3631 = vpow2.f32 %v2877_v61  ;;  %v2631_v25 = vadd.f32 %v2599_v56, %v2013_v49  ;;  %v1808_v45 = vpop.f32.mrb[42].mxu1  ;;  %v2018_v5 = vadd.f32 %v4743_v38, %v4741_v47  ;;  %v3880_v49 = vld [vmem:[#allocation7 + $0x10] sm:$0xff] }
 0x3a4   :  { %v3614_v33 = vpop.eup %3613  ;;  %2786 = vst [vmem:[#allocation11] sm:$0xff] %v2754_v20  ;;  %v2723_v2 = vmul.f32 %v3594_v55, %v2691_v50  ;;  %3633 = vpow2.f32 %v2847_v17  ;;  %v4802_v35 = vpop.f32.mrb[170].mxu0  ;;  %v3398_v55 = vadd.f32 %v4710_v19, %v1802_v51  ;;  %v3396_v50 = vadd.f32 %v4712_v24, %v4786_v41 }
 0x3a5   :  { %v3616_v44 = vpop.eup %3615  ;;  %3635 = vpow2.f32 %v2878_v22  ;;  %v2600_v36 = vmul.f32 %v3614_v33, %v1070_v48  ;;  %v4806_v37 = vpop.f32.mrb[43].mxu1  ;;  %v3881_v22 = vld [vmem:[#allocation7 + $0x18] sm:$0xff]  ;;  %v1075_v51 = vadd.f32 %v4603_v52, %v4621_v60 }
 0x3a6   :  { %v2054_v59 = vpop.f32.mrb[171].mxu0  ;;  %v3618_v61 = vpop.eup %3617  ;;  %v2755_v14 = vadd.f32 %v3608_v34, %v2723_v2  ;;  %v2692_v56 = vsub.f32 %v3880_v49, %v3616_v44  ;;  %3637 = vtanh.f32 %v2631_v25  ;;  %v3402_v49 = vadd.f32 %v4710_v19, %v1808_v45 }
 0x3a7   :  { %v3620_v17 = vpop.eup %3619  ;;  %3639 = vpow2.f32 %v2879_v29  ;;  %v2632_v7 = vadd.f32 %v2600_v36, %v2018_v5  ;;  %v1814_v48 = vpop.f32.mrb[44].mxu1  ;;  %v2880_v52 = vmul.f32 -1.442695, %v3396_v50 }
 0x3a8   :  { %v3622_v20 = vpop.eup %3621  ;;  %2787 = vst [vmem:[#allocation11 + $0x8] sm:$0xff] %v2755_v14  ;;  %v2724_v11 = vmul.f32 %v4776_v26, %v2692_v56  ;;  %v2693_v38 = vsub.f32 %v3881_v22, %v3620_v17  ;;  %3641 = vpow2.f32 %v2848_v57  ;;  %v4812_v34 = vpop.f32.mrb[172].mxu0  ;;  %v2849_v57 = vmul.f32 -1.442695, %v3398_v55 }
 0x3a9   :  { %v3624_v33 = vpop.eup %3623  ;;  %v2282_v25 = vadd.f32 1.0, %v3622_v20  ;;  %3643 = vtanh.f32 %v2632_v7  ;;  %v4816_v29 = vpop.f32.mrb[45].mxu1  ;;  %v2505_v14 = vadd.f32 1.0, %v3618_v61  ;;  %v2023_v7 = vadd.f32 %v4750_v40, %v4741_v47 }
 0x3aa   :  { %v2059_v2 = vpop.f32.mrb[173].mxu0  ;;  %v3626_v5 = vpop.eup %3625  ;;  %3645 = vrcp.f32 %v2504_v0  ;;  %v2756_v26 = vadd.f32 %v3616_v44, %v2724_v11  ;;  %v2725_v36 = vmul.f32 %v3610_v31, %v2693_v38  ;;  %v3882_v31 = vld [vmem:[#allocation7 + $0x20] sm:$0xff] }
 0x3ab   :  { %v3628_v59 = vpop.eup %3627  ;;  %3647 = vrcp.f32 %v2282_v25  ;;  %v2283_v41 = vadd.f32 1.0, %v3626_v5  ;;  %v1820_v2 = vpop.f32.mrb[46].mxu1 }
 0x3ac   :  { %v3630_v56 = vpop.eup %3629  ;;  %2788 = vst [vmem:[#allocation11 + $0x10] sm:$0xff] %v2756_v26  ;;  %v2757_v22 = vadd.f32 %v3620_v17, %v2725_v36  ;;  %v2601_v20 = vmul.f32 %v3628_v59, %v1075_v51  ;;  %v4821_v46 = vpop.f32.mrb[174].mxu0  ;;  %v3400_v17 = vadd.f32 %v4712_v24, %v4796_v32  ;;  %v2850_v51 = vmul.f32 -1.442695, %v3402_v49 }
 0x3ad   :  { %v3632_v44 = vpop.eup %3631  ;;  %v2694_v0 = vsub.f32 %v3882_v31, %v3630_v56  ;;  %3649 = vrcp.f32 %v2283_v41  ;;  %v4823_v61 = vpop.f32.mrb[47].mxu1  ;;  %v3406_v26 = vadd.f32 %v4710_v19, %v1814_v48  ;;  %v1085_v49 = vadd.f32 %v4608_v4, %v4621_v60 }
 0x3ae   :  { %v2064_v55 = vpop.f32.mrb[175].mxu0  ;;  %v3634_v11 = vpop.eup %3633  ;;  %2789 = vst [vmem:[#allocation11 + $0x18] sm:$0xff] %v2757_v22  ;;  %v2633_v45 = vadd.f32 %v2601_v20, %v2023_v7  ;;  %3651 = vpow2.f32 %v2849_v57  ;;  %v2506_v5 = vadd.f32 1.0, %v3632_v44  ;;  %v3883_v22 = vld [vmem:[#allocation7 + $0x28] sm:$0xff]  ;;  %v3404_v48 = vadd.f32 %v4712_v24, %v4806_v37 }
 0x3af   :  { %v3636_v38 = vpop.eup %3635  ;;  %3653 = vrcp.f32 %v2505_v14  ;;  %v2726_v40 = vmul.f32 %v4798_v18, %v2694_v0  ;;  %v2284_v50 = vadd.f32 1.0, %v3634_v11  ;;  %v4829_v36 = vpop.f32.mrb[48].mxu1  ;;  %v1080_v55 = vadd.f32 %v4611_v16, %v4621_v60  ;;  %v3884_v11 = vld [vmem:[#allocation7 + $0x30] sm:$0xff] }
 0x3b0   :  { %v3638_v25 = vpop.eup %3637  ;;  %3655 = vpow2.f32 %v2880_v52  ;;  %v4831_v59 = vpop.f32.mrb[176].mxu0  ;;  %v2881_v52 = vmul.f32 -1.442695, %v3400_v17  ;;  %v2507_v44 = vadd.f32 1.0, %v3636_v38 }
 0x3b1   :  { %v3640_v41 = vpop.eup %3639  ;;  %v2758_v57 = vadd.f32 %v3630_v56, %v2726_v40  ;;  %v2695_v7 = vsub.f32 %v3883_v22, %v3638_v25  ;;  %3657 = vrcp.f32 %v2284_v50  ;;  %v4833_v32 = vpop.f32.mrb[49].mxu1  ;;  %v2851_v50 = vmul.f32 -1.442695, %v3406_v26 }
 0x3b2   :  { %v2069_v14 = vpop.f32.mrb[177].mxu0  ;;  %v3642_v18 = vpop.eup %3641  ;;  %3659 = vtanh.f32 %v2633_v45  ;;  %v2508_v22 = vadd.f32 1.0, %v3640_v41  ;;  %v3408_v41 = vadd.f32 %v4712_v24, %v4816_v29 }
 0x3b3   :  { %v3644_v20 = vpop.eup %3643  ;;  %2790 = vst [vmem:[#allocation11 + $0x20] sm:$0xff] %v2758_v57  ;;  %v2727_v31 = vmul.f32 %v3624_v33, %v2695_v7  ;;  %v2285_v56 = vadd.f32 1.0, %v3642_v18  ;;  %3661 = vpow2.f32 %v2850_v51  ;;  %v4841_v4 = vpop.f32.mrb[50].mxu1  ;;  %v2028_v33 = vadd.f32 %v4756_v10, %v4741_v47 }
 0x3b4   :  { %v3646_v0 = vpop.eup %3645  ;;  %3663 = vrcp.f32 %v2506_v5  ;;  %v2696_v40 = vsub.f32 %v3884_v11, %v3644_v20  ;;  %v4843_v45 = vpop.f32.mrb[178].mxu0  ;;  %v3410_v5 = vadd.f32 %v4710_v19, %v1820_v2  ;;  %v2882_v7 = vmul.f32 -1.442695, %v3404_v48 }
 0x3b5   :  { %v3648_v17 = vpop.eup %3647  ;;  %v2759_v37 = vadd.f32 %v3638_v25, %v2727_v31  ;;  %3665 = vrcp.f32 %v2285_v56  ;;  %v4847_v38 = vpop.f32.mrb[51].mxu1  ;;  %v2033_v25 = vadd.f32 %v4763_v12, %v4741_v47 }
 0x3b6   :  { %v2074_v51 = vpop.f32.mrb[179].mxu0  ;;  %v2728_v57 = vmul.f32 %v3646_v0, %v2696_v40  ;;  %3667 = vpow2.f32 %v2881_v52  ;;  %v2602_v16 = vmul.f32 %v3648_v17, %v1080_v55  ;;  %v2883_v40 = vmul.f32 -1.442695, %v3408_v41 }
 0x3b7   :  { %v3650_v26 = vpop.eup %3649  ;;  %3669 = vrcp.f32 %v2507_v44  ;;  %2791 = vst [vmem:[#allocation11 + $0x28] sm:$0xff] %v2759_v37  ;;  %v4854_v56 = vpop.f32.mrb[52].mxu1  ;;  %v1090_v44 = vadd.f32 %v4616_v39, %v4621_v60  ;;  %v2038_v17 = vadd.f32 %v4771_v6, %v4741_v47 }
 0x3b8   :  { %v3652_v14 = vpop.eup %3651  ;;  %v2760_v10 = vadd.f32 %v3644_v20, %v2728_v57  ;;  %v2634_v18 = vadd.f32 %v2602_v16, %v2028_v33  ;;  %v2603_v31 = vmul.f32 %v3650_v26, %v1085_v49  ;;  %3671 = vpow2.f32 %v2851_v50  ;;  %v4856_v52 = vpop.f32.mrb[180].mxu0  ;;  %v3885_v57 = vld [vmem:[#allocation7 + $0x38] sm:$0xff] }
 0x3b9   :  { %v3654_v2 = vpop.eup %3653  ;;  %3673 = vrcp.f32 %v2508_v22  ;;  %v2286_v48 = vadd.f32 1.0, %v3652_v14  ;;  %v4860_v0 = vpop.f32.mrb[53].mxu1  ;;  %v2852_v20 = vmul.f32 -1.442695, %v3410_v5  ;;  %v3414_v49 = vadd.f32 %v4710_v19, %v4829_v36 }
 0x3ba   :  { %v2079_v12 = vpop.f32.mrb[181].mxu0  ;;  %v3656_v55 = vpop.eup %3655  ;;  %2792 = vst [vmem:[#allocation11 + $0x30] sm:$0xff] %v2760_v10  ;;  %3675 = vtanh.f32 %v2634_v18  ;;  %v2635_v29 = vadd.f32 %v2603_v31, %v2033_v25  ;;  %v3412_v50 = vadd.f32 %v4712_v24, %v4823_v61  ;;  %v1095_v36 = vadd.f32 %v4613_v27, %v4621_v60 }
 0x3bb   :  { %v3658_v11 = vpop.eup %3657  ;;  %3677 = vrcp.f32 %v2286_v48  ;;  %v4868_v22 = vpop.f32.mrb[54].mxu1  ;;  %v2853_v6 = vmul.f32 -1.442695, %v3414_v49  ;;  %v2043_v27 = vadd.f32 %v4781_v9, %v4741_v47 }
 0x3bc   :  { %v3660_v39 = vpop.eup %3659  ;;  %3679 = vpow2.f32 %v2882_v7  ;;  %v2604_v37 = vmul.f32 %v3658_v11, %v1090_v44  ;;  %v4870_v33 = vpop.f32.mrb[182].mxu0  ;;  %v2884_v10 = vmul.f32 -1.442695, %v3412_v50  ;;  %v3418_v44 = vadd.f32 %v4710_v19, %v4841_v4 }
 0x3bd   :  { %v3662_v51 = vpop.eup %3661  ;;  %v2697_v16 = vsub.f32 %v3885_v57, %v3660_v39  ;;  %3681 = vtanh.f32 %v2635_v29  ;;  %v4874_v5 = vpop.f32.mrb[55].mxu1  ;;  %v2509_v50 = vadd.f32 1.0, %v3656_v55  ;;  %v3422_v55 = vadd.f32 %v4710_v19, %v4854_v56 }
 0x3be   :  { %v2084_v61 = vpop.f32.mrb[183].mxu0  ;;  %v3664_v26 = vpop.eup %3663  ;;  %v2287_v7 = vadd.f32 1.0, %v3662_v51  ;;  %v2636_v25 = vadd.f32 %v2604_v37, %v2038_v17  ;;  %3683 = vpow2.f32 %v2852_v20  ;;  %v1105_v56 = vadd.f32 %v4618_v42, %v4621_v60 }
 0x3bf   :  { %v3666_v41 = vpop.eup %3665  ;;  %v2729_v14 = vmul.f32 %v3654_v2, %v2697_v16  ;;  %3685 = vpow2.f32 %v2883_v40  ;;  %v4880_v48 = vpop.f32.mrb[56].mxu1  ;;  %v3416_v2 = vadd.f32 %v4712_v24, %v4833_v32  ;;  %v1100_v32 = vadd.f32 %v4623_v1, %v4621_v60 }
 0x3c0   :  { %v3668_v18 = vpop.eup %3667  ;;  %3687 = vrcp.f32 %v2287_v7  ;;  %v2605_v31 = vmul.f32 %v3666_v41, %v1095_v36  ;;  %v4882_v12 = vpop.f32.mrb[184].mxu0  ;;  %v2854_v36 = vmul.f32 -1.442695, %v3418_v44  ;;  %v3886_v7 = vld [vmem:[#allocation7 + $0x40] sm:$0xff]  ;;  %v2048_v1 = vadd.f32 %v4792_v30, %v4741_v47 }
 0x3c1   :  { %v3670_v29 = vpop.eup %3669  ;;  %v2761_v20 = vadd.f32 %v3660_v39, %v2729_v14  ;;  %3689 = vtanh.f32 %v2636_v25  ;;  %v4886_v49 = vpop.f32.mrb[57].mxu1  ;;  %v2510_v4 = vadd.f32 1.0, %v3668_v18  ;;  %v3420_v39 = vadd.f32 %v4712_v24, %v4847_v38 }
 0x3c2   :  { %v2089_v11 = vpop.f32.mrb[185].mxu0  ;;  %v3672_v40 = vpop.eup %3671  ;;  %v2637_v9 = vadd.f32 %v2605_v31, %v2043_v27  ;;  %3691 = vpow2.f32 %v2853_v6  ;;  %v2885_v6 = vmul.f32 -1.442695, %v3416_v2  ;;  %v3426_v42 = vadd.f32 %v4710_v19, %v4868_v22 }
 0x3c3   :  { %v4888_v17 = vpop.eup %3673  ;;  %2793 = vst [vmem:[#allocation11 + $0x38] sm:$0xff] %v2761_v20  ;;  %v2288_v37 = vadd.f32 1.0, %v3672_v40  ;;  %3693 = vpow2.f32 %v2884_v10  ;;  %v4896_v57 = vpop.f32.mrb[58].mxu1  ;;  %v2886_v31 = vmul.f32 -1.442695, %v3420_v39  ;;  %v3887_v20 = vld [vmem:[#allocation7 + $0x48] sm:$0xff]  ;;  %v3430_v22 = vadd.f32 %v4710_v19, %v4880_v48 }
 0x3c4   :  { %v3676_v51 = vpop.eup %3675  ;;  %3695 = vtanh.f32 %v2637_v9  ;;  %v4898_v16 = vpop.f32.mrb[186].mxu0  ;;  %v2855_v40 = vmul.f32 -1.442695, %v3422_v55 }
 0x3c5   :  { %v3678_v61 = vpop.eup %3677  ;;  %v2698_v25 = vsub.f32 %v3886_v7, %v3676_v51  ;;  %3697 = vrcp.f32 %v2288_v37  ;;  %v4900_v41 = vpop.f32.mrb[59].mxu1 }
 0x3c6   :  { %v2094_v38 = vpop.f32.mrb[187].mxu0  ;;  %v3680_v14 = vpop.eup %3679  ;;  %3699 = vrcp.f32 %v2509_v50  ;;  %v2606_v10 = vmul.f32 %v3678_v61, %v1100_v32 }
 0x3c7   :  { %v3682_v18 = vpop.eup %3681  ;;  %3701 = vrcp.f32 %v2510_v4  ;;  %v2730_v27 = vmul.f32 %v3664_v26, %v2698_v25  ;;  %v4906_v9 = vpop.f32.mrb[60].mxu1  ;;  %v2511_v39 = vadd.f32 1.0, %v3680_v14  ;;  %v3888_v38 = vld [vmem:[#allocation7 + $0x50] sm:$0xff] }
 0x3c8   :  { %v3684_v44 = vpop.eup %3683  ;;  %v2699_v11 = vsub.f32 %v3887_v20, %v3682_v18  ;;  %v2638_v2 = vadd.f32 %v2606_v10, %v2048_v1  ;;  %3703 = vpow2.f32 %v2854_v36  ;;  %v4908_v50 = vpop.f32.mrb[188].mxu0  ;;  %v2053_v36 = vadd.f32 %v4802_v35, %v4741_v47 }
 0x3c9   :  { %v3686_v37 = vpop.eup %3685  ;;  %v2762_v30 = vadd.f32 %v3676_v51, %v2730_v27  ;;  %v2289_v32 = vadd.f32 1.0, %v3684_v44  ;;  %3705 = vpow2.f32 %v2885_v6  ;;  %v4912_v60 = vpop.f32.mrb[61].mxu1  ;;  %v3424_v51 = vadd.f32 %v4712_v24, %v4860_v0 }
 0x3ca   :  { %v2099_v26 = vpop.f32.mrb[189].mxu0  ;;  %v3688_v4 = vpop.eup %3687  ;;  %v2731_v61 = vmul.f32 %v3670_v29, %v2699_v11  ;;  %3707 = vtanh.f32 %v2638_v2  ;;  %v2512_v48 = vadd.f32 1.0, %v3686_v37  ;;  %v3889_v2 = vld [vmem:[#allocation7 + $0x58] sm:$0xff] }
 0x3cb   :  { %v3690_v55 = vpop.eup %3689  ;;  %2794 = vst [vmem:[#allocation11 + $0x40] sm:$0xff] %v2762_v30  ;;  %3709 = vrcp.f32 %v2289_v32  ;;  %v2607_v7 = vmul.f32 %v3688_v4, %v1105_v56  ;;  %v4920_v29 = vpop.f32.mrb[62].mxu1  ;;  %v2856_v56 = vmul.f32 -1.442695, %v3426_v42  ;;  %v2887_v32 = vmul.f32 -1.442695, %v3424_v51 }
 0x3cc   :  { %v3692_v25 = vpop.eup %3691  ;;  %v2763_v6 = vadd.f32 %v3682_v18, %v2731_v61  ;;  %v2700_v1 = vsub.f32 %v3888_v38, %v3690_v55  ;;  %3711 = vpow2.f32 %v2886_v31  ;;  %v4922_v14 = vpop.f32.mrb[190].mxu0  ;;  %v2058_v31 = vadd.f32 %v4812_v34, %v4741_v47 }
 0x3cd   :  { %v3694_v35 = vpop.eup %3693  ;;  %v2290_v10 = vadd.f32 1.0, %v3692_v25  ;;  %v2639_v27 = vadd.f32 %v2607_v7, %v2053_v36  ;;  %3713 = vpow2.f32 %v2855_v40  ;;  %v4924_v44 = vpop.f32.mrb[63].mxu1  ;;  %v2857_v26 = vmul.f32 -1.442695, %v3430_v22 }
 0x3ce   :  { %v2104_v0 = vpop.f32.mrb[191].mxu0  ;;  %v3696_v20 = vpop.eup %3695  ;;  %3715 = vrcp.f32 %v2511_v39  ;;  %2795 = vst [vmem:[#allocation11 + $0x48] sm:$0xff] %v2763_v6  ;;  %v2732_v18 = vmul.f32 %v4888_v17, %v2700_v1  ;;  %v3428_v39 = vadd.f32 %v4712_v24, %v4874_v5  ;;  %v3434_v36 = vadd.f32 %v4710_v19, %v4896_v57 }
 0x3cf   :  { %v3698_v11 = vpop.eup %3697  ;;  %v2701_v30 = vsub.f32 %v3889_v2, %v3696_v20  ;;  %3717 = vrcp.f32 %v2290_v10  ;;  %v4932_v37 = vpop.f32.mrb[64].mxu1 }
 0x3d0   :  { %v3700_v40 = vpop.eup %3699  ;;  %v2764_v42 = vadd.f32 %v3690_v55, %v2732_v18  ;;  %3719 = vtanh.f32 %v2639_v27  ;;  %v2608_v4 = vmul.f32 %v3698_v11, %v4630_v63  ;;  %v4934_v17 = vpop.f32.mrb[192].mxu0  ;;  %v2513_v63 = vadd.f32 1.0, %v3694_v35 }
 0x3d1   :  { %v3702_v61 = vpop.eup %3701  ;;  %v2733_v34 = vmul.f32 %v3700_v40, %v2701_v30  ;;  %3721 = vpow2.f32 %v2856_v56  ;;  %v4938_v7 = vpop.f32.mrb[65].mxu1  ;;  %v2888_v1 = vmul.f32 -1.442695, %v3428_v39  ;;  %v3890_v56 = vld [vmem:[#allocation7 + $0x60] sm:$0xff] }
 0x3d2   :  { %v2109_v51 = vpop.f32.mrb[193].mxu0  ;;  %v3704_v55 = vpop.eup %3703  ;;  %3723 = vrcp.f32 %v2512_v48  ;;  %2796 = vst [vmem:[#allocation11 + $0x50] sm:$0xff] %v2764_v42  ;;  %v2640_v22 = vadd.f32 %v2608_v4, %v2058_v31  ;;  %v2858_v48 = vmul.f32 -1.442695, %v3434_v36 }
 0x3d3   :  { %v3706_v25 = vpop.eup %3705  ;;  %v2765_v5 = vadd.f32 %v3696_v20, %v2733_v34  ;;  %v2291_v6 = vadd.f32 1.0, %v3704_v55  ;;  %3725 = vpow2.f32 %v2857_v26  ;;  %v4940_v10 = vpop.f32.mrb[66].mxu1  ;;  %v2063_v20 = vadd.f32 %v4821_v46, %v4741_v47 }
 0x3d4   :  { %v3708_v38 = vpop.eup %3707  ;;  %3727 = vpow2.f32 %v2887_v32  ;;  %v4942_v27 = vpop.f32.mrb[194].mxu0  ;;  %v2514_v30 = vadd.f32 1.0, %v3706_v25  ;;  %v3432_v26 = vadd.f32 %v4712_v24, %v4886_v49  ;;  %v2068_v49 = vadd.f32 %v4831_v59, %v4741_v47 }
 0x3d5   :  { %v3710_v57 = vpop.eup %3709  ;;  %2797 = vst [vmem:[#allocation11 + $0x58] sm:$0xff] %v2765_v5  ;;  %v2702_v0 = vsub.f32 %v3890_v56, %v3708_v38  ;;  %3729 = vrcp.f32 %v2291_v6  ;;  %v4944_v18 = vpop.f32.mrb[67].mxu1  ;;  %v3891_v5 = vld [vmem:[#allocation7 + $0x68] sm:$0xff] }
 0x3d6   :  { %v2114_v35 = vpop.f32.mrb[195].mxu0  ;;  %v3712_v31 = vpop.eup %3711  ;;  %3731 = vrcp.f32 %v2513_v63  ;;  %v2609_v11 = vmul.f32 %v3710_v57, %v4627_v3 }
 0x3d7   :  { %v3714_v2 = vpop.eup %3713  ;;  %v2734_v32 = vmul.f32 %v3702_v61, %v2702_v0  ;;  %3733 = vtanh.f32 %v2640_v22  ;;  %v4951_v39 = vpop.f32.mrb[68].mxu1  ;;  %v2515_v46 = vadd.f32 1.0, %v3712_v31  ;;  %v3438_v22 = vadd.f32 %v4710_v19, %v4906_v9 }
 0x3d8   :  { %v3716_v40 = vpop.eup %3715  ;;  %v2292_v42 = vadd.f32 1.0, %v3714_v2  ;;  %3735 = vpow2.f32 %v2888_v1  ;;  %v2641_v4 = vadd.f32 %v2609_v11, %v2063_v20  ;;  %v4953_v34 = vpop.f32.mrb[196].mxu0  ;;  %v3436_v1 = vadd.f32 %v4712_v24, %v4900_v41 }
 0x3d9   :  { %v3718_v36 = vpop.eup %3717  ;;  %v2766_v51 = vadd.f32 %v3708_v38, %v2734_v32  ;;  %3737 = vpow2.f32 %v2858_v48  ;;  %v4955_v3 = vpop.f32.mrb[69].mxu1  ;;  %v2889_v38 = vmul.f32 -1.442695, %v3432_v26  ;;  %v2859_v2 = vmul.f32 -1.442695, %v3438_v22  ;;  %v3892_v22 = vld [vmem:[#allocation7 + $0x70] sm:$0xff] }
 0x3da   :  { %v2119_v55 = vpop.f32.mrb[197].mxu0  ;;  %v3720_v61 = vpop.eup %3719  ;;  %3739 = vrcp.f32 %v2292_v42  ;;  %v2610_v63 = vmul.f32 %v3718_v36, %v4636_v58  ;;  %v2890_v32 = vmul.f32 -1.442695, %v3436_v1  ;;  %v3442_v26 = vadd.f32 %v4710_v19, %v4920_v29 }
 0x3db   :  { %v3722_v25 = vpop.eup %3721  ;;  %3741 = vrcp.f32 %v2514_v30  ;;  %2798 = vst [vmem:[#allocation11 + $0x60] sm:$0xff] %v2766_v51  ;;  %v2703_v6 = vsub.f32 %v3891_v5, %v3720_v61  ;;  %v4964_v48 = vpop.f32.mrb[70].mxu1  ;;  %v3440_v36 = vadd.f32 %v4712_v24, %v4912_v60 }
 0x3dc   :  { %v3724_v57 = vpop.eup %3723  ;;  %v2293_v56 = vadd.f32 1.0, %v3722_v25  ;;  %3743 = vtanh.f32 %v2641_v4  ;;  %v2642_v0 = vadd.f32 %v2610_v63, %v2068_v49  ;;  %v4966_v59 = vpop.f32.mrb[198].mxu0  ;;  %v2073_v4 = vadd.f32 %v4843_v45, %v4741_v47 }
 0x3dd   :  { %v3726_v58 = vpop.eup %3725  ;;  %3745 = vrcp.f32 %v2515_v46  ;;  %v2735_v9 = vmul.f32 %v3716_v40, %v2703_v6  ;;  %v4968_v35 = vpop.f32.mrb[71].mxu1  ;;  %v2860_v5 = vmul.f32 -1.442695, %v3442_v26  ;;  %v3446_v6 = vadd.f32 %v4710_v19, %v4932_v37  ;;  %v3893_v26 = vld [vmem:[#allocation7 + $0x78] sm:$0xff] }
 0x3de   :  { %v2124_v31 = vpop.f32.mrb[199].mxu0  ;;  %v3728_v20 = vpop.eup %3727  ;;  %3747 = vrcp.f32 %v2293_v56  ;;  %v2294_v11 = vadd.f32 1.0, %v3726_v58 }
 0x3df   :  { %v3730_v30 = vpop.eup %3729  ;;  %v2767_v41 = vadd.f32 %v3720_v61, %v2735_v9  ;;  %3749 = vpow2.f32 %v2889_v38  ;;  %v4977_v51 = vpop.f32.mrb[72].mxu1  ;;  %v2516_v61 = vadd.f32 1.0, %v3728_v20 }
 0x3e0   :  { %v3732_v42 = vpop.eup %3731  ;;  %3751 = vrcp.f32 %v2294_v11  ;;  %v2611_v40 = vmul.f32 %v3730_v30, %v4633_v43  ;;  %v4979_v46 = vpop.f32.mrb[200].mxu0  ;;  %v3444_v43 = vadd.f32 %v4712_v24, %v4924_v44  ;;  %v2078_v44 = vadd.f32 %v4856_v52, %v4741_v47 }
 0x3e1   :  { %v3734_v55 = vpop.eup %3733  ;;  %2799 = vst [vmem:[#allocation11 + $0x68] sm:$0xff] %v2767_v41  ;;  %3753 = vtanh.f32 %v2642_v0  ;;  %v4981_v49 = vpop.f32.mrb[73].mxu1  ;;  %v2891_v0 = vmul.f32 -1.442695, %v3440_v36  ;;  %v3450_v41 = vadd.f32 %v4710_v19, %v4940_v10  ;;  %v2861_v36 = vmul.f32 -1.442695, %v3446_v6 }
 0x3e2   :  { %v2129_v29 = vpop.f32.mrb[201].mxu0  ;;  %v3736_v63 = vpop.eup %3735  ;;  %v2704_v25 = vsub.f32 %v3892_v22, %v3734_v55  ;;  %v2643_v45 = vadd.f32 %v2611_v40, %v2073_v4  ;;  %3755 = vpow2.f32 %v2859_v2  ;;  %v2083_v10 = vadd.f32 %v4870_v33, %v4741_v47 }
 0x3e3   :  { %v3738_v60 = vpop.eup %3737  ;;  %3757 = vpow2.f32 %v2890_v32  ;;  %v4987_v58 = vpop.f32.mrb[74].mxu1  ;;  %v2517_v52 = vadd.f32 1.0, %v3736_v63  ;;  %v3454_v6 = vadd.f32 %v4710_v19, %v4951_v39 }
 0x3e4   :  { %v3740_v38 = vpop.eup %3739  ;;  %v2736_v1 = vmul.f32 %v3724_v57, %v2704_v25  ;;  %v2295_v56 = vadd.f32 1.0, %v3738_v60  ;;  %3759 = vtanh.f32 %v2643_v45  ;;  %v4989_v9 = vpop.f32.mrb[202].mxu0  ;;  %v2892_v57 = vmul.f32 -1.442695, %v3444_v43 }
 0x3e5   :  { %v3742_v31 = vpop.eup %3741  ;;  %3761 = vrcp.f32 %v2516_v61  ;;  %v2612_v20 = vmul.f32 %v3740_v38, %v4643_v28  ;;  %v4994_v11 = vpop.f32.mrb[75].mxu1  ;;  %v3448_v28 = vadd.f32 %v4712_v24, %v4938_v7  ;;  %v2088_v7 = vadd.f32 %v4882_v12, %v4741_v47 }
 0x3e6   :  { %v2134_v2 = vpop.f32.mrb[203].mxu0  ;;  %v3744_v37 = vpop.eup %3743  ;;  %v2768_v30 = vadd.f32 %v3734_v55, %v2736_v1  ;;  %3763 = vrcp.f32 %v2295_v56 }
 0x3e7   :  { %v3746_v32 = vpop.eup %3745  ;;  %v2705_v4 = vsub.f32 %v3893_v26, %v3744_v37  ;;  %v2644_v40 = vadd.f32 %v2612_v20, %v2078_v44  ;;  %3765 = vpow2.f32 %v2860_v5  ;;  %v5000_v29 = vpop.f32.mrb[76].mxu1  ;;  %v2862_v5 = vmul.f32 -1.442695, %v3450_v41 }
 0x3e8   :  { %v3748_v61 = vpop.eup %3747  ;;  %2800 = vst [vmem:[#allocation11 + $0x70] sm:$0xff] %v2768_v30  ;;  %3767 = vpow2.f32 %v2891_v0  ;;  %v5002_v55 = vpop.f32.mrb[204].mxu0  ;;  %v2893_v44 = vmul.f32 -1.442695, %v3448_v28 }
 0x3e9   :  { %v3750_v22 = vpop.eup %3749  ;;  %v2737_v25 = vmul.f32 %v3732_v42, %v2705_v4  ;;  %3769 = vtanh.f32 %v2644_v40  ;;  %v2613_v45 = vmul.f32 %v3748_v61, %v4640_v15  ;;  %v5007_v43 = vpop.f32.mrb[77].mxu1  ;;  %v3894_v15 = vld [vmem:[#allocation7 + $0x80] sm:$0xff]  ;;  %v3895_v40 = vld [vmem:[#allocation7 + $0x88] sm:$0xff]  ;;  %v3452_v61 = vadd.f32 %v4712_v24, %v4944_v18 }
 0x3ea   :  { %v2139_v60 = vpop.f32.mrb[205].mxu0  ;;  %v3752_v63 = vpop.eup %3751  ;;  %3771 = vpow2.f32 %v2892_v57  ;;  %v2518_v26 = vadd.f32 1.0, %v3750_v22  ;;  %v3458_v18 = vadd.f32 %v4710_v19, %v4964_v48 }
 0x3eb   :  { %v3754_v38 = vpop.eup %3753  ;;  %v2769_v42 = vadd.f32 %v3744_v37, %v2737_v25  ;;  %v2645_v1 = vadd.f32 %v2613_v45, %v2083_v10  ;;  %3773 = vpow2.f32 %v2861_v36  ;;  %v2614_v33 = vmul.f32 %v3752_v63, %v4650_v21  ;;  %v5014_v20 = vpop.f32.mrb[78].mxu1 }
 0x3ec   :  { %v3756_v56 = vpop.eup %3755  ;;  %3775 = vrcp.f32 %v2517_v52  ;;  %v2706_v0 = vsub.f32 %v3894_v15, %v3754_v38  ;;  %v5016_v2 = vpop.f32.mrb[206].mxu0  ;;  %v2863_v52 = vmul.f32 -1.442695, %v3454_v6  ;;  %v2093_v10 = vadd.f32 %v4898_v16, %v4741_v47  ;;  %v3896_v16 = vld [vmem:[#allocation7 + $0x90] sm:$0xff] }
 0x3ed   :  { %v3758_v12 = vpop.eup %3757  ;;  %2801 = vst [vmem:[#allocation11 + $0x78] sm:$0xff] %v2769_v42  ;;  %v2296_v30 = vadd.f32 1.0, %v3756_v56  ;;  %3777 = vtanh.f32 %v2645_v1  ;;  %v2646_v39 = vadd.f32 %v2614_v33, %v2088_v7  ;;  %v5018_v57 = vpop.f32.mrb[79].mxu1  ;;  %v3462_v56 = vadd.f32 %v4710_v19, %v4977_v51 }
 0x3ee   :  { %v2144_v37 = vpop.f32.mrb[207].mxu0  ;;  %v3760_v41 = vpop.eup %3759  ;;  %v2738_v21 = vmul.f32 %v3742_v31, %v2706_v0  ;;  %3779 = vpow2.f32 %v2862_v5  ;;  %v2519_v60 = vadd.f32 1.0, %v3758_v12  ;;  %v2864_v48 = vmul.f32 -1.442695, %v3458_v18 }
 0x3ef   :  { %v3762_v4 = vpop.eup %3761  ;;  %v2707_v36 = vsub.f32 %v3895_v40, %v3760_v41  ;;  %3781 = vrcp.f32 %v2296_v30  ;;  %v3456_v30 = vadd.f32 %v4712_v24, %v4955_v3  ;;  %v2865_v51 = vmul.f32 -1.442695, %v3462_v56  ;;  %v3899_v56 = vld [vmem:[#allocation7 + $0xa8] sm:$0xff] }
 0x3f0   :  { %v3764_v28 = vpop.eup %3763  ;;  %v2770_v25 = vadd.f32 %v3754_v38, %v2738_v21  ;;  %3783 = vpow2.f32 %v2893_v44  ;;  %v2894_v38 = vmul.f32 -1.442695, %v3452_v61 }
 0x3f1   :  { %v3766_v45 = vpop.eup %3765  ;;  %v2739_v63 = vmul.f32 %v3746_v32, %v2707_v36  ;;  %3785 = vtanh.f32 %v2646_v39  ;;  %v2615_v31 = vmul.f32 %v3764_v28, %v4647_v23  ;;  %v2098_v28 = vadd.f32 %v4908_v50, %v4741_v47 }
 0x3f2   :  { %v3768_v22 = vpop.eup %3767  ;;  %3787 = vrcp.f32 %v2518_v26  ;;  %2802 = vst [vmem:[#allocation11 + $0x80] sm:$0xff] %v2770_v25  ;;  %v2297_v7 = vadd.f32 1.0, %v3766_v45  ;;  %v3897_v26 = vld [vmem:[#allocation7 + $0x98] sm:$0xff]  ;;  %v3460_v45 = vadd.f32 %v4712_v24, %v4968_v35  ;;  %v2103_v35 = vadd.f32 %v4922_v14, %v4741_v47 }
 0x3f3   :  { %v3770_v5 = vpop.eup %3769  ;;  %v2771_v6 = vadd.f32 %v3760_v41, %v2739_v63  ;;  %v2647_v42 = vadd.f32 %v2615_v31, %v2093_v10  ;;  %3789 = vpow2.f32 %v2863_v52  ;;  %v2520_v23 = vadd.f32 1.0, %v3768_v22  ;;  %v3898_v31 = vld [vmem:[#allocation7 + $0xa0] sm:$0xff] }
 0x3f4   :  { %v3772_v1 = vpop.eup %3771  ;;  %v2708_v33 = vsub.f32 %v3896_v16, %v3770_v5  ;;  %3791 = vrcp.f32 %v2297_v7  ;;  %v2895_v10 = vmul.f32 -1.442695, %v3456_v30  ;;  %v2108_v14 = vadd.f32 %v4934_v17, %v4741_v47 }
 0x3f5   :  { %v3774_v32 = vpop.eup %3773  ;;  %3793 = vrcp.f32 %v2519_v60  ;;  %2803 = vst [vmem:[#allocation11 + $0x88] sm:$0xff] %v2771_v6  ;;  %v2521_v41 = vadd.f32 1.0, %v3772_v1 }
 0x3f6   :  { %v3776_v15 = vpop.eup %3775  ;;  %v2740_v0 = vmul.f32 %v3762_v4, %v2708_v33  ;;  %v2298_v44 = vadd.f32 1.0, %v3774_v32  ;;  %3795 = vtanh.f32 %v2647_v42  ;;  %v3466_v4 = vadd.f32 %v4710_v19, %v4987_v58 }
 0x3f7   :  { %v3778_v12 = vpop.eup %3777  ;;  %3797 = vpow2.f32 %v2894_v38  ;;  %v3470_v38 = vadd.f32 %v4710_v19, %v5000_v29  ;;  %v2896_v32 = vmul.f32 -1.442695, %v3460_v45 }
 0x3f8   :  { %v3780_v39 = vpop.eup %3779  ;;  %v2772_v37 = vadd.f32 %v3770_v5, %v2740_v0  ;;  %v2709_v21 = vsub.f32 %v3897_v26, %v3778_v12  ;;  %3799 = vrcp.f32 %v2298_v44  ;;  %v2866_v5 = vmul.f32 -1.442695, %v3466_v4 }
 0x3f9   :  { %v3782_v40 = vpop.eup %3781  ;;  %3801 = vrcp.f32 %v2520_v23  ;;  %v2299_v36 = vadd.f32 1.0, %v3780_v39  ;;  %v2867_v29 = vmul.f32 -1.442695, %v3470_v38  ;;  %v3464_v39 = vadd.f32 %v4712_v24, %v4981_v49 }
 0x3fa   :  { %v3784_v61 = vpop.eup %3783  ;;  %2804 = vst [vmem:[#allocation11 + $0x90] sm:$0xff] %v2772_v37  ;;  %v2741_v52 = vmul.f32 %v3776_v15, %v2709_v21  ;;  %v2616_v3 = vmul.f32 %v3782_v40, %v4657_v13  ;;  %3803 = vpow2.f32 %v2864_v48  ;;  %v3474_v37 = vadd.f32 %v4710_v19, %v5014_v20 }
 0x3fb   :  { %v3786_v25 = vpop.eup %3785  ;;  %3805 = vrcp.f32 %v2299_v36  ;;  %v2522_v18 = vadd.f32 1.0, %v3784_v61  ;;  %v3468_v4 = vadd.f32 %v4712_v24, %v4994_v11  ;;  %v2897_v20 = vmul.f32 -1.442695, %v3464_v39 }
 0x3fc   :  { %v3788_v60 = vpop.eup %3787  ;;  %3807 = vrcp.f32 %v2521_v41  ;;  %v2773_v63 = vadd.f32 %v3778_v12, %v2741_v52  ;;  %v2710_v58 = vsub.f32 %v3898_v31, %v3786_v25  ;;  %v2648_v22 = vadd.f32 %v2616_v3, %v2098_v28  ;;  %v3900_v3 = vld [vmem:[#allocation7 + $0xb0] sm:$0xff] }
 0x3fd   :  { %v3790_v7 = vpop.eup %3789  ;;  %3809 = vpow2.f32 %v2865_v51  ;;  %v2898_v45 = vmul.f32 -1.442695, %v3468_v4 }
 0x3fe   :  { %v3792_v50 = vpop.eup %3791  ;;  %2805 = vst [vmem:[#allocation11 + $0x98] sm:$0xff] %v2773_v63  ;;  %v2742_v13 = vmul.f32 %v3788_v60, %v2710_v58  ;;  %v2300_v6 = vadd.f32 1.0, %v3790_v7  ;;  %3811 = vtanh.f32 %v2648_v22  ;;  %v2118_v63 = vadd.f32 %v4953_v34, %v4741_v47 }
 0x3ff   :  { %v3794_v42 = vpop.eup %3793  ;;  %3813 = vpow2.f32 %v2895_v10  ;;  %v2617_v1 = vmul.f32 %v3792_v50, %v4654_v54  ;;  %v2868_v10 = vmul.f32 -1.442695, %v3474_v37 }
 0x400   :  { %v3796_v16 = vpop.eup %3795  ;;  %v2774_v33 = vadd.f32 %v3786_v25, %v2742_v13  ;;  %3815 = vrcp.f32 %v2300_v6  ;;  %v3901_v6 = vld [vmem:[#allocation7 + $0xb8] sm:$0xff] }
 0x401   :  { %v3798_v23 = vpop.eup %3797  ;;  %3817 = vrcp.f32 %v2522_v18  ;;  %v2711_v15 = vsub.f32 %v3899_v56, %v3796_v16  ;;  %v2649_v0 = vadd.f32 %v2617_v1, %v2103_v35  ;;  %v3476_v1 = vadd.f32 %v4712_v24, %v5018_v57  ;;  %v5106_v57 = vld [vmem:[#allocation18_spill] sm:$0xff] }
 0x402   :  { %v3800_v44 = vpop.eup %3799  ;;  %2806 = vst [vmem:[#allocation11 + $0xa0] sm:$0xff] %v2774_v33  ;;  %3819 = vpow2.f32 %v2866_v5  ;;  %v2523_v26 = vadd.f32 1.0, %v3798_v23  ;;  %v5105_v23 = vld [vmem:[#allocation16_spill] sm:$0xff] }
 0x403   :  { %v3802_v48 = vpop.eup %3801  ;;  %v2743_v12 = vmul.f32 %v3794_v42, %v2711_v15  ;;  %3821 = vtanh.f32 %v2649_v0  ;;  %v2618_v54 = vmul.f32 %v3800_v44, %v4664_v62  ;;  %v2113_v62 = vadd.f32 %v4942_v27, %v4741_v47  ;;  %v3902_v0 = vld [vmem:[#allocation7 + $0xc0] sm:$0xff] }
 0x404   :  { %v3804_v30 = vpop.eup %3803  ;;  %3823 = vpow2.f32 %v2896_v32  ;;  %v2123_v32 = vadd.f32 %v4966_v59, %v4741_v47  ;;  %v3903_v59 = vld [vmem:[#allocation7 + $0xc8] sm:$0xff] }
 0x405   :  { %v3806_v41 = vpop.eup %3805  ;;  %v2775_v21 = vadd.f32 %v3796_v16, %v2743_v12  ;;  %v2301_v40 = vadd.f32 1.0, %v3804_v30  ;;  %v2650_v36 = vadd.f32 %v2618_v54, %v2108_v14  ;;  %3825 = vpow2.f32 %v2867_v29 }
 0x406   :  { %v3808_v51 = vpop.eup %3807  ;;  %v2619_v17 = vmul.f32 %v3806_v41, %v4661_v53  ;;  %v3472_v53 = vadd.f32 %v4712_v24, %v5007_v43  ;;  %v2900_v30 = vmul.f32 -1.442695, %v3476_v1  ;;  %v2128_v24 = vadd.f32 %v4979_v46, %v4741_v47 }
 0x407   :  { %v3810_v61 = vpop.eup %3809  ;;  %2807 = vst [vmem:[#allocation11 + $0xa8] sm:$0xff] %v2775_v21  ;;  %3827 = vrcp.f32 %v2301_v40  ;;  %v2133_v46 = vadd.f32 %v4989_v9, %v4741_v47 }
 0x408   :  { %v3812_v49 = vpop.eup %3811  ;;  %v2302_v19 = vadd.f32 1.0, %v3810_v61  ;;  %3829 = vtanh.f32 %v2650_v36  ;;  %v2651_v52 = vadd.f32 %v2619_v17, %v2113_v62  ;;  %v2899_v43 = vmul.f32 -1.442695, %v3472_v53 }
 0x409   :  { %v3814_v28 = vpop.eup %3813  ;;  %3831 = vrcp.f32 %v2523_v26  ;;  %v2712_v25 = vsub.f32 %v3900_v3, %v3812_v49 }
 0x40a   :  { %v3816_v11 = vpop.eup %3815  ;;  %3833 = vrcp.f32 %v2302_v19  ;;  %v2524_v22 = vadd.f32 1.0, %v3814_v28  ;;  %v5107_v19 = vld [vmem:[#allocation17_spill] sm:$0xff]  ;;  %v3904_v28 = vld [vmem:[#allocation7 + $0xd0] sm:$0xff] }
 0x40b   :  { %v3818_v27 = vpop.eup %3817  ;;  %v2744_v60 = vmul.f32 %v3802_v48, %v2712_v25  ;;  %3835 = vtanh.f32 %v2651_v52  ;;  %v2620_v31 = vmul.f32 %v3816_v11, %v4671_v8 }
 0x40c   :  { %v3820_v58 = vpop.eup %3819  ;;  %3837 = vpow2.f32 %v2897_v20 }
 0x40d   :  { %v3822_v7 = vpop.eup %3821  ;;  %v2776_v18 = vadd.f32 %v3812_v49, %v2744_v60  ;;  %v2303_v5 = vadd.f32 1.0, %v3820_v58  ;;  %v2652_v50 = vadd.f32 %v2620_v31, %v2118_v63  ;;  %3839 = vpow2.f32 %v2868_v10  ;;  %v5108_v60 = vld [vmem:[#allocation20_spill] sm:$0xff] }
 0x40e   :  { %v3824_v13 = vpop.eup %3823  ;;  %v2713_v38 = vsub.f32 %v3901_v6, %v3822_v7  ;;  %3841 = vpow2.f32 %v2898_v45 }
 0x40f   :  { %2808 = vst [vmem:[#allocation11 + $0xb0] sm:$0xff] %v2776_v18  ;;  %3843 = vrcp.f32 %v2303_v5  ;;  %v3826_v42 = vpop.eup %3825  ;;  %v2525_v48 = vadd.f32 1.0, %v3824_v13 }
 0x410   :  { %v2745_v35 = vmul.f32 %v3808_v51, %v2713_v38  ;;  %3845 = vtanh.f32 %v2652_v50  ;;  %v2304_v8 = vadd.f32 1.0, %v3826_v42  ;;  %v5109_v42 = vld [vmem:[#allocation19_spill] sm:$0xff] }
 0x411   :  { %v3828_v34 = vpop.eup %3827  ;;  %3847 = vrcp.f32 %v2524_v22 }
 0x412   :  { %v3830_v16 = vpop.eup %3829  ;;  %v2777_v33 = vadd.f32 %v3822_v7, %v2745_v35  ;;  %3849 = vpow2.f32 %v2899_v43  ;;  %v2621_v56 = vmul.f32 %v3828_v34, %v5105_v23  ;;  %v3905_v7 = vld [vmem:[#allocation7 + $0xd8] sm:$0xff]  ;;  %v3906_v34 = vld [vmem:[#allocation7 + $0xe0] sm:$0xff] }
 0x413   :  { %v3832_v15 = vpop.eup %3831  ;;  %v2714_v44 = vsub.f32 %v3902_v0, %v3830_v16  ;;  %3851 = vrcp.f32 %v2304_v8 }
 0x414   :  { %v3834_v29 = vpop.eup %3833  ;;  %2809 = vst [vmem:[#allocation11 + $0xb8] sm:$0xff] %v2777_v33  ;;  %v2653_v12 = vadd.f32 %v2621_v56, %v2123_v32 }
 0x415   :  { %v3836_v14 = vpop.eup %3835  ;;  %v2746_v54 = vmul.f32 %v3818_v27, %v2714_v44  ;;  %v2622_v39 = vmul.f32 %v3834_v29, %v5106_v57  ;;  %v2138_v27 = vadd.f32 %v5002_v55, %v4741_v47  ;;  %v2143_v55 = vadd.f32 %v5016_v2, %v4741_v47  ;;  %v3908_v47 = vld [vmem:[#allocation7 + $0xf0] sm:$0xff]  ;;  %v3909_v57 = vld [vmem:[#allocation7 + $0xf8] sm:$0xff] }
 0x416   :  { %v3838_v37 = vpop.eup %3837  ;;  %v2715_v41 = vsub.f32 %v3903_v59, %v3836_v14  ;;  %3853 = vtanh.f32 %v2653_v12 }
 0x417   :  { %v3840_v26 = vpop.eup %3839  ;;  %v2778_v21 = vadd.f32 %v3830_v16, %v2746_v54  ;;  %v2654_v40 = vadd.f32 %v2622_v39, %v2128_v24  ;;  %3855 = vrcp.f32 %v2525_v48  ;;  %v2526_v17 = vadd.f32 1.0, %v3838_v37 }
 0x418   :  { %v3842_v36 = vpop.eup %3841  ;;  %v2747_v51 = vmul.f32 %v3832_v15, %v2715_v41  ;;  %v2305_v4 = vadd.f32 1.0, %v3840_v26  ;;  %3857 = vpow2.f32 %v2900_v30  ;;  %v3907_v15 = vld [vmem:[#allocation7 + $0xe8] sm:$0xff] }
 0x419   :  { %v3844_v62 = vpop.eup %3843  ;;  %2810 = vst [vmem:[#allocation11 + $0xc0] sm:$0xff] %v2778_v21  ;;  %v2527_v45 = vadd.f32 1.0, %v3842_v36 }
 0x41a   :  { %v3846_v61 = vpop.eup %3845  ;;  %v2779_v49 = vadd.f32 %v3836_v14, %v2747_v51  ;;  %3859 = vrcp.f32 %v2305_v4  ;;  %v2623_v20 = vmul.f32 %v3844_v62, %v5107_v19 }
 0x41b   :  { %v3848_v52 = vpop.eup %3847  ;;  %v2716_v3 = vsub.f32 %v3904_v28, %v3846_v61  ;;  %3861 = vtanh.f32 %v2654_v40 }
 0x41c   :  { %v3850_v25 = vpop.eup %3849  ;;  %2811 = vst [vmem:[#allocation11 + $0xc8] sm:$0xff] %v2779_v49  ;;  %v2655_v10 = vadd.f32 %v2623_v20, %v2133_v46  ;;  %3863 = vrcp.f32 %v2526_v17 }
 0x41d   :  { %v3852_v11 = vpop.eup %3851  ;;  %v2748_v53 = vmul.f32 %v3848_v52, %v2716_v3  ;;  %v2528_v58 = vadd.f32 1.0, %v3850_v25 }
 0x41e   :  { %v2624_v63 = vmul.f32 %v3852_v11, %v5108_v60  ;;  %3865 = vtanh.f32 %v2655_v10 }
 0x41f   :  { %v2780_v31 = vadd.f32 %v3846_v61, %v2748_v53  ;;  %3867 = vrcp.f32 %v2527_v45 }
 0x420   :  { %v3854_v9 = vpop.eup %3853  ;;  %v2656_v22 = vadd.f32 %v2624_v63, %v2138_v27 }
 0x421   :  { %2812 = vst [vmem:[#allocation11 + $0xd0] sm:$0xff] %v2780_v31  ;;  %v2717_v18 = vsub.f32 %v3905_v7, %v3854_v9  ;;  %v3856_v5 = vpop.eup %3855 }
 0x422   :  { %3869 = vtanh.f32 %v2656_v22  ;;  %v3858_v50 = vpop.eup %3857 }
 0x423   :  { %v2749_v13 = vmul.f32 %v3856_v5, %v2717_v18  ;;  %3871 = vrcp.f32 %v2528_v58  ;;  %v2529_v16 = vadd.f32 1.0, %v3858_v50 }
 0x424   :  { %v3860_v6 = vpop.eup %3859 }
 0x425   :  { %v3862_v38 = vpop.eup %3861  ;;  %v2781_v43 = vadd.f32 %v3854_v9, %v2749_v13  ;;  %v2625_v35 = vmul.f32 %v3860_v6, %v5109_v42 }
 0x426   :  { %v2718_v8 = vsub.f32 %v3906_v34, %v3862_v38  ;;  %v3864_v1 = vpop.eup %3863 }
 0x427   :  { %2813 = vst [vmem:[#allocation11 + $0xd8] sm:$0xff] %v2781_v43  ;;  %v2657_v33 = vadd.f32 %v2625_v35, %v2143_v55 }
 0x428   :  { %v2750_v32 = vmul.f32 %v3864_v1, %v2718_v8  ;;  %v3866_v23 = vpop.eup %3865 }
 0x429   :  { %3873 = vtanh.f32 %v2657_v33  ;;  %v2719_v0 = vsub.f32 %v3907_v15, %v3866_v23  ;;  %v3868_v44 = vpop.eup %3867 }
 0x42a   :  { %v2782_v56 = vadd.f32 %v3862_v38, %v2750_v32  ;;  %3875 = vrcp.f32 %v2529_v16 }
 0x42b   :  { %v2751_v48 = vmul.f32 %v3868_v44, %v2719_v0 }
 0x42c   :  { %v3870_v29 = vpop.eup %3869  ;;  %2814 = vst [vmem:[#allocation11 + $0xe0] sm:$0xff] %v2782_v56 }
 0x42d   :  { %v2720_v2 = vsub.f32 %v3908_v47, %v3870_v29  ;;  %v3872_v12 = vpop.eup %3871  ;;  %v2783_v14 = vadd.f32 %v3866_v23, %v2751_v48 }
 0x42f   :  { %v2752_v54 = vmul.f32 %v3872_v12, %v2720_v2  ;;  %2815 = vst [vmem:[#allocation11 + $0xe8] sm:$0xff] %v2783_v14 }
 0x431   :  { %v2784_v30 = vadd.f32 %v3870_v29, %v2752_v54 }
 0x433   :  { %v3874_v24 = vpop.eup %3873  ;;  %2816 = vst [vmem:[#allocation11 + $0xf0] sm:$0xff] %v2784_v30 }
 0x434   :  { %v2721_v39 = vsub.f32 %v3909_v57, %v3874_v24  ;;  %v3876_v37 = vpop.eup %3875 }
 0x436   :  { %v2753_v59 = vmul.f32 %v3876_v37, %v2721_v39 }
 0x438   :  { %v2785_v41 = vadd.f32 %v3874_v24, %v2753_v59 }
 0x43a   :  { %2817 = vst [vmem:[#allocation11 + $0xf8] sm:$0xff] %v2785_v41 }
 0x43b   :  { %4031 = shalt.err (!%p4028_p2)
}
 0x43c   :  { %s4032_s26 = scalar_lea.hbm %s5099_s7, 4096 }
 0x43d   :  { %p4033_p3 = scmp.ne.s32.totalorder %s5099_s7, %s4032_s26  ;;  %p4036_p4 = scmp.lt.u32.totalorder %s4032_s26, %s5099_s7 }
 0x43f   :  { %p4038_p5 = pnand %p4036_p4, %p4033_p3 }
 0x441   :  { %4041 = shalt.err (!%p4038_p5)
}
 0x442   :  { %2829 = dma.vmem_to_hbm [thread:$0]  %s2824_s6, 4096, %s5099_s7, [#allocation4], %s4058_s0, %s4058_s0, %s4059_s13  }
 0x443   :  { %4048 = dma.done.wait [#allocation4], 4096  }
 0x444   :  { %4049 = vsyncadd [#allocation4], 4294963200 }
 0x445   :  { %2833 = vsyncpa [#allocation3], 1 }
 0x446   :  { %2834 = vsyncpa [#allocation6], 1 }
 0x447   :  { %2835 = vsyncpa [#allocation9], 1 }
 0x448   :  { %2836 = vsyncpa [#allocation4], 1 }

</bundles_post_ra>
